<compile_context>
chip_gen: v7x
topology: tpu7x:2x2x1
jax: 0.10.0
libtpu: 0.0.40
codegen_flags: <defaults>
</compile_context>

<pallas_src>
from functools import partial

import jax
import jax.numpy as jnp
from jax.experimental import pallas as pl
from jax.experimental.pallas import tpu as pltpu


# ----------------------------- Pallas kernel --------------------------------

def convlstm_seq_kernel(x_ref, wx_ref, wh_ref, b_ref, h_out_ref,
                        xpad_ref, hpad_ref, c_ref, *, H, W, Cin, Ch):
    """One ConvLSTM layer; the time recurrence runs inside the kernel.

    Grid = (B, T).  T is the inner ("arbitrary") axis so the h/c scratch carries
    the recurrence; B is "parallel" (megacore-splittable; state reset at t == 0).

    x_ref     : [H, W, Cin]      bf16  current frame (block of [B,T,H,W,Cin])
    wx_ref    : [9, Cin, 4*Ch]   bf16  per-tap input->gates weights (i,f,o,g)
    wh_ref    : [9, Ch, 4*Ch]    bf16  per-tap hidden->gates weights
    b_ref     : [1, 4*Ch]        f32   gate bias
    h_out_ref : [H*W, Ch]              hidden state for this (b, t)
    xpad_ref  : [H+2, W+2, Cin]  bf16  zero-padded frame buffer     (scratch)
    hpad_ref  : [H+2, W+2, Ch]   bf16  zero-padded h_{t-1} buffer   (scratch)
    c_ref     : [H*W, Ch]        f32   cell state                   (scratch)
    """
    t = pl.program_id(1)
    G = 4 * Ch
    HW = H * W

    @pl.when(t == 0)
    def _():
        # New sequence for this batch element: zero state and padded borders.
        xpad_ref[...] = jnp.zeros_like(xpad_ref)
        hpad_ref[...] = jnp.zeros_like(hpad_ref)
        c_ref[...] = jnp.zeros_like(c_ref)

    # Drop the current frame into the interior of the padded buffer.
    xpad_ref[1:H + 1, 1:W + 1, :] = x_ref[...]

    # 3x3 'same' conv of concat([x_t, h_{t-1}]) == sum over 9 taps of two matmuls.
    acc = jnp.zeros((HW, G), jnp.float32)
    for tap in range(9):
        dy, dx = divmod(tap, 3)
        xw = xpad_ref[dy:dy + H, dx:dx + W, :].reshape(HW, Cin)
        hw = hpad_ref[dy:dy + H, dx:dx + W, :].reshape(HW, Ch)
        acc += jnp.dot(xw, wx_ref[tap], preferred_element_type=jnp.float32)
        acc += jnp.dot(hw, wh_ref[tap], preferred_element_type=jnp.float32)
    pre = acc + b_ref[...]                                   # [HW, 4*Ch] f32

    # Gates (order i, f, o, g).  sigmoid(z) = 0.5*(tanh(0.5*z)+1): 1 EUP op/gate.
    def sig(z):
        return 0.5 * (jnp.tanh(0.5 * z) + 1.0)

    i = sig(pre[:, 0 * Ch:1 * Ch])
    f = sig(pre[:, 1 * Ch:2 * Ch])
    o = sig(pre[:, 2 * Ch:3 * Ch])
    g = jnp.tanh(pre[:, 3 * Ch:4 * Ch])

    c_new = f * c_ref[...] + i * g
    h_new = o * jnp.tanh(c_new)

    c_ref[...] = c_new
    hpad_ref[1:H + 1, 1:W + 1, :] = h_new.reshape(H, W, Ch).astype(hpad_ref.dtype)
    h_out_ref[...] = h_new.astype(h_out_ref.dtype)


# ------------------------------- wrappers ------------------------------------

def run_convlstm_layer(x_seq, wx, wh, bias, *, out_dtype=jnp.bfloat16):
    """x_seq: [B, T, H, W, Cin] -> all hidden states h_seq: [B, T, H*W, Ch]."""
    B, T, H, W, Cin = x_seq.shape
    Ch = wh.shape[1]
    G = 4 * Ch
    kernel = partial(convlstm_seq_kernel, H=H, W=W, Cin=Cin, Ch=Ch)
    return pl.pallas_call(
        kernel,
        out_shape=jax.ShapeDtypeStruct((B, T, H * W, Ch), out_dtype),
        grid_spec=pltpu.PrefetchScalarGridSpec(
            num_scalar_prefetch=0,
            grid=(B, T),
            in_specs=[
                pl.BlockSpec((None, None, H, W, Cin), lambda b, t: (b, t, 0, 0, 0)),
                pl.BlockSpec((9, Cin, G), lambda b, t: (0, 0, 0)),   # VMEM-resident
                pl.BlockSpec((9, Ch, G), lambda b, t: (0, 0, 0)),    # VMEM-resident
                pl.BlockSpec((1, G), lambda b, t: (0, 0)),           # VMEM-resident
            ],
            out_specs=pl.BlockSpec((None, None, H * W, Ch), lambda b, t: (b, t, 0, 0)),
            scratch_shapes=[
                pltpu.VMEM((H + 2, W + 2, Cin), jnp.bfloat16),       # padded x_t
                pltpu.VMEM((H + 2, W + 2, Ch), jnp.bfloat16),        # padded h_{t-1}
                pltpu.VMEM((H * W, Ch), jnp.float32),                # cell state
            ],
        ),
        compiler_params=pltpu.CompilerParams(
            dimension_semantics=("parallel", "arbitrary"),
            vmem_limit_bytes=32 * 1024 * 1024,   # safe on v7x's 64 MiB physical VMEM
        ),
    )(x_seq.astype(jnp.bfloat16), wx, wh, bias)


def init_convlstm_params(key, in_ch, hidden):
    """Synthetic init; weights stored per-tap: wx [9,Cin,4*Ch], wh [9,Ch,4*Ch] (bf16)."""
    k1, k2, k3 = jax.random.split(key, 3)
    fan_in = 9 * (in_ch + hidden)
    wx = (jax.random.normal(k1, (9, in_ch, 4 * hidden), jnp.float32)
          / jnp.sqrt(fan_in)).astype(jnp.bfloat16)
    wh = (jax.random.normal(k2, (9, hidden, 4 * hidden), jnp.float32)
          / jnp.sqrt(fan_in)).astype(jnp.bfloat16)
    b = jax.random.normal(k3, (1, 4 * hidden), jnp.float32) * 0.01
    return wx, wh, b


def make_discrete_encoder(in_channels, clstm_hidden, seed=0):
    """Params + forward for DiscreteEncoder (primary + secondary ConvLSTM blocks)."""
    key = jax.random.PRNGKey(seed)
    k1, k2 = jax.random.split(key)
    p1 = init_convlstm_params(k1, in_channels, clstm_hidden[0])
    p2 = init_convlstm_params(k2, clstm_hidden[0], clstm_hidden[1])
    params = (p1, p2)

    @jax.jit
    def forward(x_nchw):
        # x_nchw : [B, T, C, H, W]  (PyTorch batch_first ConvLSTM convention)
        B, T, C, H, W = x_nchw.shape
        x = jnp.moveaxis(x_nchw, 2, -1)                               # [B,T,H,W,C]
        h1 = run_convlstm_layer(x, *p1, out_dtype=jnp.bfloat16)       # primary
        h1 = h1.reshape(B, T, H, W, clstm_hidden[0])
        h2 = run_convlstm_layer(h1, *p2, out_dtype=jnp.float32)       # secondary
        h2 = h2.reshape(B, T, H, W, clstm_hidden[1])
        # TODO(synk): forward_simple / forward_redundant heads are not in the given
        # source; return the secondary ConvLSTM's full hidden-state sequence (NCHW).
        return jnp.moveaxis(h2, -1, 2)                                # [B,T,Ch2,H,W]

    return forward, params


# -------------------------- pure-JAX f32 reference ----------------------------

def _ref_layer(x_seq, wx, wh, bias, hidden):
    B, T, H, W, _ = x_seq.shape
    wx = wx.astype(jnp.float32)
    wh = wh.astype(jnp.float32)

    def conv3x3(a, w):                                   # a:[B,H,W,C], w:[9,C,G]
        ap = jnp.pad(a, ((0, 0), (1, 1), (1, 1), (0, 0)))
        out = jnp.zeros(a.shape[:3] + (w.shape[-1],), jnp.float32)
        for tap in range(9):
            dy, dx = divmod(tap, 3)
            out = out + jnp.einsum('bhwc,cg->bhwg',
                                   ap[:, dy:dy + H, dx:dx + W, :], w[tap])
        return out

    h = jnp.zeros((B, H, W, hidden), jnp.float32)
    c = jnp.zeros((B, H, W, hidden), jnp.float32)
    hs = []
    for t in range(T):
        pre = conv3x3(x_seq[:, t].astype(jnp.float32), wx) + conv3x3(h, wh) + bias[0]
        i = jax.nn.sigmoid(pre[..., 0 * hidden:1 * hidden])
        f = jax.nn.sigmoid(pre[..., 1 * hidden:2 * hidden])
        o = jax.nn.sigmoid(pre[..., 2 * hidden:3 * hidden])
        g = jnp.tanh(pre[..., 3 * hidden:4 * hidden])
        c = f * c + i * g
        h = o * jnp.tanh(c)
        hs.append(h)
    return jnp.stack(hs, axis=1)                          # [B,T,H,W,hidden]


def reference_forward(params, x_nchw, clstm_hidden):
    (wx1, wh1, b1), (wx2, wh2, b2) = params
    x = jnp.moveaxis(x_nchw, 2, -1)
    h1 = _ref_layer(x, wx1, wh1, b1, clstm_hidden[0])
    h2 = _ref_layer(h1, wx2, wh2, b2, clstm_hidden[1])
    return jnp.moveaxis(h2, -1, 2)


# --------------------------------- main ---------------------------------------

if __name__ == "__main__":
    # Small shapes consistent with the module (window=T, conv_n_feats[n_convBlocks]=Cin).
    B, T, Cin, H, W = 2, 4, 4, 8, 8
    clstm_hidden = [16, 32]

    key = jax.random.PRNGKey(0)
    x = jax.random.normal(key, (B, T, Cin, H, W), jnp.float32)

    forward, params = make_discrete_encoder(Cin, clstm_hidden, seed=0)
    out = forward(x)
    jax.block_until_ready(out)

    assert out.shape == (B, T, clstm_hidden[1], H, W), out.shape
    assert bool(jnp.all(jnp.isfinite(out)))

    # Numerical sanity check vs a pure-JAX f32 reference (kernel uses bf16 operands).
    ref = reference_forward(params, x, clstm_hidden)
    diff = jnp.abs(out.astype(jnp.float32) - ref)
    assert float(jnp.max(diff)) < 0.3 and float(jnp.mean(diff)) < 0.03, (
        float(jnp.max(diff)), float(jnp.mean(diff)))

    print("KERNEL_OK")
</pallas_src>

<mosaic_0001>
module attributes {stable_mosaic.version = 11 : i64} {
  func.func @convlstm_seq_kernel(%arg0: i32, %arg1: i32, %arg2: memref<1x1x8x8x4xbf16, #tpu.memory_space<vmem>>, %arg3: memref<9x4x64xbf16, #tpu.memory_space<vmem>>, %arg4: memref<9x16x64xbf16, #tpu.memory_space<vmem>>, %arg5: memref<1x64xf32, #tpu.memory_space<vmem>>, %arg6: memref<1x1x64x16xbf16, #tpu.memory_space<vmem>>, %arg7: memref<10x10x4xbf16, #tpu.memory_space<vmem>>, %arg8: memref<10x10x16xbf16, #tpu.memory_space<vmem>>, %arg9: memref<64x16xf32, #tpu.memory_space<vmem>>) attributes {dimension_semantics = [#tpu.dimension_semantics<parallel>, #tpu.dimension_semantics<arbitrary>], iteration_bounds = array<i64: 2, 4>, scalar_prefetch = 0 : i64, scratch_operands = 3 : i64, tpu.core_type = #tpu.core_type<tc>, window_params = [{transform_indices = @transform_0, window_bounds = array<i64: 1, 1, 8, 8, 4>}, {pipeline_mode = #tpu.pipeline_mode<synchronous>, transform_indices = @transform_1, window_bounds = array<i64: 9, 4, 64>}, {pipeline_mode = #tpu.pipeline_mode<synchronous>, transform_indices = @transform_2, window_bounds = array<i64: 9, 16, 64>}, {pipeline_mode = #tpu.pipeline_mode<synchronous>, transform_indices = @transform_3, window_bounds = array<i64: 1, 64>}, {transform_indices = @transform_4, window_bounds = array<i64: 1, 1, 64, 16>}]} {
    %c0_i32 = arith.constant 0 : i32
    %0 = arith.cmpi eq, %arg1, %c0_i32 : i32
    %1 = arith.extui %0 : i1 to i32
    %c0_i32_0 = arith.constant 0 : i32
    %2 = arith.cmpi ne, %1, %c0_i32_0 : i32
    scf.if %2 {
      %cst_148 = arith.constant 0.000000e+00 : bf16
      %158 = vector.broadcast %cst_148 : bf16 to vector<10x10x4xbf16>
      %c0_149 = arith.constant 0 : index
      %c0_150 = arith.constant 0 : index
      %c0_151 = arith.constant 0 : index
      %159 = vector.load %arg7[%c0_149, %c0_150, %c0_151] : memref<10x10x4xbf16, #tpu.memory_space<vmem>>, vector<10x10x4xbf16>
      tpu.vector_store %arg7[%c0_149, %c0_150, %c0_151], %158 {strides = array<i32>} : memref<10x10x4xbf16, #tpu.memory_space<vmem>>, vector<10x10x4xbf16>,
      %cst_152 = arith.constant 0.000000e+00 : bf16
      %160 = vector.broadcast %cst_152 : bf16 to vector<10x10x16xbf16>
      %c0_153 = arith.constant 0 : index
      %c0_154 = arith.constant 0 : index
      %c0_155 = arith.constant 0 : index
      %161 = vector.load %arg8[%c0_153, %c0_154, %c0_155] : memref<10x10x16xbf16, #tpu.memory_space<vmem>>, vector<10x10x16xbf16>
      tpu.vector_store %arg8[%c0_153, %c0_154, %c0_155], %160 {strides = array<i32>} : memref<10x10x16xbf16, #tpu.memory_space<vmem>>, vector<10x10x16xbf16>,
      %cst_156 = arith.constant 0.000000e+00 : f32
      %162 = vector.broadcast %cst_156 : f32 to vector<64x16xf32>
      %c0_157 = arith.constant 0 : index
      %c0_158 = arith.constant 0 : index
      %163 = vector.load %arg9[%c0_157, %c0_158] : memref<64x16xf32, #tpu.memory_space<vmem>>, vector<64x16xf32>
      tpu.vector_store %arg9[%c0_157, %c0_158], %162 {strides = array<i32>} : memref<64x16xf32, #tpu.memory_space<vmem>>, vector<64x16xf32>,
    } else {
    }
    %c0 = arith.constant 0 : index
    %c0_1 = arith.constant 0 : index
    %c0_2 = arith.constant 0 : index
    %c0_3 = arith.constant 0 : index
    %c0_4 = arith.constant 0 : index
    %3 = vector.load %arg2[%c0, %c0_1, %c0_2, %c0_3, %c0_4] : memref<1x1x8x8x4xbf16, #tpu.memory_space<vmem>>, vector<1x1x8x8x4xbf16>
    %4 = vector.shape_cast %3 : vector<1x1x8x8x4xbf16> to vector<8x8x4xbf16>
    %c1 = arith.constant 1 : index
    %c1_5 = arith.constant 1 : index
    %c0_6 = arith.constant 0 : index
    %5 = vector.load %arg7[%c1, %c1_5, %c0_6] : memref<10x10x4xbf16, #tpu.memory_space<vmem>>, vector<8x8x4xbf16>
    tpu.vector_store %arg7[%c1, %c1_5, %c0_6], %4 {strides = array<i32>} : memref<10x10x4xbf16, #tpu.memory_space<vmem>>, vector<8x8x4xbf16>,
    %cst = arith.constant 0.000000e+00 : f32
    %6 = vector.broadcast %cst : f32 to vector<64x64xf32>
    %c0_7 = arith.constant 0 : index
    %c0_8 = arith.constant 0 : index
    %c0_9 = arith.constant 0 : index
    %7 = vector.load %arg7[%c0_7, %c0_8, %c0_9] : memref<10x10x4xbf16, #tpu.memory_space<vmem>>, vector<8x8x4xbf16>
    %8 = vector.shape_cast %7 : vector<8x8x4xbf16> to vector<64x4xbf16>
    %c0_10 = arith.constant 0 : index
    %c0_11 = arith.constant 0 : index
    %c0_12 = arith.constant 0 : index
    %9 = vector.load %arg8[%c0_10, %c0_11, %c0_12] : memref<10x10x16xbf16, #tpu.memory_space<vmem>>, vector<8x8x16xbf16>
    %10 = vector.shape_cast %9 : vector<8x8x16xbf16> to vector<64x16xbf16>
    %c0_13 = arith.constant 0 : index
    %c0_14 = arith.constant 0 : index
    %c0_15 = arith.constant 0 : index
    %11 = vector.load %arg3[%c0_13, %c0_14, %c0_15] : memref<9x4x64xbf16, #tpu.memory_space<vmem>>, vector<1x4x64xbf16>
    %12 = vector.shape_cast %11 : vector<1x4x64xbf16> to vector<4x64xbf16>
    %cst_16 = arith.constant dense<0.000000e+00> : vector<64x64xf32>
    %13 = tpu.matmul %8, %12, %cst_16 {dimension_numbers = #tpu.dot_dimension_numbers<[1], [0], [0], [1], [0, 0, 1, 1], [], []>} : vector<64x4xbf16>, vector<4x64xbf16>, vector<64x64xf32> -> vector<64x64xf32>
    %14 = arith.addf %6, %13 : vector<64x64xf32>
    %c0_17 = arith.constant 0 : index
    %c0_18 = arith.constant 0 : index
    %c0_19 = arith.constant 0 : index
    %15 = vector.load %arg4[%c0_17, %c0_18, %c0_19] : memref<9x16x64xbf16, #tpu.memory_space<vmem>>, vector<1x16x64xbf16>
    %16 = vector.shape_cast %15 : vector<1x16x64xbf16> to vector<16x64xbf16>
    %cst_20 = arith.constant dense<0.000000e+00> : vector<64x64xf32>
    %17 = tpu.matmul %10, %16, %cst_20 {dimension_numbers = #tpu.dot_dimension_numbers<[1], [0], [0], [1], [0, 0, 1, 1], [], []>} : vector<64x16xbf16>, vector<16x64xbf16>, vector<64x64xf32> -> vector<64x64xf32>
    %18 = arith.addf %14, %17 : vector<64x64xf32>
    %c0_21 = arith.constant 0 : index
    %c1_22 = arith.constant 1 : index
    %c0_23 = arith.constant 0 : index
    %19 = vector.load %arg7[%c0_21, %c1_22, %c0_23] : memref<10x10x4xbf16, #tpu.memory_space<vmem>>, vector<8x8x4xbf16>
    %20 = vector.shape_cast %19 : vector<8x8x4xbf16> to vector<64x4xbf16>
    %c0_24 = arith.constant 0 : index
    %c1_25 = arith.constant 1 : index
    %c0_26 = arith.constant 0 : index
    %21 = vector.load %arg8[%c0_24, %c1_25, %c0_26] : memref<10x10x16xbf16, #tpu.memory_space<vmem>>, vector<8x8x16xbf16>
    %22 = vector.shape_cast %21 : vector<8x8x16xbf16> to vector<64x16xbf16>
    %c1_27 = arith.constant 1 : index
    %c0_28 = arith.constant 0 : index
    %c0_29 = arith.constant 0 : index
    %23 = vector.load %arg3[%c1_27, %c0_28, %c0_29] : memref<9x4x64xbf16, #tpu.memory_space<vmem>>, vector<1x4x64xbf16>
    %24 = vector.shape_cast %23 : vector<1x4x64xbf16> to vector<4x64xbf16>
    %cst_30 = arith.constant dense<0.000000e+00> : vector<64x64xf32>
    %25 = tpu.matmul %20, %24, %cst_30 {dimension_numbers = #tpu.dot_dimension_numbers<[1], [0], [0], [1], [0, 0, 1, 1], [], []>} : vector<64x4xbf16>, vector<4x64xbf16>, vector<64x64xf32> -> vector<64x64xf32>
    %26 = arith.addf %18, %25 : vector<64x64xf32>
    %c1_31 = arith.constant 1 : index
    %c0_32 = arith.constant 0 : index
    %c0_33 = arith.constant 0 : index
    %27 = vector.load %arg4[%c1_31, %c0_32, %c0_33] : memref<9x16x64xbf16, #tpu.memory_space<vmem>>, vector<1x16x64xbf16>
    %28 = vector.shape_cast %27 : vector<1x16x64xbf16> to vector<16x64xbf16>
    %cst_34 = arith.constant dense<0.000000e+00> : vector<64x64xf32>
    %29 = tpu.matmul %22, %28, %cst_34 {dimension_numbers = #tpu.dot_dimension_numbers<[1], [0], [0], [1], [0, 0, 1, 1], [], []>} : vector<64x16xbf16>, vector<16x64xbf16>, vector<64x64xf32> -> vector<64x64xf32>
    %30 = arith.addf %26, %29 : vector<64x64xf32>
    %c0_35 = arith.constant 0 : index
    %c2 = arith.constant 2 : index
    %c0_36 = arith.constant 0 : index
    %31 = vector.load %arg7[%c0_35, %c2, %c0_36] : memref<10x10x4xbf16, #tpu.memory_space<vmem>>, vector<8x8x4xbf16>
    %32 = vector.shape_cast %31 : vector<8x8x4xbf16> to vector<64x4xbf16>
    %c0_37 = arith.constant 0 : index
    %c2_38 = arith.constant 2 : index
    %c0_39 = arith.constant 0 : index
    %33 = vector.load %arg8[%c0_37, %c2_38, %c0_39] : memref<10x10x16xbf16, #tpu.memory_space<vmem>>, vector<8x8x16xbf16>
    %34 = vector.shape_cast %33 : vector<8x8x16xbf16> to vector<64x16xbf16>
    %c2_40 = arith.constant 2 : index
    %c0_41 = arith.constant 0 : index
    %c0_42 = arith.constant 0 : index
    %35 = vector.load %arg3[%c2_40, %c0_41, %c0_42] : memref<9x4x64xbf16, #tpu.memory_space<vmem>>, vector<1x4x64xbf16>
    %36 = vector.shape_cast %35 : vector<1x4x64xbf16> to vector<4x64xbf16>
    %cst_43 = arith.constant dense<0.000000e+00> : vector<64x64xf32>
    %37 = tpu.matmul %32, %36, %cst_43 {dimension_numbers = #tpu.dot_dimension_numbers<[1], [0], [0], [1], [0, 0, 1, 1], [], []>} : vector<64x4xbf16>, vector<4x64xbf16>, vector<64x64xf32> -> vector<64x64xf32>
    %38 = arith.addf %30, %37 : vector<64x64xf32>
    %c2_44 = arith.constant 2 : index
    %c0_45 = arith.constant 0 : index
    %c0_46 = arith.constant 0 : index
    %39 = vector.load %arg4[%c2_44, %c0_45, %c0_46] : memref<9x16x64xbf16, #tpu.memory_space<vmem>>, vector<1x16x64xbf16>
    %40 = vector.shape_cast %39 : vector<1x16x64xbf16> to vector<16x64xbf16>
    %cst_47 = arith.constant dense<0.000000e+00> : vector<64x64xf32>
    %41 = tpu.matmul %34, %40, %cst_47 {dimension_numbers = #tpu.dot_dimension_numbers<[1], [0], [0], [1], [0, 0, 1, 1], [], []>} : vector<64x16xbf16>, vector<16x64xbf16>, vector<64x64xf32> -> vector<64x64xf32>
    %42 = arith.addf %38, %41 : vector<64x64xf32>
    %c1_48 = arith.constant 1 : index
    %c0_49 = arith.constant 0 : index
    %c0_50 = arith.constant 0 : index
    %43 = vector.load %arg7[%c1_48, %c0_49, %c0_50] : memref<10x10x4xbf16, #tpu.memory_space<vmem>>, vector<8x8x4xbf16>
    %44 = vector.shape_cast %43 : vector<8x8x4xbf16> to vector<64x4xbf16>
    %c1_51 = arith.constant 1 : index
    %c0_52 = arith.constant 0 : index
    %c0_53 = arith.constant 0 : index
    %45 = vector.load %arg8[%c1_51, %c0_52, %c0_53] : memref<10x10x16xbf16, #tpu.memory_space<vmem>>, vector<8x8x16xbf16>
    %46 = vector.shape_cast %45 : vector<8x8x16xbf16> to vector<64x16xbf16>
    %c3 = arith.constant 3 : index
    %c0_54 = arith.constant 0 : index
    %c0_55 = arith.constant 0 : index
    %47 = vector.load %arg3[%c3, %c0_54, %c0_55] : memref<9x4x64xbf16, #tpu.memory_space<vmem>>, vector<1x4x64xbf16>
    %48 = vector.shape_cast %47 : vector<1x4x64xbf16> to vector<4x64xbf16>
    %cst_56 = arith.constant dense<0.000000e+00> : vector<64x64xf32>
    %49 = tpu.matmul %44, %48, %cst_56 {dimension_numbers = #tpu.dot_dimension_numbers<[1], [0], [0], [1], [0, 0, 1, 1], [], []>} : vector<64x4xbf16>, vector<4x64xbf16>, vector<64x64xf32> -> vector<64x64xf32>
    %50 = arith.addf %42, %49 : vector<64x64xf32>
    %c3_57 = arith.constant 3 : index
    %c0_58 = arith.constant 0 : index
    %c0_59 = arith.constant 0 : index
    %51 = vector.load %arg4[%c3_57, %c0_58, %c0_59] : memref<9x16x64xbf16, #tpu.memory_space<vmem>>, vector<1x16x64xbf16>
    %52 = vector.shape_cast %51 : vector<1x16x64xbf16> to vector<16x64xbf16>
    %cst_60 = arith.constant dense<0.000000e+00> : vector<64x64xf32>
    %53 = tpu.matmul %46, %52, %cst_60 {dimension_numbers = #tpu.dot_dimension_numbers<[1], [0], [0], [1], [0, 0, 1, 1], [], []>} : vector<64x16xbf16>, vector<16x64xbf16>, vector<64x64xf32> -> vector<64x64xf32>
    %54 = arith.addf %50, %53 : vector<64x64xf32>
    %c1_61 = arith.constant 1 : index
    %c1_62 = arith.constant 1 : index
    %c0_63 = arith.constant 0 : index
    %55 = vector.load %arg7[%c1_61, %c1_62, %c0_63] : memref<10x10x4xbf16, #tpu.memory_space<vmem>>, vector<8x8x4xbf16>
    %56 = vector.shape_cast %55 : vector<8x8x4xbf16> to vector<64x4xbf16>
    %c1_64 = arith.constant 1 : index
    %c1_65 = arith.constant 1 : index
    %c0_66 = arith.constant 0 : index
    %57 = vector.load %arg8[%c1_64, %c1_65, %c0_66] : memref<10x10x16xbf16, #tpu.memory_space<vmem>>, vector<8x8x16xbf16>
    %58 = vector.shape_cast %57 : vector<8x8x16xbf16> to vector<64x16xbf16>
    %c4 = arith.constant 4 : index
    %c0_67 = arith.constant 0 : index
    %c0_68 = arith.constant 0 : index
    %59 = vector.load %arg3[%c4, %c0_67, %c0_68] : memref<9x4x64xbf16, #tpu.memory_space<vmem>>, vector<1x4x64xbf16>
    %60 = vector.shape_cast %59 : vector<1x4x64xbf16> to vector<4x64xbf16>
    %cst_69 = arith.constant dense<0.000000e+00> : vector<64x64xf32>
    %61 = tpu.matmul %56, %60, %cst_69 {dimension_numbers = #tpu.dot_dimension_numbers<[1], [0], [0], [1], [0, 0, 1, 1], [], []>} : vector<64x4xbf16>, vector<4x64xbf16>, vector<64x64xf32> -> vector<64x64xf32>
    %62 = arith.addf %54, %61 : vector<64x64xf32>
    %c4_70 = arith.constant 4 : index
    %c0_71 = arith.constant 0 : index
    %c0_72 = arith.constant 0 : index
    %63 = vector.load %arg4[%c4_70, %c0_71, %c0_72] : memref<9x16x64xbf16, #tpu.memory_space<vmem>>, vector<1x16x64xbf16>
    %64 = vector.shape_cast %63 : vector<1x16x64xbf16> to vector<16x64xbf16>
    %cst_73 = arith.constant dense<0.000000e+00> : vector<64x64xf32>
    %65 = tpu.matmul %58, %64, %cst_73 {dimension_numbers = #tpu.dot_dimension_numbers<[1], [0], [0], [1], [0, 0, 1, 1], [], []>} : vector<64x16xbf16>, vector<16x64xbf16>, vector<64x64xf32> -> vector<64x64xf32>
    %66 = arith.addf %62, %65 : vector<64x64xf32>
    %c1_74 = arith.constant 1 : index
    %c2_75 = arith.constant 2 : index
    %c0_76 = arith.constant 0 : index
    %67 = vector.load %arg7[%c1_74, %c2_75, %c0_76] : memref<10x10x4xbf16, #tpu.memory_space<vmem>>, vector<8x8x4xbf16>
    %68 = vector.shape_cast %67 : vector<8x8x4xbf16> to vector<64x4xbf16>
    %c1_77 = arith.constant 1 : index
    %c2_78 = arith.constant 2 : index
    %c0_79 = arith.constant 0 : index
    %69 = vector.load %arg8[%c1_77, %c2_78, %c0_79] : memref<10x10x16xbf16, #tpu.memory_space<vmem>>, vector<8x8x16xbf16>
    %70 = vector.shape_cast %69 : vector<8x8x16xbf16> to vector<64x16xbf16>
    %c5 = arith.constant 5 : index
    %c0_80 = arith.constant 0 : index
    %c0_81 = arith.constant 0 : index
    %71 = vector.load %arg3[%c5, %c0_80, %c0_81] : memref<9x4x64xbf16, #tpu.memory_space<vmem>>, vector<1x4x64xbf16>
    %72 = vector.shape_cast %71 : vector<1x4x64xbf16> to vector<4x64xbf16>
    %cst_82 = arith.constant dense<0.000000e+00> : vector<64x64xf32>
    %73 = tpu.matmul %68, %72, %cst_82 {dimension_numbers = #tpu.dot_dimension_numbers<[1], [0], [0], [1], [0, 0, 1, 1], [], []>} : vector<64x4xbf16>, vector<4x64xbf16>, vector<64x64xf32> -> vector<64x64xf32>
    %74 = arith.addf %66, %73 : vector<64x64xf32>
    %c5_83 = arith.constant 5 : index
    %c0_84 = arith.constant 0 : index
    %c0_85 = arith.constant 0 : index
    %75 = vector.load %arg4[%c5_83, %c0_84, %c0_85] : memref<9x16x64xbf16, #tpu.memory_space<vmem>>, vector<1x16x64xbf16>
    %76 = vector.shape_cast %75 : vector<1x16x64xbf16> to vector<16x64xbf16>
    %cst_86 = arith.constant dense<0.000000e+00> : vector<64x64xf32>
    %77 = tpu.matmul %70, %76, %cst_86 {dimension_numbers = #tpu.dot_dimension_numbers<[1], [0], [0], [1], [0, 0, 1, 1], [], []>} : vector<64x16xbf16>, vector<16x64xbf16>, vector<64x64xf32> -> vector<64x64xf32>
    %78 = arith.addf %74, %77 : vector<64x64xf32>
    %c2_87 = arith.constant 2 : index
    %c0_88 = arith.constant 0 : index
    %c0_89 = arith.constant 0 : index
    %79 = vector.load %arg7[%c2_87, %c0_88, %c0_89] : memref<10x10x4xbf16, #tpu.memory_space<vmem>>, vector<8x8x4xbf16>
    %80 = vector.shape_cast %79 : vector<8x8x4xbf16> to vector<64x4xbf16>
    %c2_90 = arith.constant 2 : index
    %c0_91 = arith.constant 0 : index
    %c0_92 = arith.constant 0 : index
    %81 = vector.load %arg8[%c2_90, %c0_91, %c0_92] : memref<10x10x16xbf16, #tpu.memory_space<vmem>>, vector<8x8x16xbf16>
    %82 = vector.shape_cast %81 : vector<8x8x16xbf16> to vector<64x16xbf16>
    %c6 = arith.constant 6 : index
    %c0_93 = arith.constant 0 : index
    %c0_94 = arith.constant 0 : index
    %83 = vector.load %arg3[%c6, %c0_93, %c0_94] : memref<9x4x64xbf16, #tpu.memory_space<vmem>>, vector<1x4x64xbf16>
    %84 = vector.shape_cast %83 : vector<1x4x64xbf16> to vector<4x64xbf16>
    %cst_95 = arith.constant dense<0.000000e+00> : vector<64x64xf32>
    %85 = tpu.matmul %80, %84, %cst_95 {dimension_numbers = #tpu.dot_dimension_numbers<[1], [0], [0], [1], [0, 0, 1, 1], [], []>} : vector<64x4xbf16>, vector<4x64xbf16>, vector<64x64xf32> -> vector<64x64xf32>
    %86 = arith.addf %78, %85 : vector<64x64xf32>
    %c6_96 = arith.constant 6 : index
    %c0_97 = arith.constant 0 : index
    %c0_98 = arith.constant 0 : index
    %87 = vector.load %arg4[%c6_96, %c0_97, %c0_98] : memref<9x16x64xbf16, #tpu.memory_space<vmem>>, vector<1x16x64xbf16>
    %88 = vector.shape_cast %87 : vector<1x16x64xbf16> to vector<16x64xbf16>
    %cst_99 = arith.constant dense<0.000000e+00> : vector<64x64xf32>
    %89 = tpu.matmul %82, %88, %cst_99 {dimension_numbers = #tpu.dot_dimension_numbers<[1], [0], [0], [1], [0, 0, 1, 1], [], []>} : vector<64x16xbf16>, vector<16x64xbf16>, vector<64x64xf32> -> vector<64x64xf32>
    %90 = arith.addf %86, %89 : vector<64x64xf32>
    %c2_100 = arith.constant 2 : index
    %c1_101 = arith.constant 1 : index
    %c0_102 = arith.constant 0 : index
    %91 = vector.load %arg7[%c2_100, %c1_101, %c0_102] : memref<10x10x4xbf16, #tpu.memory_space<vmem>>, vector<8x8x4xbf16>
    %92 = vector.shape_cast %91 : vector<8x8x4xbf16> to vector<64x4xbf16>
    %c2_103 = arith.constant 2 : index
    %c1_104 = arith.constant 1 : index
    %c0_105 = arith.constant 0 : index
    %93 = vector.load %arg8[%c2_103, %c1_104, %c0_105] : memref<10x10x16xbf16, #tpu.memory_space<vmem>>, vector<8x8x16xbf16>
    %94 = vector.shape_cast %93 : vector<8x8x16xbf16> to vector<64x16xbf16>
    %c7 = arith.constant 7 : index
    %c0_106 = arith.constant 0 : index
    %c0_107 = arith.constant 0 : index
    %95 = vector.load %arg3[%c7, %c0_106, %c0_107] : memref<9x4x64xbf16, #tpu.memory_space<vmem>>, vector<1x4x64xbf16>
    %96 = vector.shape_cast %95 : vector<1x4x64xbf16> to vector<4x64xbf16>
    %cst_108 = arith.constant dense<0.000000e+00> : vector<64x64xf32>
    %97 = tpu.matmul %92, %96, %cst_108 {dimension_numbers = #tpu.dot_dimension_numbers<[1], [0], [0], [1], [0, 0, 1, 1], [], []>} : vector<64x4xbf16>, vector<4x64xbf16>, vector<64x64xf32> -> vector<64x64xf32>
    %98 = arith.addf %90, %97 : vector<64x64xf32>
    %c7_109 = arith.constant 7 : index
    %c0_110 = arith.constant 0 : index
    %c0_111 = arith.constant 0 : index
    %99 = vector.load %arg4[%c7_109, %c0_110, %c0_111] : memref<9x16x64xbf16, #tpu.memory_space<vmem>>, vector<1x16x64xbf16>
    %100 = vector.shape_cast %99 : vector<1x16x64xbf16> to vector<16x64xbf16>
    %cst_112 = arith.constant dense<0.000000e+00> : vector<64x64xf32>
    %101 = tpu.matmul %94, %100, %cst_112 {dimension_numbers = #tpu.dot_dimension_numbers<[1], [0], [0], [1], [0, 0, 1, 1], [], []>} : vector<64x16xbf16>, vector<16x64xbf16>, vector<64x64xf32> -> vector<64x64xf32>
    %102 = arith.addf %98, %101 : vector<64x64xf32>
    %c2_113 = arith.constant 2 : index
    %c2_114 = arith.constant 2 : index
    %c0_115 = arith.constant 0 : index
    %103 = vector.load %arg7[%c2_113, %c2_114, %c0_115] : memref<10x10x4xbf16, #tpu.memory_space<vmem>>, vector<8x8x4xbf16>
    %104 = vector.shape_cast %103 : vector<8x8x4xbf16> to vector<64x4xbf16>
    %c2_116 = arith.constant 2 : index
    %c2_117 = arith.constant 2 : index
    %c0_118 = arith.constant 0 : index
    %105 = vector.load %arg8[%c2_116, %c2_117, %c0_118] : memref<10x10x16xbf16, #tpu.memory_space<vmem>>, vector<8x8x16xbf16>
    %106 = vector.shape_cast %105 : vector<8x8x16xbf16> to vector<64x16xbf16>
    %c8 = arith.constant 8 : index
    %c0_119 = arith.constant 0 : index
    %c0_120 = arith.constant 0 : index
    %107 = vector.load %arg3[%c8, %c0_119, %c0_120] : memref<9x4x64xbf16, #tpu.memory_space<vmem>>, vector<1x4x64xbf16>
    %108 = vector.shape_cast %107 : vector<1x4x64xbf16> to vector<4x64xbf16>
    %cst_121 = arith.constant dense<0.000000e+00> : vector<64x64xf32>
    %109 = tpu.matmul %104, %108, %cst_121 {dimension_numbers = #tpu.dot_dimension_numbers<[1], [0], [0], [1], [0, 0, 1, 1], [], []>} : vector<64x4xbf16>, vector<4x64xbf16>, vector<64x64xf32> -> vector<64x64xf32>
    %110 = arith.addf %102, %109 : vector<64x64xf32>
    %c8_122 = arith.constant 8 : index
    %c0_123 = arith.constant 0 : index
    %c0_124 = arith.constant 0 : index
    %111 = vector.load %arg4[%c8_122, %c0_123, %c0_124] : memref<9x16x64xbf16, #tpu.memory_space<vmem>>, vector<1x16x64xbf16>
    %112 = vector.shape_cast %111 : vector<1x16x64xbf16> to vector<16x64xbf16>
    %cst_125 = arith.constant dense<0.000000e+00> : vector<64x64xf32>
    %113 = tpu.matmul %106, %112, %cst_125 {dimension_numbers = #tpu.dot_dimension_numbers<[1], [0], [0], [1], [0, 0, 1, 1], [], []>} : vector<64x16xbf16>, vector<16x64xbf16>, vector<64x64xf32> -> vector<64x64xf32>
    %114 = arith.addf %110, %113 : vector<64x64xf32>
    %c0_126 = arith.constant 0 : index
    %c0_127 = arith.constant 0 : index
    %115 = vector.load %arg5[%c0_126, %c0_127] : memref<1x64xf32, #tpu.memory_space<vmem>>, vector<1x64xf32>
    %116 = vector.broadcast %115 : vector<1x64xf32> to vector<64x64xf32>
    %117 = arith.addf %114, %116 : vector<64x64xf32>
    %118 = vector.extract_strided_slice %117 {offsets = [0, 0], sizes = [64, 16], strides = [1, 1]} : vector<64x64xf32> to vector<64x16xf32>
    %cst_128 = arith.constant 5.000000e-01 : f32
    %119 = vector.broadcast %cst_128 : f32 to vector<64x16xf32>
    %120 = arith.mulf %119, %118 : vector<64x16xf32>
    %121 = math.tanh %120 : vector<64x16xf32>
    %cst_129 = arith.constant 1.000000e+00 : f32
    %122 = vector.broadcast %cst_129 : f32 to vector<64x16xf32>
    %123 = arith.addf %121, %122 : vector<64x16xf32>
    %cst_130 = arith.constant 5.000000e-01 : f32
    %124 = vector.broadcast %cst_130 : f32 to vector<64x16xf32>
    %125 = arith.mulf %124, %123 : vector<64x16xf32>
    %126 = vector.extract_strided_slice %117 {offsets = [0, 16], sizes = [64, 16], strides = [1, 1]} : vector<64x64xf32> to vector<64x16xf32>
    %cst_131 = arith.constant 5.000000e-01 : f32
    %127 = vector.broadcast %cst_131 : f32 to vector<64x16xf32>
    %128 = arith.mulf %127, %126 : vector<64x16xf32>
    %129 = math.tanh %128 : vector<64x16xf32>
    %cst_132 = arith.constant 1.000000e+00 : f32
    %130 = vector.broadcast %cst_132 : f32 to vector<64x16xf32>
    %131 = arith.addf %129, %130 : vector<64x16xf32>
    %cst_133 = arith.constant 5.000000e-01 : f32
    %132 = vector.broadcast %cst_133 : f32 to vector<64x16xf32>
    %133 = arith.mulf %132, %131 : vector<64x16xf32>
    %134 = vector.extract_strided_slice %117 {offsets = [0, 32], sizes = [64, 16], strides = [1, 1]} : vector<64x64xf32> to vector<64x16xf32>
    %cst_134 = arith.constant 5.000000e-01 : f32
    %135 = vector.broadcast %cst_134 : f32 to vector<64x16xf32>
    %136 = arith.mulf %135, %134 : vector<64x16xf32>
    %137 = math.tanh %136 : vector<64x16xf32>
    %cst_135 = arith.constant 1.000000e+00 : f32
    %138 = vector.broadcast %cst_135 : f32 to vector<64x16xf32>
    %139 = arith.addf %137, %138 : vector<64x16xf32>
    %cst_136 = arith.constant 5.000000e-01 : f32
    %140 = vector.broadcast %cst_136 : f32 to vector<64x16xf32>
    %141 = arith.mulf %140, %139 : vector<64x16xf32>
    %142 = vector.extract_strided_slice %117 {offsets = [0, 48], sizes = [64, 16], strides = [1, 1]} : vector<64x64xf32> to vector<64x16xf32>
    %143 = math.tanh %142 : vector<64x16xf32>
    %c0_137 = arith.constant 0 : index
    %c0_138 = arith.constant 0 : index
    %144 = vector.load %arg9[%c0_137, %c0_138] : memref<64x16xf32, #tpu.memory_space<vmem>>, vector<64x16xf32>
    %145 = arith.mulf %133, %144 : vector<64x16xf32>
    %146 = arith.mulf %125, %143 : vector<64x16xf32>
    %147 = arith.addf %145, %146 : vector<64x16xf32>
    %148 = math.tanh %147 : vector<64x16xf32>
    %149 = arith.mulf %141, %148 : vector<64x16xf32>
    %c0_139 = arith.constant 0 : index
    %c0_140 = arith.constant 0 : index
    %150 = vector.load %arg9[%c0_139, %c0_140] : memref<64x16xf32, #tpu.memory_space<vmem>>, vector<64x16xf32>
    tpu.vector_store %arg9[%c0_139, %c0_140], %147 {strides = array<i32>} : memref<64x16xf32, #tpu.memory_space<vmem>>, vector<64x16xf32>,
    %151 = vector.shape_cast %149 : vector<64x16xf32> to vector<8x8x16xf32>
    %152 = arith.truncf %151 : vector<8x8x16xf32> to vector<8x8x16xbf16>
    %c1_141 = arith.constant 1 : index
    %c1_142 = arith.constant 1 : index
    %c0_143 = arith.constant 0 : index
    %153 = vector.load %arg8[%c1_141, %c1_142, %c0_143] : memref<10x10x16xbf16, #tpu.memory_space<vmem>>, vector<8x8x16xbf16>
    tpu.vector_store %arg8[%c1_141, %c1_142, %c0_143], %152 {strides = array<i32>} : memref<10x10x16xbf16, #tpu.memory_space<vmem>>, vector<8x8x16xbf16>,
    %154 = arith.truncf %149 : vector<64x16xf32> to vector<64x16xbf16>
    %c0_144 = arith.constant 0 : index
    %c0_145 = arith.constant 0 : index
    %c0_146 = arith.constant 0 : index
    %c0_147 = arith.constant 0 : index
    %155 = vector.load %arg6[%c0_144, %c0_145, %c0_146, %c0_147] : memref<1x1x64x16xbf16, #tpu.memory_space<vmem>>, vector<1x1x64x16xbf16>
    %156 = vector.shape_cast %155 : vector<1x1x64x16xbf16> to vector<64x16xbf16>
    %157 = vector.shape_cast %154 : vector<64x16xbf16> to vector<1x1x64x16xbf16>
    tpu.vector_store %arg6[%c0_144, %c0_145, %c0_146, %c0_147], %157 {strides = array<i32>} : memref<1x1x64x16xbf16, #tpu.memory_space<vmem>>, vector<1x1x64x16xbf16>,
    return
  }
  func.func @transform_0(%arg0: i32, %arg1: i32) -> (i32, i32, i32, i32, i32) {
    %c0_i32 = arith.constant 0 : i32
    %c0_i32_0 = arith.constant 0 : i32
    %c0_i32_1 = arith.constant 0 : i32
    %c0_i32_2 = arith.constant 0 : i32
    return %arg0, %arg1, %c0_i32, %c0_i32_0, %c0_i32_1 : i32, i32, i32, i32, i32
  }
  func.func @transform_1(%arg0: i32, %arg1: i32) -> (i32, i32, i32) {
    %c0_i32 = arith.constant 0 : i32
    %c0_i32_0 = arith.constant 0 : i32
    %c0_i32_1 = arith.constant 0 : i32
    %c0_i32_2 = arith.constant 0 : i32
    return %c0_i32, %c0_i32_0, %c0_i32_1 : i32, i32, i32
  }
  func.func @transform_2(%arg0: i32, %arg1: i32) -> (i32, i32, i32) {
    %c0_i32 = arith.constant 0 : i32
    %c0_i32_0 = arith.constant 0 : i32
    %c0_i32_1 = arith.constant 0 : i32
    %c0_i32_2 = arith.constant 0 : i32
    return %c0_i32, %c0_i32_0, %c0_i32_1 : i32, i32, i32
  }
  func.func @transform_3(%arg0: i32, %arg1: i32) -> (i32, i32) {
    %c0_i32 = arith.constant 0 : i32
    %c0_i32_0 = arith.constant 0 : i32
    %c0_i32_1 = arith.constant 0 : i32
    return %c0_i32, %c0_i32_0 : i32, i32
  }
  func.func @transform_4(%arg0: i32, %arg1: i32) -> (i32, i32, i32, i32) {
    %c0_i32 = arith.constant 0 : i32
    %c0_i32_0 = arith.constant 0 : i32
    %c0_i32_1 = arith.constant 0 : i32
    return %arg0, %arg1, %c0_i32, %c0_i32_0 : i32, i32, i32, i32
  }
}

module attributes {stable_mosaic.version = 11 : i64} {
  func.func @convlstm_seq_kernel(%arg0: i32, %arg1: i32, %arg2: memref<1x1x8x8x16xbf16, #tpu.memory_space<vmem>>, %arg3: memref<9x16x128xbf16, #tpu.memory_space<vmem>>, %arg4: memref<9x32x128xbf16, #tpu.memory_space<vmem>>, %arg5: memref<1x128xf32, #tpu.memory_space<vmem>>, %arg6: memref<1x1x64x32xf32, #tpu.memory_space<vmem>>, %arg7: memref<10x10x16xbf16, #tpu.memory_space<vmem>>, %arg8: memref<10x10x32xbf16, #tpu.memory_space<vmem>>, %arg9: memref<64x32xf32, #tpu.memory_space<vmem>>) attributes {dimension_semantics = [#tpu.dimension_semantics<parallel>, #tpu.dimension_semantics<arbitrary>], iteration_bounds = array<i64: 2, 4>, scalar_prefetch = 0 : i64, scratch_operands = 3 : i64, tpu.core_type = #tpu.core_type<tc>, window_params = [{transform_indices = @transform_0, window_bounds = array<i64: 1, 1, 8, 8, 16>}, {pipeline_mode = #tpu.pipeline_mode<synchronous>, transform_indices = @transform_1, window_bounds = array<i64: 9, 16, 128>}, {pipeline_mode = #tpu.pipeline_mode<synchronous>, transform_indices = @transform_2, window_bounds = array<i64: 9, 32, 128>}, {pipeline_mode = #tpu.pipeline_mode<synchronous>, transform_indices = @transform_3, window_bounds = array<i64: 1, 128>}, {transform_indices = @transform_4, window_bounds = array<i64: 1, 1, 64, 32>}]} {
    %c0_i32 = arith.constant 0 : i32
    %0 = arith.cmpi eq, %arg1, %c0_i32 : i32
    %1 = arith.extui %0 : i1 to i32
    %c0_i32_0 = arith.constant 0 : i32
    %2 = arith.cmpi ne, %1, %c0_i32_0 : i32
    scf.if %2 {
      %cst_148 = arith.constant 0.000000e+00 : bf16
      %157 = vector.broadcast %cst_148 : bf16 to vector<10x10x16xbf16>
      %c0_149 = arith.constant 0 : index
      %c0_150 = arith.constant 0 : index
      %c0_151 = arith.constant 0 : index
      %158 = vector.load %arg7[%c0_149, %c0_150, %c0_151] : memref<10x10x16xbf16, #tpu.memory_space<vmem>>, vector<10x10x16xbf16>
      tpu.vector_store %arg7[%c0_149, %c0_150, %c0_151], %157 {strides = array<i32>} : memref<10x10x16xbf16, #tpu.memory_space<vmem>>, vector<10x10x16xbf16>,
      %cst_152 = arith.constant 0.000000e+00 : bf16
      %159 = vector.broadcast %cst_152 : bf16 to vector<10x10x32xbf16>
      %c0_153 = arith.constant 0 : index
      %c0_154 = arith.constant 0 : index
      %c0_155 = arith.constant 0 : index
      %160 = vector.load %arg8[%c0_153, %c0_154, %c0_155] : memref<10x10x32xbf16, #tpu.memory_space<vmem>>, vector<10x10x32xbf16>
      tpu.vector_store %arg8[%c0_153, %c0_154, %c0_155], %159 {strides = array<i32>} : memref<10x10x32xbf16, #tpu.memory_space<vmem>>, vector<10x10x32xbf16>,
      %cst_156 = arith.constant 0.000000e+00 : f32
      %161 = vector.broadcast %cst_156 : f32 to vector<64x32xf32>
      %c0_157 = arith.constant 0 : index
      %c0_158 = arith.constant 0 : index
      %162 = vector.load %arg9[%c0_157, %c0_158] : memref<64x32xf32, #tpu.memory_space<vmem>>, vector<64x32xf32>
      tpu.vector_store %arg9[%c0_157, %c0_158], %161 {strides = array<i32>} : memref<64x32xf32, #tpu.memory_space<vmem>>, vector<64x32xf32>,
    } else {
    }
    %c0 = arith.constant 0 : index
    %c0_1 = arith.constant 0 : index
    %c0_2 = arith.constant 0 : index
    %c0_3 = arith.constant 0 : index
    %c0_4 = arith.constant 0 : index
    %3 = vector.load %arg2[%c0, %c0_1, %c0_2, %c0_3, %c0_4] : memref<1x1x8x8x16xbf16, #tpu.memory_space<vmem>>, vector<1x1x8x8x16xbf16>
    %4 = vector.shape_cast %3 : vector<1x1x8x8x16xbf16> to vector<8x8x16xbf16>
    %c1 = arith.constant 1 : index
    %c1_5 = arith.constant 1 : index
    %c0_6 = arith.constant 0 : index
    %5 = vector.load %arg7[%c1, %c1_5, %c0_6] : memref<10x10x16xbf16, #tpu.memory_space<vmem>>, vector<8x8x16xbf16>
    tpu.vector_store %arg7[%c1, %c1_5, %c0_6], %4 {strides = array<i32>} : memref<10x10x16xbf16, #tpu.memory_space<vmem>>, vector<8x8x16xbf16>,
    %cst = arith.constant 0.000000e+00 : f32
    %6 = vector.broadcast %cst : f32 to vector<64x128xf32>
    %c0_7 = arith.constant 0 : index
    %c0_8 = arith.constant 0 : index
    %c0_9 = arith.constant 0 : index
    %7 = vector.load %arg7[%c0_7, %c0_8, %c0_9] : memref<10x10x16xbf16, #tpu.memory_space<vmem>>, vector<8x8x16xbf16>
    %8 = vector.shape_cast %7 : vector<8x8x16xbf16> to vector<64x16xbf16>
    %c0_10 = arith.constant 0 : index
    %c0_11 = arith.constant 0 : index
    %c0_12 = arith.constant 0 : index
    %9 = vector.load %arg8[%c0_10, %c0_11, %c0_12] : memref<10x10x32xbf16, #tpu.memory_space<vmem>>, vector<8x8x32xbf16>
    %10 = vector.shape_cast %9 : vector<8x8x32xbf16> to vector<64x32xbf16>
    %c0_13 = arith.constant 0 : index
    %c0_14 = arith.constant 0 : index
    %c0_15 = arith.constant 0 : index
    %11 = vector.load %arg3[%c0_13, %c0_14, %c0_15] : memref<9x16x128xbf16, #tpu.memory_space<vmem>>, vector<1x16x128xbf16>
    %12 = vector.shape_cast %11 : vector<1x16x128xbf16> to vector<16x128xbf16>
    %cst_16 = arith.constant dense<0.000000e+00> : vector<64x128xf32>
    %13 = tpu.matmul %8, %12, %cst_16 {dimension_numbers = #tpu.dot_dimension_numbers<[1], [0], [0], [1], [0, 0, 1, 1], [], []>} : vector<64x16xbf16>, vector<16x128xbf16>, vector<64x128xf32> -> vector<64x128xf32>
    %14 = arith.addf %6, %13 : vector<64x128xf32>
    %c0_17 = arith.constant 0 : index
    %c0_18 = arith.constant 0 : index
    %c0_19 = arith.constant 0 : index
    %15 = vector.load %arg4[%c0_17, %c0_18, %c0_19] : memref<9x32x128xbf16, #tpu.memory_space<vmem>>, vector<1x32x128xbf16>
    %16 = vector.shape_cast %15 : vector<1x32x128xbf16> to vector<32x128xbf16>
    %cst_20 = arith.constant dense<0.000000e+00> : vector<64x128xf32>
    %17 = tpu.matmul %10, %16, %cst_20 {dimension_numbers = #tpu.dot_dimension_numbers<[1], [0], [0], [1], [0, 0, 1, 1], [], []>} : vector<64x32xbf16>, vector<32x128xbf16>, vector<64x128xf32> -> vector<64x128xf32>
    %18 = arith.addf %14, %17 : vector<64x128xf32>
    %c0_21 = arith.constant 0 : index
    %c1_22 = arith.constant 1 : index
    %c0_23 = arith.constant 0 : index
    %19 = vector.load %arg7[%c0_21, %c1_22, %c0_23] : memref<10x10x16xbf16, #tpu.memory_space<vmem>>, vector<8x8x16xbf16>
    %20 = vector.shape_cast %19 : vector<8x8x16xbf16> to vector<64x16xbf16>
    %c0_24 = arith.constant 0 : index
    %c1_25 = arith.constant 1 : index
    %c0_26 = arith.constant 0 : index
    %21 = vector.load %arg8[%c0_24, %c1_25, %c0_26] : memref<10x10x32xbf16, #tpu.memory_space<vmem>>, vector<8x8x32xbf16>
    %22 = vector.shape_cast %21 : vector<8x8x32xbf16> to vector<64x32xbf16>
    %c1_27 = arith.constant 1 : index
    %c0_28 = arith.constant 0 : index
    %c0_29 = arith.constant 0 : index
    %23 = vector.load %arg3[%c1_27, %c0_28, %c0_29] : memref<9x16x128xbf16, #tpu.memory_space<vmem>>, vector<1x16x128xbf16>
    %24 = vector.shape_cast %23 : vector<1x16x128xbf16> to vector<16x128xbf16>
    %cst_30 = arith.constant dense<0.000000e+00> : vector<64x128xf32>
    %25 = tpu.matmul %20, %24, %cst_30 {dimension_numbers = #tpu.dot_dimension_numbers<[1], [0], [0], [1], [0, 0, 1, 1], [], []>} : vector<64x16xbf16>, vector<16x128xbf16>, vector<64x128xf32> -> vector<64x128xf32>
    %26 = arith.addf %18, %25 : vector<64x128xf32>
    %c1_31 = arith.constant 1 : index
    %c0_32 = arith.constant 0 : index
    %c0_33 = arith.constant 0 : index
    %27 = vector.load %arg4[%c1_31, %c0_32, %c0_33] : memref<9x32x128xbf16, #tpu.memory_space<vmem>>, vector<1x32x128xbf16>
    %28 = vector.shape_cast %27 : vector<1x32x128xbf16> to vector<32x128xbf16>
    %cst_34 = arith.constant dense<0.000000e+00> : vector<64x128xf32>
    %29 = tpu.matmul %22, %28, %cst_34 {dimension_numbers = #tpu.dot_dimension_numbers<[1], [0], [0], [1], [0, 0, 1, 1], [], []>} : vector<64x32xbf16>, vector<32x128xbf16>, vector<64x128xf32> -> vector<64x128xf32>
    %30 = arith.addf %26, %29 : vector<64x128xf32>
    %c0_35 = arith.constant 0 : index
    %c2 = arith.constant 2 : index
    %c0_36 = arith.constant 0 : index
    %31 = vector.load %arg7[%c0_35, %c2, %c0_36] : memref<10x10x16xbf16, #tpu.memory_space<vmem>>, vector<8x8x16xbf16>
    %32 = vector.shape_cast %31 : vector<8x8x16xbf16> to vector<64x16xbf16>
    %c0_37 = arith.constant 0 : index
    %c2_38 = arith.constant 2 : index
    %c0_39 = arith.constant 0 : index
    %33 = vector.load %arg8[%c0_37, %c2_38, %c0_39] : memref<10x10x32xbf16, #tpu.memory_space<vmem>>, vector<8x8x32xbf16>
    %34 = vector.shape_cast %33 : vector<8x8x32xbf16> to vector<64x32xbf16>
    %c2_40 = arith.constant 2 : index
    %c0_41 = arith.constant 0 : index
    %c0_42 = arith.constant 0 : index
    %35 = vector.load %arg3[%c2_40, %c0_41, %c0_42] : memref<9x16x128xbf16, #tpu.memory_space<vmem>>, vector<1x16x128xbf16>
    %36 = vector.shape_cast %35 : vector<1x16x128xbf16> to vector<16x128xbf16>
    %cst_43 = arith.constant dense<0.000000e+00> : vector<64x128xf32>
    %37 = tpu.matmul %32, %36, %cst_43 {dimension_numbers = #tpu.dot_dimension_numbers<[1], [0], [0], [1], [0, 0, 1, 1], [], []>} : vector<64x16xbf16>, vector<16x128xbf16>, vector<64x128xf32> -> vector<64x128xf32>
    %38 = arith.addf %30, %37 : vector<64x128xf32>
    %c2_44 = arith.constant 2 : index
    %c0_45 = arith.constant 0 : index
    %c0_46 = arith.constant 0 : index
    %39 = vector.load %arg4[%c2_44, %c0_45, %c0_46] : memref<9x32x128xbf16, #tpu.memory_space<vmem>>, vector<1x32x128xbf16>
    %40 = vector.shape_cast %39 : vector<1x32x128xbf16> to vector<32x128xbf16>
    %cst_47 = arith.constant dense<0.000000e+00> : vector<64x128xf32>
    %41 = tpu.matmul %34, %40, %cst_47 {dimension_numbers = #tpu.dot_dimension_numbers<[1], [0], [0], [1], [0, 0, 1, 1], [], []>} : vector<64x32xbf16>, vector<32x128xbf16>, vector<64x128xf32> -> vector<64x128xf32>
    %42 = arith.addf %38, %41 : vector<64x128xf32>
    %c1_48 = arith.constant 1 : index
    %c0_49 = arith.constant 0 : index
    %c0_50 = arith.constant 0 : index
    %43 = vector.load %arg7[%c1_48, %c0_49, %c0_50] : memref<10x10x16xbf16, #tpu.memory_space<vmem>>, vector<8x8x16xbf16>
    %44 = vector.shape_cast %43 : vector<8x8x16xbf16> to vector<64x16xbf16>
    %c1_51 = arith.constant 1 : index
    %c0_52 = arith.constant 0 : index
    %c0_53 = arith.constant 0 : index
    %45 = vector.load %arg8[%c1_51, %c0_52, %c0_53] : memref<10x10x32xbf16, #tpu.memory_space<vmem>>, vector<8x8x32xbf16>
    %46 = vector.shape_cast %45 : vector<8x8x32xbf16> to vector<64x32xbf16>
    %c3 = arith.constant 3 : index
    %c0_54 = arith.constant 0 : index
    %c0_55 = arith.constant 0 : index
    %47 = vector.load %arg3[%c3, %c0_54, %c0_55] : memref<9x16x128xbf16, #tpu.memory_space<vmem>>, vector<1x16x128xbf16>
    %48 = vector.shape_cast %47 : vector<1x16x128xbf16> to vector<16x128xbf16>
    %cst_56 = arith.constant dense<0.000000e+00> : vector<64x128xf32>
    %49 = tpu.matmul %44, %48, %cst_56 {dimension_numbers = #tpu.dot_dimension_numbers<[1], [0], [0], [1], [0, 0, 1, 1], [], []>} : vector<64x16xbf16>, vector<16x128xbf16>, vector<64x128xf32> -> vector<64x128xf32>
    %50 = arith.addf %42, %49 : vector<64x128xf32>
    %c3_57 = arith.constant 3 : index
    %c0_58 = arith.constant 0 : index
    %c0_59 = arith.constant 0 : index
    %51 = vector.load %arg4[%c3_57, %c0_58, %c0_59] : memref<9x32x128xbf16, #tpu.memory_space<vmem>>, vector<1x32x128xbf16>
    %52 = vector.shape_cast %51 : vector<1x32x128xbf16> to vector<32x128xbf16>
    %cst_60 = arith.constant dense<0.000000e+00> : vector<64x128xf32>
    %53 = tpu.matmul %46, %52, %cst_60 {dimension_numbers = #tpu.dot_dimension_numbers<[1], [0], [0], [1], [0, 0, 1, 1], [], []>} : vector<64x32xbf16>, vector<32x128xbf16>, vector<64x128xf32> -> vector<64x128xf32>
    %54 = arith.addf %50, %53 : vector<64x128xf32>
    %c1_61 = arith.constant 1 : index
    %c1_62 = arith.constant 1 : index
    %c0_63 = arith.constant 0 : index
    %55 = vector.load %arg7[%c1_61, %c1_62, %c0_63] : memref<10x10x16xbf16, #tpu.memory_space<vmem>>, vector<8x8x16xbf16>
    %56 = vector.shape_cast %55 : vector<8x8x16xbf16> to vector<64x16xbf16>
    %c1_64 = arith.constant 1 : index
    %c1_65 = arith.constant 1 : index
    %c0_66 = arith.constant 0 : index
    %57 = vector.load %arg8[%c1_64, %c1_65, %c0_66] : memref<10x10x32xbf16, #tpu.memory_space<vmem>>, vector<8x8x32xbf16>
    %58 = vector.shape_cast %57 : vector<8x8x32xbf16> to vector<64x32xbf16>
    %c4 = arith.constant 4 : index
    %c0_67 = arith.constant 0 : index
    %c0_68 = arith.constant 0 : index
    %59 = vector.load %arg3[%c4, %c0_67, %c0_68] : memref<9x16x128xbf16, #tpu.memory_space<vmem>>, vector<1x16x128xbf16>
    %60 = vector.shape_cast %59 : vector<1x16x128xbf16> to vector<16x128xbf16>
    %cst_69 = arith.constant dense<0.000000e+00> : vector<64x128xf32>
    %61 = tpu.matmul %56, %60, %cst_69 {dimension_numbers = #tpu.dot_dimension_numbers<[1], [0], [0], [1], [0, 0, 1, 1], [], []>} : vector<64x16xbf16>, vector<16x128xbf16>, vector<64x128xf32> -> vector<64x128xf32>
    %62 = arith.addf %54, %61 : vector<64x128xf32>
    %c4_70 = arith.constant 4 : index
    %c0_71 = arith.constant 0 : index
    %c0_72 = arith.constant 0 : index
    %63 = vector.load %arg4[%c4_70, %c0_71, %c0_72] : memref<9x32x128xbf16, #tpu.memory_space<vmem>>, vector<1x32x128xbf16>
    %64 = vector.shape_cast %63 : vector<1x32x128xbf16> to vector<32x128xbf16>
    %cst_73 = arith.constant dense<0.000000e+00> : vector<64x128xf32>
    %65 = tpu.matmul %58, %64, %cst_73 {dimension_numbers = #tpu.dot_dimension_numbers<[1], [0], [0], [1], [0, 0, 1, 1], [], []>} : vector<64x32xbf16>, vector<32x128xbf16>, vector<64x128xf32> -> vector<64x128xf32>
    %66 = arith.addf %62, %65 : vector<64x128xf32>
    %c1_74 = arith.constant 1 : index
    %c2_75 = arith.constant 2 : index
    %c0_76 = arith.constant 0 : index
    %67 = vector.load %arg7[%c1_74, %c2_75, %c0_76] : memref<10x10x16xbf16, #tpu.memory_space<vmem>>, vector<8x8x16xbf16>
    %68 = vector.shape_cast %67 : vector<8x8x16xbf16> to vector<64x16xbf16>
    %c1_77 = arith.constant 1 : index
    %c2_78 = arith.constant 2 : index
    %c0_79 = arith.constant 0 : index
    %69 = vector.load %arg8[%c1_77, %c2_78, %c0_79] : memref<10x10x32xbf16, #tpu.memory_space<vmem>>, vector<8x8x32xbf16>
    %70 = vector.shape_cast %69 : vector<8x8x32xbf16> to vector<64x32xbf16>
    %c5 = arith.constant 5 : index
    %c0_80 = arith.constant 0 : index
    %c0_81 = arith.constant 0 : index
    %71 = vector.load %arg3[%c5, %c0_80, %c0_81] : memref<9x16x128xbf16, #tpu.memory_space<vmem>>, vector<1x16x128xbf16>
    %72 = vector.shape_cast %71 : vector<1x16x128xbf16> to vector<16x128xbf16>
    %cst_82 = arith.constant dense<0.000000e+00> : vector<64x128xf32>
    %73 = tpu.matmul %68, %72, %cst_82 {dimension_numbers = #tpu.dot_dimension_numbers<[1], [0], [0], [1], [0, 0, 1, 1], [], []>} : vector<64x16xbf16>, vector<16x128xbf16>, vector<64x128xf32> -> vector<64x128xf32>
    %74 = arith.addf %66, %73 : vector<64x128xf32>
    %c5_83 = arith.constant 5 : index
    %c0_84 = arith.constant 0 : index
    %c0_85 = arith.constant 0 : index
    %75 = vector.load %arg4[%c5_83, %c0_84, %c0_85] : memref<9x32x128xbf16, #tpu.memory_space<vmem>>, vector<1x32x128xbf16>
    %76 = vector.shape_cast %75 : vector<1x32x128xbf16> to vector<32x128xbf16>
    %cst_86 = arith.constant dense<0.000000e+00> : vector<64x128xf32>
    %77 = tpu.matmul %70, %76, %cst_86 {dimension_numbers = #tpu.dot_dimension_numbers<[1], [0], [0], [1], [0, 0, 1, 1], [], []>} : vector<64x32xbf16>, vector<32x128xbf16>, vector<64x128xf32> -> vector<64x128xf32>
    %78 = arith.addf %74, %77 : vector<64x128xf32>
    %c2_87 = arith.constant 2 : index
    %c0_88 = arith.constant 0 : index
    %c0_89 = arith.constant 0 : index
    %79 = vector.load %arg7[%c2_87, %c0_88, %c0_89] : memref<10x10x16xbf16, #tpu.memory_space<vmem>>, vector<8x8x16xbf16>
    %80 = vector.shape_cast %79 : vector<8x8x16xbf16> to vector<64x16xbf16>
    %c2_90 = arith.constant 2 : index
    %c0_91 = arith.constant 0 : index
    %c0_92 = arith.constant 0 : index
    %81 = vector.load %arg8[%c2_90, %c0_91, %c0_92] : memref<10x10x32xbf16, #tpu.memory_space<vmem>>, vector<8x8x32xbf16>
    %82 = vector.shape_cast %81 : vector<8x8x32xbf16> to vector<64x32xbf16>
    %c6 = arith.constant 6 : index
    %c0_93 = arith.constant 0 : index
    %c0_94 = arith.constant 0 : index
    %83 = vector.load %arg3[%c6, %c0_93, %c0_94] : memref<9x16x128xbf16, #tpu.memory_space<vmem>>, vector<1x16x128xbf16>
    %84 = vector.shape_cast %83 : vector<1x16x128xbf16> to vector<16x128xbf16>
    %cst_95 = arith.constant dense<0.000000e+00> : vector<64x128xf32>
    %85 = tpu.matmul %80, %84, %cst_95 {dimension_numbers = #tpu.dot_dimension_numbers<[1], [0], [0], [1], [0, 0, 1, 1], [], []>} : vector<64x16xbf16>, vector<16x128xbf16>, vector<64x128xf32> -> vector<64x128xf32>
    %86 = arith.addf %78, %85 : vector<64x128xf32>
    %c6_96 = arith.constant 6 : index
    %c0_97 = arith.constant 0 : index
    %c0_98 = arith.constant 0 : index
    %87 = vector.load %arg4[%c6_96, %c0_97, %c0_98] : memref<9x32x128xbf16, #tpu.memory_space<vmem>>, vector<1x32x128xbf16>
    %88 = vector.shape_cast %87 : vector<1x32x128xbf16> to vector<32x128xbf16>
    %cst_99 = arith.constant dense<0.000000e+00> : vector<64x128xf32>
    %89 = tpu.matmul %82, %88, %cst_99 {dimension_numbers = #tpu.dot_dimension_numbers<[1], [0], [0], [1], [0, 0, 1, 1], [], []>} : vector<64x32xbf16>, vector<32x128xbf16>, vector<64x128xf32> -> vector<64x128xf32>
    %90 = arith.addf %86, %89 : vector<64x128xf32>
    %c2_100 = arith.constant 2 : index
    %c1_101 = arith.constant 1 : index
    %c0_102 = arith.constant 0 : index
    %91 = vector.load %arg7[%c2_100, %c1_101, %c0_102] : memref<10x10x16xbf16, #tpu.memory_space<vmem>>, vector<8x8x16xbf16>
    %92 = vector.shape_cast %91 : vector<8x8x16xbf16> to vector<64x16xbf16>
    %c2_103 = arith.constant 2 : index
    %c1_104 = arith.constant 1 : index
    %c0_105 = arith.constant 0 : index
    %93 = vector.load %arg8[%c2_103, %c1_104, %c0_105] : memref<10x10x32xbf16, #tpu.memory_space<vmem>>, vector<8x8x32xbf16>
    %94 = vector.shape_cast %93 : vector<8x8x32xbf16> to vector<64x32xbf16>
    %c7 = arith.constant 7 : index
    %c0_106 = arith.constant 0 : index
    %c0_107 = arith.constant 0 : index
    %95 = vector.load %arg3[%c7, %c0_106, %c0_107] : memref<9x16x128xbf16, #tpu.memory_space<vmem>>, vector<1x16x128xbf16>
    %96 = vector.shape_cast %95 : vector<1x16x128xbf16> to vector<16x128xbf16>
    %cst_108 = arith.constant dense<0.000000e+00> : vector<64x128xf32>
    %97 = tpu.matmul %92, %96, %cst_108 {dimension_numbers = #tpu.dot_dimension_numbers<[1], [0], [0], [1], [0, 0, 1, 1], [], []>} : vector<64x16xbf16>, vector<16x128xbf16>, vector<64x128xf32> -> vector<64x128xf32>
    %98 = arith.addf %90, %97 : vector<64x128xf32>
    %c7_109 = arith.constant 7 : index
    %c0_110 = arith.constant 0 : index
    %c0_111 = arith.constant 0 : index
    %99 = vector.load %arg4[%c7_109, %c0_110, %c0_111] : memref<9x32x128xbf16, #tpu.memory_space<vmem>>, vector<1x32x128xbf16>
    %100 = vector.shape_cast %99 : vector<1x32x128xbf16> to vector<32x128xbf16>
    %cst_112 = arith.constant dense<0.000000e+00> : vector<64x128xf32>
    %101 = tpu.matmul %94, %100, %cst_112 {dimension_numbers = #tpu.dot_dimension_numbers<[1], [0], [0], [1], [0, 0, 1, 1], [], []>} : vector<64x32xbf16>, vector<32x128xbf16>, vector<64x128xf32> -> vector<64x128xf32>
    %102 = arith.addf %98, %101 : vector<64x128xf32>
    %c2_113 = arith.constant 2 : index
    %c2_114 = arith.constant 2 : index
    %c0_115 = arith.constant 0 : index
    %103 = vector.load %arg7[%c2_113, %c2_114, %c0_115] : memref<10x10x16xbf16, #tpu.memory_space<vmem>>, vector<8x8x16xbf16>
    %104 = vector.shape_cast %103 : vector<8x8x16xbf16> to vector<64x16xbf16>
    %c2_116 = arith.constant 2 : index
    %c2_117 = arith.constant 2 : index
    %c0_118 = arith.constant 0 : index
    %105 = vector.load %arg8[%c2_116, %c2_117, %c0_118] : memref<10x10x32xbf16, #tpu.memory_space<vmem>>, vector<8x8x32xbf16>
    %106 = vector.shape_cast %105 : vector<8x8x32xbf16> to vector<64x32xbf16>
    %c8 = arith.constant 8 : index
    %c0_119 = arith.constant 0 : index
    %c0_120 = arith.constant 0 : index
    %107 = vector.load %arg3[%c8, %c0_119, %c0_120] : memref<9x16x128xbf16, #tpu.memory_space<vmem>>, vector<1x16x128xbf16>
    %108 = vector.shape_cast %107 : vector<1x16x128xbf16> to vector<16x128xbf16>
    %cst_121 = arith.constant dense<0.000000e+00> : vector<64x128xf32>
    %109 = tpu.matmul %104, %108, %cst_121 {dimension_numbers = #tpu.dot_dimension_numbers<[1], [0], [0], [1], [0, 0, 1, 1], [], []>} : vector<64x16xbf16>, vector<16x128xbf16>, vector<64x128xf32> -> vector<64x128xf32>
    %110 = arith.addf %102, %109 : vector<64x128xf32>
    %c8_122 = arith.constant 8 : index
    %c0_123 = arith.constant 0 : index
    %c0_124 = arith.constant 0 : index
    %111 = vector.load %arg4[%c8_122, %c0_123, %c0_124] : memref<9x32x128xbf16, #tpu.memory_space<vmem>>, vector<1x32x128xbf16>
    %112 = vector.shape_cast %111 : vector<1x32x128xbf16> to vector<32x128xbf16>
    %cst_125 = arith.constant dense<0.000000e+00> : vector<64x128xf32>
    %113 = tpu.matmul %106, %112, %cst_125 {dimension_numbers = #tpu.dot_dimension_numbers<[1], [0], [0], [1], [0, 0, 1, 1], [], []>} : vector<64x32xbf16>, vector<32x128xbf16>, vector<64x128xf32> -> vector<64x128xf32>
    %114 = arith.addf %110, %113 : vector<64x128xf32>
    %c0_126 = arith.constant 0 : index
    %c0_127 = arith.constant 0 : index
    %115 = vector.load %arg5[%c0_126, %c0_127] : memref<1x128xf32, #tpu.memory_space<vmem>>, vector<1x128xf32>
    %116 = vector.broadcast %115 : vector<1x128xf32> to vector<64x128xf32>
    %117 = arith.addf %114, %116 : vector<64x128xf32>
    %118 = vector.extract_strided_slice %117 {offsets = [0, 0], sizes = [64, 32], strides = [1, 1]} : vector<64x128xf32> to vector<64x32xf32>
    %cst_128 = arith.constant 5.000000e-01 : f32
    %119 = vector.broadcast %cst_128 : f32 to vector<64x32xf32>
    %120 = arith.mulf %119, %118 : vector<64x32xf32>
    %121 = math.tanh %120 : vector<64x32xf32>
    %cst_129 = arith.constant 1.000000e+00 : f32
    %122 = vector.broadcast %cst_129 : f32 to vector<64x32xf32>
    %123 = arith.addf %121, %122 : vector<64x32xf32>
    %cst_130 = arith.constant 5.000000e-01 : f32
    %124 = vector.broadcast %cst_130 : f32 to vector<64x32xf32>
    %125 = arith.mulf %124, %123 : vector<64x32xf32>
    %126 = vector.extract_strided_slice %117 {offsets = [0, 32], sizes = [64, 32], strides = [1, 1]} : vector<64x128xf32> to vector<64x32xf32>
    %cst_131 = arith.constant 5.000000e-01 : f32
    %127 = vector.broadcast %cst_131 : f32 to vector<64x32xf32>
    %128 = arith.mulf %127, %126 : vector<64x32xf32>
    %129 = math.tanh %128 : vector<64x32xf32>
    %cst_132 = arith.constant 1.000000e+00 : f32
    %130 = vector.broadcast %cst_132 : f32 to vector<64x32xf32>
    %131 = arith.addf %129, %130 : vector<64x32xf32>
    %cst_133 = arith.constant 5.000000e-01 : f32
    %132 = vector.broadcast %cst_133 : f32 to vector<64x32xf32>
    %133 = arith.mulf %132, %131 : vector<64x32xf32>
    %134 = vector.extract_strided_slice %117 {offsets = [0, 64], sizes = [64, 32], strides = [1, 1]} : vector<64x128xf32> to vector<64x32xf32>
    %cst_134 = arith.constant 5.000000e-01 : f32
    %135 = vector.broadcast %cst_134 : f32 to vector<64x32xf32>
    %136 = arith.mulf %135, %134 : vector<64x32xf32>
    %137 = math.tanh %136 : vector<64x32xf32>
    %cst_135 = arith.constant 1.000000e+00 : f32
    %138 = vector.broadcast %cst_135 : f32 to vector<64x32xf32>
    %139 = arith.addf %137, %138 : vector<64x32xf32>
    %cst_136 = arith.constant 5.000000e-01 : f32
    %140 = vector.broadcast %cst_136 : f32 to vector<64x32xf32>
    %141 = arith.mulf %140, %139 : vector<64x32xf32>
    %142 = vector.extract_strided_slice %117 {offsets = [0, 96], sizes = [64, 32], strides = [1, 1]} : vector<64x128xf32> to vector<64x32xf32>
    %143 = math.tanh %142 : vector<64x32xf32>
    %c0_137 = arith.constant 0 : index
    %c0_138 = arith.constant 0 : index
    %144 = vector.load %arg9[%c0_137, %c0_138] : memref<64x32xf32, #tpu.memory_space<vmem>>, vector<64x32xf32>
    %145 = arith.mulf %133, %144 : vector<64x32xf32>
    %146 = arith.mulf %125, %143 : vector<64x32xf32>
    %147 = arith.addf %145, %146 : vector<64x32xf32>
    %148 = math.tanh %147 : vector<64x32xf32>
    %149 = arith.mulf %141, %148 : vector<64x32xf32>
    %c0_139 = arith.constant 0 : index
    %c0_140 = arith.constant 0 : index
    %150 = vector.load %arg9[%c0_139, %c0_140] : memref<64x32xf32, #tpu.memory_space<vmem>>, vector<64x32xf32>
    tpu.vector_store %arg9[%c0_139, %c0_140], %147 {strides = array<i32>} : memref<64x32xf32, #tpu.memory_space<vmem>>, vector<64x32xf32>,
    %151 = vector.shape_cast %149 : vector<64x32xf32> to vector<8x8x32xf32>
    %152 = arith.truncf %151 : vector<8x8x32xf32> to vector<8x8x32xbf16>
    %c1_141 = arith.constant 1 : index
    %c1_142 = arith.constant 1 : index
    %c0_143 = arith.constant 0 : index
    %153 = vector.load %arg8[%c1_141, %c1_142, %c0_143] : memref<10x10x32xbf16, #tpu.memory_space<vmem>>, vector<8x8x32xbf16>
    tpu.vector_store %arg8[%c1_141, %c1_142, %c0_143], %152 {strides = array<i32>} : memref<10x10x32xbf16, #tpu.memory_space<vmem>>, vector<8x8x32xbf16>,
    %c0_144 = arith.constant 0 : index
    %c0_145 = arith.constant 0 : index
    %c0_146 = arith.constant 0 : index
    %c0_147 = arith.constant 0 : index
    %154 = vector.load %arg6[%c0_144, %c0_145, %c0_146, %c0_147] : memref<1x1x64x32xf32, #tpu.memory_space<vmem>>, vector<1x1x64x32xf32>
    %155 = vector.shape_cast %154 : vector<1x1x64x32xf32> to vector<64x32xf32>
    %156 = vector.shape_cast %149 : vector<64x32xf32> to vector<1x1x64x32xf32>
    tpu.vector_store %arg6[%c0_144, %c0_145, %c0_146, %c0_147], %156 {strides = array<i32>} : memref<1x1x64x32xf32, #tpu.memory_space<vmem>>, vector<1x1x64x32xf32>,
    return
  }
  func.func @transform_0(%arg0: i32, %arg1: i32) -> (i32, i32, i32, i32, i32) {
    %c0_i32 = arith.constant 0 : i32
    %c0_i32_0 = arith.constant 0 : i32
    %c0_i32_1 = arith.constant 0 : i32
    %c0_i32_2 = arith.constant 0 : i32
    return %arg0, %arg1, %c0_i32, %c0_i32_0, %c0_i32_1 : i32, i32, i32, i32, i32
  }
  func.func @transform_1(%arg0: i32, %arg1: i32) -> (i32, i32, i32) {
    %c0_i32 = arith.constant 0 : i32
    %c0_i32_0 = arith.constant 0 : i32
    %c0_i32_1 = arith.constant 0 : i32
    %c0_i32_2 = arith.constant 0 : i32
    return %c0_i32, %c0_i32_0, %c0_i32_1 : i32, i32, i32
  }
  func.func @transform_2(%arg0: i32, %arg1: i32) -> (i32, i32, i32) {
    %c0_i32 = arith.constant 0 : i32
    %c0_i32_0 = arith.constant 0 : i32
    %c0_i32_1 = arith.constant 0 : i32
    %c0_i32_2 = arith.constant 0 : i32
    return %c0_i32, %c0_i32_0, %c0_i32_1 : i32, i32, i32
  }
  func.func @transform_3(%arg0: i32, %arg1: i32) -> (i32, i32) {
    %c0_i32 = arith.constant 0 : i32
    %c0_i32_0 = arith.constant 0 : i32
    %c0_i32_1 = arith.constant 0 : i32
    return %c0_i32, %c0_i32_0 : i32, i32
  }
  func.func @transform_4(%arg0: i32, %arg1: i32) -> (i32, i32, i32, i32) {
    %c0_i32 = arith.constant 0 : i32
    %c0_i32_0 = arith.constant 0 : i32
    %c0_i32_1 = arith.constant 0 : i32
    return %arg0, %arg1, %c0_i32, %c0_i32_0 : i32, i32, i32, i32
  }
}

</mosaic_0001>

<bundles_post_ra>
// kernel: forward.3
= control target key start
LH: loop header
LB: loop body
LE: loop exit
PB: predicated region body
PF: predicated region fallthrough
CT: control target
= control target key end

     0   :  { %9 = vsyncpa [#allocation6], 0  ;;  %s6288_s0 = inlined_call_operand.vmem [shape: bf16[2,4,8,8,16], index: 0, kind: input, shape index: {}]   ;;  %s6289_s1 = inlined_call_operand.vmem [shape: bf16[9,16,128], index: 1, kind: input, shape index: {}]   ;;  %s6290_s2 = inlined_call_operand.vmem [shape: bf16[9,32,128], index: 2, kind: input, shape index: {}]   ;;  %s6291_s3 = inlined_call_operand.vmem [shape: f32[1,128], index: 3, kind: input, shape index: {}]   ;;  %s6292_s4 = inlined_call_operand.hbm [shape: f32[2,4,64,32], index: 4, kind: output, shape index: {}]  }
   0x1   :  { %11 = vsyncpa [#allocation6 + $0x1], 0  ;;  %s5253_s15 = smov 0   ;;  %s5255_s16 = smov 0  }
   0x2   :  { %s5257_s17 = smov 0   ;;  %s5259_s18 = smov 0  }
   0x3   :  { %s5261_s19 = smov 0   ;;  %s5263_s20 = smov 0  }
   0x4   :  { %s5265_s21 = smov 0   ;;  %s5267_s22 = smov 0  }
   0x5 LB: > { %s4206_s23 = sadd.s32 4294967295, %s5218_s22   ;;  %s4207_s24 = sadd.s32 4294967294, %s5218_s22   ;;  %s5218_s22 = sphi %s5267_s22, %s17_s22   ;;  %s5214_s21 = sphi %s5265_s21, %s6313_s21   ;;  %s5210_s20 = sphi %s5263_s20, %s6312_s20   ;;  %s5206_s19 = sphi %s5261_s19, %s6311_s19   ;;  %s5202_s18 = sphi %s5259_s18, %s6310_s18   ;;  %s5198_s17 = sphi %s5257_s17, %s6309_s17   ;;  %s5194_s16 = sphi %s5255_s16, %s6308_s16   ;;  %s5190_s15 = sphi %s5253_s15, %s6307_s15  }
   0x6   : > { %s26_s25 = sadd.s32 1, %s5210_s20  ;;  %s29_s26 = sadd.s32 1, %s5214_s21 }
   0x7   : > { %p27_p0 = scmp.ge.s32.totalorder %s26_s25, 4  ;;  %p139_p1 = scmp.ne.s32.totalorder %s5198_s17, %s5194_s16 }
   0x8   : > { %p140_p2 = scmp.eq.s32.totalorder %s4206_s23, 7  ;;  %p145_p5 = scmp.ne.s32.totalorder %s5194_s16, %s5190_s15 }
   0x9   : > { %s6315_s25 = smov (%p27_p0, %s26_s25), 0  ;;  %s6317_s26 = smov (!%p27_p0, %s29_s26), %s5214_s21 }
   0xa   : > { %s125_s27 = ssub.s32 %s5210_s20, %s6315_s25  ;;  %p5304_p3 = por %p140_p2, %p139_p1 }
   0xb   : > { %p31_p4 = scmp.ge.s32.totalorder %s6317_s26, 2  ;;  %p146_p6 = scmp.eq.s32.totalorder %s4207_s24, 7 }
   0xc   : > { %p4210_p7 = scmp.ge.s32.totalorder %s5218_s22, 1  ;;  %p185_p9 = scmp.lt.s32.totalorder %s5218_s22, 9 }
   0xd   : > { %s6319_s26 = smov (%p31_p4, %s6317_s26), 0  ;;  %p5313_p8 = por %p146_p6, %p145_p5 }
   0xe   : > { %s124_s30 = ssub.s32 %s5214_s21, %s6319_s26  ;;  %s129_s5 = sadd.s32 1, %s5198_s17 }
   0xf   : > { %s126_s6 = sor.u32 %s125_s27, %s124_s30  ;;  %p186_p10 = pnand %p4210_p7, %p185_p9 }
  0x10   : > { %p127_p11 = scmp.eq.s32.totalorder %s126_s6, 0  ;;  %s212_s8 = sand.u32 (!%p186_p10), 1, %s5194_s16  }
  0x11   : > { %189 = sbr.rel (%p186_p10) target bundleno = 1000 (0x3e8), region = 36  ;;  %p215_p12 = scmp.lt.s32.totalorder (!%p186_p10), %s5206_s19, 1 }
  0x12   : > { %s5322_s7 = scalar_select %p127_p11, %s5198_s17, %s129_s5  }
  0x13   : > { %s4211_s9 = sshll.u32 (!%p186_p10), %s212_s8, 6  ;;  %p217_p13 = scmp.lt.s32.totalorder (!%p186_p10), %s5202_s18, 3 }
  0x14   : > { %s5336_s5 = scalar_lea.vmem (!%p186_p10), [#allocation5], %s4211_s9  ;;  %p4215_p0 = scmp.ne.s32.totalorder (!%p186_p10), %s5202_s18, 0 }
  0x18   : > { %s216_s10 = scalar_select %p215_p12, %s5206_s19, 1 }
  0x19   : > { %s218_s11 = scalar_select %p217_p13, %s5202_s18, 3 }
  0x1a   : > { %s4213_s12 = sshll.u32 %s216_s10, 5  ;;  %228 = sbr.rel (%p4215_p0) target bundleno = 51 (0x33), region = 40  ;;  %vm229_vm0 = vcmask (!%p4215_p0), 125952   ;;  %vm231_vm1 = vcmask (!%p4215_p0), 122880   ;;  %vm251_vm2 = vcmask (!%p4215_p0), 257024   ;;  %v5220_v0 = vmov (!%p4215_p0), 0  }
  0x1b   : > { %s4212_s13 = sshll.u32 %s218_s11, 3  ;;  %230 = vst.msk [vmem:[#allocation2] sm:$0xf] (!%p4215_p0), %vm229_vm0, %v5220_v0  ;;  %233 = vst.msk [vmem:[#allocation2 + $0x8] sm:$0xf] (!%p4215_p0), %vm229_vm0, %v5220_v0  ;;  %vm253_vm3 = vcmask (!%p4215_p0), 253952  }
  0x1c   : > { %s221_s14 = sadd.s32 %s4213_s12, %s4212_s13  ;;  %235 = vst.msk [vmem:[#allocation2 + $0x10] sm:$0xf] (!%p4215_p0), %vm229_vm0, %v5220_v0  ;;  %237 = vst.msk [vmem:[#allocation2 + $0x18] sm:$0xf] (!%p4215_p0), %vm229_vm0, %v5220_v0  ;;  %vm273_vm4 = vcmask (!%p4215_p0), 261120   ;;  %v5221_v1 = vmov (!%p4215_p0), 0.0  }
  0x1d   : > { %s4214_s23 = sshll.u32 %s221_s14, 2  ;;  %239 = vst.msk [vmem:[#allocation2 + $0x20] sm:$0xf] (!%p4215_p0), %vm229_vm0, %v5220_v0  ;;  %241 = vst.msk [vmem:[#allocation2 + $0x28] sm:$0xf] (!%p4215_p0), %vm229_vm0, %v5220_v0 }
  0x1e   : > { %s5334_s30 = scalar_lea.vmem %s6288_s0, %s4214_s23  ;;  %243 = vst.msk [vmem:[#allocation2 + $0x30] sm:$0xf] (!%p4215_p0), %vm229_vm0, %v5220_v0  ;;  %245 = vst.msk [vmem:[#allocation2 + $0x38] sm:$0xf] (!%p4215_p0), %vm229_vm0, %v5220_v0 }
  0x1f   : > { %247 = vst.msk [vmem:[#allocation2 + $0x40] sm:$0xf] (!%p4215_p0), %vm229_vm0, %v5220_v0  ;;  %249 = vst.msk [vmem:[#allocation2 + $0x48] sm:$0xf] (!%p4215_p0), %vm229_vm0, %v5220_v0 }
  0x20   : > { %232 = vst.msk [vmem:[#allocation2 + $0x4] sm:$0x1] (!%p4215_p0), %vm231_vm1, %v5220_v0  ;;  %234 = vst.msk [vmem:[#allocation2 + $0xc] sm:$0x1] (!%p4215_p0), %vm231_vm1, %v5220_v0 }
  0x21   : > { %236 = vst.msk [vmem:[#allocation2 + $0x14] sm:$0x1] %vm231_vm1, %v5220_v0  ;;  %238 = vst.msk [vmem:[#allocation2 + $0x1c] sm:$0x1] %vm231_vm1, %v5220_v0 }
  0x22   : > { %240 = vst.msk [vmem:[#allocation2 + $0x24] sm:$0x1] %vm231_vm1, %v5220_v0  ;;  %242 = vst.msk [vmem:[#allocation2 + $0x2c] sm:$0x1] %vm231_vm1, %v5220_v0 }
  0x23   : > { %244 = vst.msk [vmem:[#allocation2 + $0x34] sm:$0x1] %vm231_vm1, %v5220_v0  ;;  %246 = vst.msk [vmem:[#allocation2 + $0x3c] sm:$0x1] %vm231_vm1, %v5220_v0 }
  0x24   : > { %248 = vst.msk [vmem:[#allocation2 + $0x44] sm:$0x1] %vm231_vm1, %v5220_v0  ;;  %250 = vst.msk [vmem:[#allocation2 + $0x4c] sm:$0x1] %vm231_vm1, %v5220_v0 }
  0x25   : > { %252 = vst.msk [vmem:[#allocation3] sm:$0xf] %vm251_vm2, %v5220_v0  ;;  %255 = vst.msk [vmem:[#allocation3 + $0x8] sm:$0xf] %vm251_vm2, %v5220_v0 }
  0x26   : > { %257 = vst.msk [vmem:[#allocation3 + $0x10] sm:$0xf] %vm251_vm2, %v5220_v0  ;;  %259 = vst.msk [vmem:[#allocation3 + $0x18] sm:$0xf] %vm251_vm2, %v5220_v0 }
  0x27   : > { %261 = vst.msk [vmem:[#allocation3 + $0x20] sm:$0xf] %vm251_vm2, %v5220_v0  ;;  %263 = vst.msk [vmem:[#allocation3 + $0x28] sm:$0xf] %vm251_vm2, %v5220_v0 }
  0x28   : > { %265 = vst.msk [vmem:[#allocation3 + $0x30] sm:$0xf] %vm251_vm2, %v5220_v0  ;;  %267 = vst.msk [vmem:[#allocation3 + $0x38] sm:$0xf] %vm251_vm2, %v5220_v0 }
  0x29   : > { %269 = vst.msk [vmem:[#allocation3 + $0x40] sm:$0xf] %vm251_vm2, %v5220_v0  ;;  %271 = vst.msk [vmem:[#allocation3 + $0x48] sm:$0xf] %vm251_vm2, %v5220_v0 }
  0x2a   : > { %254 = vst.msk [vmem:[#allocation3 + $0x4] sm:$0x1] %vm253_vm3, %v5220_v0  ;;  %256 = vst.msk [vmem:[#allocation3 + $0xc] sm:$0x1] %vm253_vm3, %v5220_v0 }
  0x2b   : > { %258 = vst.msk [vmem:[#allocation3 + $0x14] sm:$0x1] %vm253_vm3, %v5220_v0  ;;  %260 = vst.msk [vmem:[#allocation3 + $0x1c] sm:$0x1] %vm253_vm3, %v5220_v0 }
  0x2c   : > { %262 = vst.msk [vmem:[#allocation3 + $0x24] sm:$0x1] %vm253_vm3, %v5220_v0  ;;  %264 = vst.msk [vmem:[#allocation3 + $0x2c] sm:$0x1] %vm253_vm3, %v5220_v0 }
  0x2d   : > { %266 = vst.msk [vmem:[#allocation3 + $0x34] sm:$0x1] %vm253_vm3, %v5220_v0  ;;  %268 = vst.msk [vmem:[#allocation3 + $0x3c] sm:$0x1] %vm253_vm3, %v5220_v0 }
  0x2e   : > { %270 = vst.msk [vmem:[#allocation3 + $0x44] sm:$0x1] %vm253_vm3, %v5220_v0  ;;  %272 = vst.msk [vmem:[#allocation3 + $0x4c] sm:$0x1] %vm253_vm3, %v5220_v0 }
  0x2f   : > { %274 = vst.msk [vmem:[#allocation4] sm:$0xff] %vm273_vm4, %v5221_v1  ;;  %275 = vst.msk [vmem:[#allocation4 + $0x8] sm:$0xff] %vm273_vm4, %v5221_v1 }
  0x30   : > { %276 = vst.msk [vmem:[#allocation4 + $0x10] sm:$0xff] %vm273_vm4, %v5221_v1  ;;  %277 = vst.msk [vmem:[#allocation4 + $0x18] sm:$0xff] %vm273_vm4, %v5221_v1 }
  0x31   : > { %278 = vst.msk [vmem:[#allocation4 + $0x20] sm:$0xff] %vm273_vm4, %v5221_v1  ;;  %279 = vst.msk [vmem:[#allocation4 + $0x28] sm:$0xff] %vm273_vm4, %v5221_v1 }
  0x32   : > { %280 = vst.msk [vmem:[#allocation4 + $0x30] sm:$0xff] %vm273_vm4, %v5221_v1  ;;  %281 = vst.msk [vmem:[#allocation4 + $0x38] sm:$0xff] %vm273_vm4, %v5221_v1 }
  0x33 PF: > { %v5017_v2 = vld [vmem:[%s6290_s2] sm:$0xff]   ;;  %v5019_v4 = vld [vmem:[%s6290_s2 + $0x8] sm:$0xff]   ;;  %vm479_vm5 = vcmask 261120   ;;  %v5021_v6 = vld [vmem:[#allocation3] ss:$8 sps:$4 sm:$0xff]   ;;  %vm371_vm9 = vcmask 125952  }
  0x34   : > { %v5018_v3 = vld [vmem:[%s6290_s2 + $0x40] sm:$0xff]   ;;  %4605 = vmatprep.subr.bf16.mxu1 %v5017_v2  ;;  %v5020_v5 = vld [vmem:[%s6290_s2 + $0x48] sm:$0xff]   ;;  %4609 = vmatprep.mubr.msk.bf16.mxu1 %vm479_vm5, %v5021_v6  ;;  %vm677_vm6 = vsmask.f32 3328  ;;  %vm678_vm7 = vsmask.f32 7440 }
  0x35   : > { %4606 = vmatpush3.bf16.msra.mxu1 %v5017_v2  ;;  %4703 = vmatprep.subr.bf16.mxu0 %v5018_v3  ;;  %v5022_v7 = vld [vmem:[#allocation3 + $0x10] ss:$8 sps:$4 sm:$0xff]   ;;  %v1856_v9 = vld [vmem:[#allocation3 + $0x8] sm:$0xf]  ;;  %v5383_v10 = vld [vmem:[#allocation3 + $0xc] sm:$0x1] }
  0x36   : > { %4704 = vmatpush3.bf16.msra.mxu0 %v5018_v3  ;;  %4607 = vmatprep.subr.bf16.mxu1 %v5019_v4  ;;  %v5023_v8 = vld [vmem:[%s6289_s1] sm:$0xff]   ;;  %v1873_v12 = vshrl.u32 %v1856_v9, 16  ;;  %v1876_v13 = vshll.u32 %v1856_v9, 16  ;;  %v1882_v15 = vshll.u32 %v5383_v10, 16  ;;  %v5393_v24 = vld [vmem:[%s6289_s1 + $0x28] sm:$0xff]   ;;  %vm5404_vm8 = vmor %vm677_vm6, %vm678_vm7  ;;  %v2286_v52 = vrot.slane %v5383_v10, 5 }
  0x37   : > { %4705 = vmatprep.subr.bf16.mxu0 %v5020_v5  ;;  %v1858_v11 = vld [vmem:[#allocation3 + $0x10] sm:$0xf]  ;;  %v5385_v14 = vld [vmem:[#allocation3 + $0x14] sm:$0x1]  ;;  %v1860_v27 = vld [vmem:[#allocation3 + $0x18] sm:$0xf] }
  0x38   : > { %v1887_v16 = vshrl.u32 %v1858_v11, 16  ;;  %v1890_v17 = vshll.u32 %v1858_v11, 16  ;;  %v1875_v18 = vrot.slane %v1873_v12, 4  ;;  %v1878_v19 = vrot.slane %v1876_v13, 5  ;;  %v5395_v28 = vld [vmem:[#allocation3 + $0x1c] sm:$0x1] }
  0x39   : > { %4608 = vmatpush3.bf16.msra.mxu1 %v5019_v4  ;;  %v1896_v20 = vshll.u32 %v5385_v14, 16  ;;  %v1884_v21 = vrot.slane %v1882_v15, 5  ;;  %v5400_v29 = vld [vmem:[%s6289_s1 + $0x8] sm:$0xff]   ;;  %v1862_v32 = vld [vmem:[#allocation3 + $0x20] sm:$0xf]  ;;  %v1901_v34 = vshrl.u32 %v1860_v27, 16 }
  0x3a   : > { %4706 = vmatpush3.bf16.msra.mxu0 %v5020_v5  ;;  %4617 = vmatprep.subr.bf16.mxu1 %v5023_v8  ;;  %v1889_v22 = vrot.slane %v1887_v16, 4  ;;  %v1892_v23 = vrot.slane %v1890_v17, 5  ;;  %v1879_v25 = vor.u32 %v1878_v19, %v1875_v18  ;;  %v5409_v33 = vld [vmem:[#allocation3 + $0x24] sm:$0x1]  ;;  %v1904_v35 = vshll.u32 %v1860_v27, 16  ;;  %s5222_s10 = smov 32  }
  0x3b   : > { %v1898_v26 = vrot.slane %v1896_v20, 5  ;;  %4715 = vmatprep.subr.bf16.mxu0 %v5393_v24  ;;  %v1910_v37 = vshll.u32 %v5395_v28, 16  ;;  %v1915_v38 = vshrl.u32 %v1862_v32, 16  ;;  %v1918_v39 = vshll.u32 %v1862_v32, 16  ;;  %v5025_v47 = vld [vmem:[#allocation3 + $0x20] ss:$8 sps:$4 sm:$0xff]  }
  0x3c   : > { %4610 = vmatmul.mubr.msk.bf16.vlgmr.msra.gmra.mrb[0].mxu1 %vm479_vm5, %v5022_v7  ;;  %v1893_v31 = vor.u32 %v1892_v23, %v1889_v22  ;;  %v1880_v36 = vrot.slane %v1879_v25, 4  ;;  %v1903_v41 = vrot.slane %v1901_v34, 4  ;;  %v1906_v42 = vrot.slane %v1904_v35, 5  ;;  %v5026_v55 = vld [vmem:[#allocation3 + $0x30] ss:$8 sps:$4 sm:$0xff]   ;;  %v5437_v13 = vld [vmem:[%s6290_s2 + $0x50] sm:$0xff]  }
  0x3d   : > { %4618 = vmatpush3.bf16.msra.mxu1 %v5023_v8  ;;  %v1924_v43 = vshll.u32 %v5409_v33, 16  ;;  %v1917_v45 = vrot.slane %v1915_v38, 4  ;;  %v1920_v46 = vrot.slane %v1918_v39, 5  ;;  %v1912_v50 = vrot.slane %v1910_v37, 5  ;;  %4613 = vmatprep.mubr.msk.bf16.mxu1 %vm479_vm5, %v5025_v47  ;;  %v1864_v56 = vld [vmem:[#allocation3 + $0x28] sm:$0xf] }
  0x3e   : > { %4627 = vmatprep.subr.bf16.mxu1 %v5400_v29  ;;  %v1894_v40 = vrot.slane %v1893_v31, 4  ;;  %v1885_v44 = vsel %vm5404_vm8, %v1880_v36, %v1884_v21  ;;  %v1907_v49 = vor.u32 %v1906_v42, %v1903_v41  ;;  %v5420_v58 = vld [vmem:[#allocation3 + $0x2c] sm:$0x1]  ;;  %v1866_v59 = vld [vmem:[#allocation3 + $0x30] sm:$0xf]  ;;  %v1929_v60 = vshrl.u32 %v1864_v56, 16 }
  0x3f   : > { %v1921_v53 = vor.u32 %v1920_v46, %v1917_v45  ;;  %v1926_v54 = vrot.slane %v1924_v43, 5  ;;  %v5424_v62 = vld [vmem:[#allocation3 + $0x34] sm:$0x1]  ;;  %v1932_v63 = vshll.u32 %v1864_v56, 16  ;;  %v1938_v0 = vshll.u32 %v5420_v58, 16  ;;  %s5223_s11 = smov 96  }
  0x40   : > { %v1899_v48 = vsel %vm5404_vm8, %v1894_v40, %v1898_v26  ;;  %v1908_v57 = vrot.slane %v1907_v49, 4  ;;  %v1943_v1 = vshrl.u32 %v1866_v59, 16  ;;  %v1931_v3 = vrot.slane %v1929_v60, 4  ;;  %v1868_v6 = vld [vmem:[#allocation3 + $0x38] sm:$0xf]  ;;  %s5224_s12 = smov 64  }
  0x41   : > { %v4341_v51 = vcombine.low %v1885_v44, %v1899_v48  ;;  %v1922_v61 = vrot.slane %v1921_v53, 4  ;;  %v1946_v4 = vshll.u32 %v1866_v59, 16  ;;  %v1952_v5 = vshll.u32 %v5424_v62, 16  ;;  %v5432_v12 = vld [vmem:[#allocation3 + $0x3c] sm:$0x1]  ;;  %s4493_s13 = sshll.u32 %s5202_s18, 3 }
  0x42   : > { %v1913_v2 = vsel %vm5404_vm8, %v1908_v57, %v1912_v50  ;;  %v1934_v8 = vrot.slane %v1932_v63, 5  ;;  %v1940_v9 = vrot.slane %v1938_v0, 5  ;;  %v1945_v11 = vrot.slane %v1943_v1, 4  ;;  %v1870_v18 = vld [vmem:[#allocation3 + $0x40] sm:$0xf]  ;;  %s4494_s14 = sshll.u32 %s5206_s19, 5 }
  0x43   : > { %4707 = vmatprep.mubr.msk.bf16.mxu0 %vm479_vm5, %v4341_v51  ;;  %v1927_v7 = vsel %vm5404_vm8, %v1922_v61, %v1926_v54  ;;  %vm377_vm10 = vcmask 122880   ;;  %v1948_v16 = vrot.slane %v1946_v4, 5  ;;  %v1954_v17 = vrot.slane %v1952_v5, 5  ;;  %v5439_v19 = vld [vmem:[#allocation3 + $0x44] sm:$0x1]  ;;  %s4118_s23 = sadd.s32 %s4494_s14, %s4493_s13  ;;  %s6218_s6 = scalar_lea.sflag [#allocation6], %s212_s8 }
  0x44   : > { %4614 = vmatmul.mubr.msk.bf16.gmra.mrb[4].mxu1 %vm479_vm5, %v5026_v55  ;;  %v4342_v15 = vcombine.low %v1913_v2, %v1927_v7  ;;  %v1935_v20 = vor.u32 %v1934_v8, %v1931_v3  ;;  %v1957_v21 = vshrl.u32 %v1868_v6, 16  ;;  %v1960_v22 = vshll.u32 %v1868_v6, 16  ;;  %v282_v32 = vld [vmem:[%s5334_s30] sm:$0xf]  ;;  %v283_v42 = vld [vmem:[%s5334_s30 + $0x4] sm:$0xf] }
  0x45   : > { %v1966_v23 = vshll.u32 %v5432_v12, 16  ;;  %v1949_v25 = vor.u32 %v1948_v16, %v1945_v11  ;;  %v1971_v26 = vshrl.u32 %v1870_v18, 16  ;;  %v1974_v27 = vshll.u32 %v1870_v18, 16  ;;  %v284_v47 = vld [vmem:[%s5334_s30 + $0x8] sm:$0xf]  ;;  %s4495_s18 = sshll.u32 %s4118_s23, 7 }
  0x46   : > { %4708 = vmatmul.mubr.msk.bf16.vlgmr.msra.gmra.mrb[0].mxu0 %vm479_vm5, %v4342_v15  ;;  %v1980_v31 = vshll.u32 %v5439_v19, 16  ;;  %v1936_v34 = vrot.slane %v1935_v20, 4  ;;  %v1959_v35 = vrot.slane %v1957_v21, 4  ;;  %v1962_v36 = vrot.slane %v1960_v22, 5  ;;  %v374_v49 = vld [vmem:[#allocation2 + $0x8] sm:$0xf]  ;;  %s6212_s27 = scalar_lea.hbm %s6292_s4, %s4495_s18 }
  0x47   : > { %4716 = vmatpush3.bf16.msra.mxu0 %v5393_v24  ;;  %v1968_v37 = vrot.slane %v1966_v23, 5  ;;  %v1950_v38 = vrot.slane %v1949_v25, 4  ;;  %v1973_v39 = vrot.slane %v1971_v26, 4  ;;  %v1976_v40 = vrot.slane %v1974_v27, 5  ;;  %v383_v56 = vld [vmem:[#allocation2 + $0x10] sm:$0xf] }
  0x48   : > { %v1982_v41 = vrot.slane %v1980_v31, 5  ;;  %4725 = vmatprep.subr.bf16.mxu0 %v5437_v13  ;;  %v1941_v43 = vsel %vm5404_vm8, %v1936_v34, %v1940_v9  ;;  %v1963_v44 = vor.u32 %v1962_v36, %v1959_v35  ;;  %v291_v45 = vshrl.u32 %v282_v32, 16  ;;  %v389_v3 = vld [vmem:[#allocation2 + $0x18] sm:$0xf]  ;;  %v380_v4 = vld [vmem:[#allocation2 + $0xc] sm:$0x1] }
  0x49   : > { %v294_v46 = vshll.u32 %v282_v32, 16  ;;  %v1955_v24 = vsel %vm5404_vm8, %v1950_v38, %v1954_v17  ;;  %v1977_v48 = vor.u32 %v1976_v40, %v1973_v39  ;;  %vm372_vm11 = vsmask.f32 7938  ;;  %v386_v11 = vld [vmem:[#allocation2 + $0x14] sm:$0x1] }
  0x4a   : > { %v299_v50 = vshrl.u32 %v283_v42, 16  ;;  %v4343_v51 = vcombine.low %v1941_v43, %v1955_v24  ;;  %v1964_v53 = vrot.slane %v1963_v44, 4  ;;  %v293_v54 = vrot.slane %v291_v45, 7  ;;  %vm5455_vm13 = vmand %vm371_vm9, %vm372_vm11  ;;  %v285_v18 = vld [vmem:[%s5334_s30 + $0xc] sm:$0xf] }
  0x4b   : > { %v302_v55 = vshll.u32 %v283_v42, 16  ;;  %vm1164_vm12 = vcmask 1042432   ;;  %v1978_v57 = vrot.slane %v1977_v48, 4  ;;  %v307_v61 = vshrl.u32 %v284_v47, 16  ;;  %v392_v20 = vld [vmem:[#allocation2 + $0x1c] sm:$0x1] }
  0x4c   : > { %v301_v60 = vrot.slane %v299_v50, 7  ;;  %v310_v63 = vshll.u32 %v284_v47, 16  ;;  %4711 = vmatprep.mubr.msk.bf16.mxu0 %vm479_vm5, %v4343_v51  ;;  %v1969_v0 = vsel %vm5404_vm8, %v1964_v53, %v1968_v37  ;;  %v296_v1 = vor.u32 %v294_v46, %v293_v54  ;;  %v286_v32 = vld [vmem:[%s5334_s30 + $0x10] sm:$0xf]  ;;  %v287_v38 = vld [vmem:[%s5334_s30 + $0x14] sm:$0xf] }
  0x4d   : > { %v297_v2 = vrot.slane %v293_v54, 4  ;;  %vm378_vm14 = vsmask.f32 256  ;;  %v1983_v5 = vsel %vm5404_vm8, %v1978_v57, %v1982_v41  ;;  %vm583_vm15 = vcmask 130048   ;;  %v288_v39 = vld [vmem:[%s5334_s30 + $0x18] sm:$0xf] }
  0x4e   : > { %v304_v6 = vor.u32 %v302_v55, %v301_v60  ;;  %v309_v7 = vrot.slane %v307_v61, 7  ;;  %v305_v8 = vrot.slane %v301_v60, 4  ;;  %vm5466_vm0 = vmand %vm377_vm10, %vm378_vm14  ;;  %v4344_v15 = vcombine.low %v1969_v0, %v1983_v5  ;;  %v395_v41 = vld [vmem:[#allocation2 + $0x20] sm:$0xf]  ;;  %v398_v45 = vld [vmem:[#allocation2 + $0x24] sm:$0x1] }
  0x4f   : > { %v375_v16 = vsel %vm5455_vm13, %v296_v1, %v374_v49  ;;  %v381_v17 = vsel %vm5466_vm0, %v297_v2, %v380_v4  ;;  %v2290_v26 = vrot.slane %v5385_v14, 5  ;;  %vm1165_vm1 = vcmask 1046532   ;;  %v401_v47 = vld [vmem:[#allocation2 + $0x28] sm:$0xf]  ;;  %v407_v53 = vld [vmem:[#allocation2 + $0x30] sm:$0xf] }
  0x50   : > { %376 = vst [vmem:[#allocation2 + $0x8] sm:$0xf] %v375_v16  ;;  %v312_v21 = vor.u32 %v310_v63, %v309_v7  ;;  %v313_v22 = vrot.slane %v309_v7, 4  ;;  %v384_v23 = vsel %vm5455_vm13, %v304_v6, %v383_v56  ;;  %382 = vst [vmem:[#allocation2 + $0xc] sm:$0x1] %v381_v17  ;;  %v387_v25 = vsel %vm5466_vm0, %v305_v8, %v386_v11 }
  0x51   : > { %4712 = vmatmul.mubr.msk.bf16.gmra.mrb[4].mxu0 %vm479_vm5, %v4344_v15  ;;  %385 = vst [vmem:[#allocation2 + $0x10] sm:$0xf] %v384_v23  ;;  %388 = vst [vmem:[#allocation2 + $0x14] sm:$0x1] %v387_v25  ;;  %v315_v27 = vshrl.u32 %v285_v18, 16  ;;  %v318_v31 = vshll.u32 %v285_v18, 16 }
  0x52   : > { %v390_v34 = vsel %vm5455_vm13, %v312_v21, %v389_v3  ;;  %v393_v35 = vsel %vm5466_vm0, %v313_v22, %v392_v20  ;;  %v323_v36 = vshrl.u32 %v286_v32, 16  ;;  %v326_v37 = vshll.u32 %v286_v32, 16  ;;  %v413_v54 = vld [vmem:[#allocation2 + $0x38] sm:$0xf]  ;;  %v404_v55 = vld [vmem:[#allocation2 + $0x2c] sm:$0x1]  ;;  %vm5491_vm2 = vmor %vm1164_vm12, %vm1165_vm1 }
  0x53   : > { %391 = vst [vmem:[#allocation2 + $0x18] sm:$0xf] %v390_v34  ;;  %v317_v40 = vrot.slane %v315_v27, 7  ;;  %394 = vst [vmem:[#allocation2 + $0x1c] sm:$0x1] %v393_v35  ;;  %v331_v42 = vshrl.u32 %v287_v38, 16 }
  0x54   : > { %v334_v43 = vshll.u32 %v287_v38, 16  ;;  %v339_v44 = vshrl.u32 %v288_v39, 16  ;;  %v325_v46 = vrot.slane %v323_v36, 7  ;;  %v342_v24 = vshll.u32 %v288_v39, 16  ;;  %v410_v63 = vld [vmem:[#allocation2 + $0x34] sm:$0x1] }
  0x55   : > { %v320_v48 = vor.u32 %v318_v31, %v317_v40  ;;  %v321_v49 = vrot.slane %v317_v40, 4  ;;  %v333_v50 = vrot.slane %v331_v42, 7  ;;  %v2294_v56 = vrot.slane %v5395_v28, 5  ;;  %v5506_v15 = vld [vmem:[%s6290_s2 + $0x10] sm:$0xff]   ;;  %v416_v42 = vld [vmem:[#allocation2 + $0x3c] sm:$0x1] }
  0x56   : > { %v341_v51 = vrot.slane %v339_v44, 7  ;;  %v328_v60 = vor.u32 %v326_v37, %v325_v46  ;;  %v329_v61 = vrot.slane %v325_v46, 4  ;;  %v289_v37 = vld [vmem:[%s5334_s30 + $0x1c] sm:$0xf]  ;;  %v4483_v30 = vld [vmem:[%s6291_s3] ss:$0 sm:$0xff] }
  0x57   : > { %v5027_v0 = vld [vmem:[#allocation2] ss:$8 sps:$4 sm:$0xff]   ;;  %v1729_v1 = vld [vmem:[#allocation2 + $0xc] sm:$0x1]  ;;  %v396_v2 = vsel %vm5455_vm13, %v320_v48, %v395_v41  ;;  %v399_v3 = vsel %vm5466_vm0, %v321_v49, %v398_v45  ;;  %v336_v4 = vor.u32 %v334_v43, %v333_v50  ;;  %v337_v21 = vrot.slane %v333_v50, 4  ;;  %s4121_s30 = sshll.u32 %s5336_s5, 4  ;;  %s6205_s30 = int_to_ptr.vmem [resolvable:$true] %s4121_s30 }
  0x58   : > { %v344_v5 = vor.u32 %v342_v24, %v341_v51  ;;  %v1731_v6 = vld [vmem:[#allocation2 + $0x14] sm:$0x1]  ;;  %v2204_v7 = vld [vmem:[#allocation2 + $0x8] sm:$0xe]  ;;  %397 = vst [vmem:[#allocation2 + $0x20] sm:$0xf] %v396_v2  ;;  %v402_v8 = vsel %vm5455_vm13, %v328_v60, %v401_v47  ;;  %v405_v11 = vsel %vm5466_vm0, %v329_v61, %v404_v55  ;;  %4619 = vmatprep.mubr.msk.bf16.mxu1 %vm583_vm15, %v5027_v0 }
  0x59   : > { %400 = vst [vmem:[#allocation2 + $0x24] sm:$0x1] %v399_v3  ;;  %v2205_v16 = vld [vmem:[#allocation2 + $0x10] sm:$0xe]  ;;  %v4351_v17 = vrot.slane %v2204_v7, 9  ;;  %v2230_v18 = vrot.slane %v1729_v1, 5  ;;  %v408_v27 = vsel %vm5455_vm13, %v336_v4, %v407_v53  ;;  %v411_v36 = vsel %vm5466_vm0, %v337_v21, %v410_v63 }
  0x5a   : > { %v2234_v20 = vrot.slane %v1731_v6, 5  ;;  %403 = vst [vmem:[#allocation2 + $0x28] sm:$0xf] %v402_v8  ;;  %406 = vst [vmem:[#allocation2 + $0x2c] sm:$0x1] %v405_v11  ;;  %v4352_v23 = vrot.slane %v2205_v16, 9  ;;  %v414_v31 = vsel %vm5455_vm13, %v344_v5, %v413_v54 }
  0x5b   : > { %v5028_v22 = vld [vmem:[#allocation2 + $0x10] ss:$8 sps:$4 sm:$0xff]   ;;  %v345_v25 = vrot.slane %v341_v51, 4  ;;  %v2231_v32 = vsel %vm5491_vm2, %v4351_v17, %v2230_v18  ;;  %v1733_v34 = vld [vmem:[#allocation2 + $0x1c] sm:$0x1]  ;;  %v347_v41 = vshrl.u32 %v289_v37, 16 }
  0x5c   : > { %v2206_v35 = vld [vmem:[#allocation2 + $0x18] sm:$0xe]  ;;  %409 = vst [vmem:[#allocation2 + $0x30] sm:$0xf] %v408_v27  ;;  %415 = vst [vmem:[#allocation2 + $0x38] sm:$0xf] %v414_v31  ;;  %4620 = vmatmul.mubr.msk.bf16.vlgmr.msra.gmra.mrb[0].mxu1 %vm583_vm15, %v5028_v22  ;;  %v2235_v38 = vsel %vm5491_vm2, %v4352_v23, %v2234_v20 }
  0x5d   : > { %v4353_v39 = vrot.slane %v2206_v35, 9  ;;  %v2238_v40 = vrot.slane %v1733_v34, 5  ;;  %412 = vst [vmem:[#allocation2 + $0x34] sm:$0x1] %v411_v36  ;;  %v2298_v43 = vrot.slane %v5409_v33, 5  ;;  %v4369_v44 = vcombine.low %v2231_v32, %v2235_v38  ;;  %4628 = vmatpush3.bf16.msra.mxu1 %v5400_v29  ;;  %v5033_v3 = vld [vmem:[%s6290_s2 + $0x58] sm:$0xff]  }
  0x5e   : > { %v350_v45 = vshll.u32 %v289_v37, 16  ;;  %v417_v46 = vsel %vm5466_vm0, %v345_v25, %v416_v42  ;;  %v419_v47 = vld [vmem:[#allocation2 + $0x40] sm:$0xf]  ;;  %v349_v24 = vrot.slane %v347_v41, 7  ;;  %v422_v48 = vld [vmem:[#allocation2 + $0x44] sm:$0x1]  ;;  %4637 = vmatprep.subr.bf16.mxu1 %v5506_v15 }
  0x5f   : > { %418 = vst [vmem:[#allocation2 + $0x3c] sm:$0x1] %v417_v46  ;;  %v661_v49 = vld [vmem:[#allocation2] sm:$0xf]  ;;  %v2302_v50 = vrot.slane %v5420_v58, 5  ;;  %v2306_v51 = vrot.slane %v5424_v62, 5  ;;  %4717 = vmatprep.mubr.msk.bf16.mxu0 %vm583_vm15, %v4369_v44  ;;  %v2239_v55 = vsel %vm5491_vm2, %v4353_v39, %v2238_v40 }
  0x60   : > { %v2310_v53 = vrot.slane %v5432_v12, 5  ;;  %v1735_v29 = vld [vmem:[#allocation2 + $0x24] sm:$0x1]  ;;  %v2207_v54 = vld [vmem:[#allocation2 + $0x20] sm:$0xe]  ;;  %v352_v0 = vor.u32 %v350_v45, %v349_v24  ;;  %v353_v4 = vrot.slane %v349_v24, 4 }
  0x61   : > { %v4354_v60 = vrot.slane %v2207_v54, 9  ;;  %v2242_v61 = vrot.slane %v1735_v29, 5  ;;  %v5031_v63 = vld [vmem:[#allocation2 + $0x20] ss:$8 sps:$4 sm:$0xff]   ;;  %v1737_v1 = vld [vmem:[#allocation2 + $0x2c] sm:$0x1] }
  0x62   : > { %v2208_v2 = vld [vmem:[#allocation2 + $0x28] sm:$0xe]  ;;  %v5535_v5 = vld [vmem:[#allocation2 + $0x4] sm:$0x1]  ;;  %v681_v6 = vshrl.u32 %v661_v49, 16  ;;  %4623 = vmatprep.mubr.msk.bf16.mxu1 %vm583_vm15, %v5031_v63  ;;  %v420_v11 = vsel %vm5455_vm13, %v352_v0, %v419_v47  ;;  %v2246_v21 = vrot.slane %v1737_v1, 5  ;;  %v423_v22 = vsel %vm5466_vm0, %v353_v4, %v422_v48 }
  0x63   : > { %v2243_v7 = vsel %vm5491_vm2, %v4354_v60, %v2242_v61  ;;  %v5032_v8 = vld [vmem:[#allocation2 + $0x30] ss:$8 sps:$4 sm:$0xff]   ;;  %v4355_v20 = vrot.slane %v2208_v2, 9  ;;  %421 = vst [vmem:[#allocation2 + $0x40] sm:$0xf] %v420_v11  ;;  %v684_v38 = vshll.u32 %v661_v49, 16 }
  0x64   : > { %v4370_v16 = vcombine.low %v2239_v55, %v2243_v7  ;;  %v1739_v17 = vld [vmem:[#allocation2 + $0x34] sm:$0x1]  ;;  %v2209_v18 = vld [vmem:[#allocation2 + $0x30] sm:$0xe]  ;;  %4624 = vmatmul.mubr.msk.bf16.gmra.mrb[4].mxu1 %vm583_vm15, %v5032_v8  ;;  %424 = vst [vmem:[#allocation2 + $0x44] sm:$0x1] %v423_v22 }
  0x65   : > { %v4356_v23 = vrot.slane %v2209_v18, 9  ;;  %v2250_v25 = vrot.slane %v1739_v17, 5  ;;  %v2210_v27 = vld [vmem:[#allocation2 + $0x38] sm:$0xe]  ;;  %v663_v31 = vld [vmem:[#allocation2 + $0x8] sm:$0xf]  ;;  %v2247_v59 = vsel %vm5491_vm2, %v4355_v20, %v2246_v21 }
  0x66   : > { %4718 = vmatmul.mubr.msk.bf16.vlgmr.msra.gmra.mrb[0].mxu0 %vm583_vm15, %v4370_v16  ;;  %v1741_v32 = vld [vmem:[#allocation2 + $0x3c] sm:$0x1]  ;;  %v4357_v34 = vrot.slane %v2210_v27, 9  ;;  %v5548_v35 = vld [vmem:[#allocation2 + $0xc] sm:$0x1]  ;;  %v683_v36 = vrot.slane %v681_v6, 4 }
  0x67   : > { %4726 = vmatpush3.bf16.msra.mxu0 %v5437_v13  ;;  %v2251_v9 = vsel %vm5491_vm2, %v4356_v23, %v2250_v25  ;;  %v2254_v37 = vrot.slane %v1741_v32, 5  ;;  %v690_v39 = vshll.u32 %v5535_v5, 16  ;;  %v665_v40 = vld [vmem:[#allocation2 + $0x10] sm:$0xf]  ;;  %v695_v42 = vshrl.u32 %v663_v31, 16  ;;  %s5124_s9 = scalar_lea.vmem %s6205_s30, 1024 }
  0x68   : > { %v4371_v41 = vcombine.low %v2247_v59, %v2251_v9  ;;  %4727 = vmatprep.subr.bf16.mxu0 %v5033_v3  ;;  %v698_v44 = vshll.u32 %v663_v31, 16  ;;  %v704_v45 = vshll.u32 %v5548_v35, 16  ;;  %v5555_v46 = vld [vmem:[#allocation2 + $0x14] sm:$0x1]  ;;  %v686_v24 = vrot.slane %v684_v38, 5  ;;  %p5125_p1 = scmp.ne.s32.totalorder %s6205_s30, %s5124_s9 }
  0x69   : > { %v5560_v13 = vld [vmem:[%s6289_s1 + $0x30] sm:$0xff]   ;;  %v2255_v47 = vsel %vm5491_vm2, %v4357_v34, %v2254_v37  ;;  %v692_v48 = vrot.slane %v690_v39, 5  ;;  %v667_v49 = vld [vmem:[#allocation2 + $0x18] sm:$0xf]  ;;  %v5564_v29 = vld [vmem:[#allocation2 + $0x1c] sm:$0x1] }
  0x6a   : > { %4721 = vmatprep.mubr.msk.bf16.mxu0 %vm583_vm15, %v4371_v41  ;;  %v697_v54 = vrot.slane %v695_v42, 4  ;;  %v700_v55 = vrot.slane %v698_v44, 5  ;;  %v706_v60 = vrot.slane %v704_v45, 5  ;;  %v709_v61 = vshrl.u32 %v665_v40, 16  ;;  %v2211_v63 = vld [vmem:[#allocation2 + $0x40] sm:$0xe]  ;;  %p5126_p2 = pnand %p5125_p1, %p5304_p3 }
  0x6b   : > { %4728 = vmatpush3.bf16.msra.mxu0 %v5033_v3  ;;  %v687_v0 = vor.u32 %v686_v24, %v683_v36  ;;  %v712_v1 = vshll.u32 %v665_v40, 16  ;;  %v718_v2 = vshll.u32 %v5555_v46, 16  ;;  %v723_v4 = vshrl.u32 %v667_v49, 16  ;;  %v1743_v6 = vld [vmem:[#allocation2 + $0x44] sm:$0x1] }
  0x6c   : > { %v4358_v7 = vrot.slane %v2211_v63, 9  ;;  %v701_v8 = vor.u32 %v700_v55, %v697_v54  ;;  %v711_v11 = vrot.slane %v709_v61, 4  ;;  %v726_v16 = vshll.u32 %v667_v49, 16  ;;  %4737 = vmatprep.subr.bf16.mxu0 %v5560_v13  ;;  %v2260_v27 = vld [vmem:[#allocation3 + $0x8] sm:$0xe]  ;;  %p5127_p4 = pneg %p5126_p2 }
  0x6d   : > { %v2258_v17 = vrot.slane %v1743_v6, 5  ;;  %v688_v18 = vrot.slane %v687_v0, 4  ;;  %v714_v20 = vrot.slane %v712_v1, 5  ;;  %v720_v21 = vrot.slane %v718_v2, 5  ;;  %v2261_v34 = vld [vmem:[#allocation3 + $0x10] sm:$0xe] }
  0x6e   : > { %v702_v22 = vrot.slane %v701_v8, 4  ;;  %v725_v23 = vrot.slane %v723_v4, 4  ;;  %v728_v25 = vrot.slane %v726_v16, 5  ;;  %v732_v3 = vshll.u32 %v5564_v29, 16  ;;  %v2262_v40 = vld [vmem:[#allocation3 + $0x18] sm:$0xe] }
  0x6f   : > { %v2259_v31 = vsel %vm5491_vm2, %v4358_v7, %v2258_v17  ;;  %v693_v59 = vsel %vm5404_vm8, %v688_v18, %v692_v48  ;;  %v715_v32 = vor.u32 %v714_v20, %v711_v11  ;;  %v4359_v36 = vrot.slane %v2260_v27, 9  ;;  %v2263_v24 = vld [vmem:[#allocation3 + $0x20] sm:$0xe]  ;;  %v669_v48 = vld [vmem:[#allocation2 + $0x20] sm:$0xf]  ;;  %v5036_v2 = vld [vmem:[%s6290_s2 + $0x18] sm:$0xff]  }
  0x70   : > { %v4372_v9 = vcombine.low %v2255_v47, %v2259_v31  ;;  %v707_v37 = vsel %vm5404_vm8, %v702_v22, %v706_v60  ;;  %v729_v38 = vor.u32 %v728_v25, %v725_v23  ;;  %v734_v39 = vrot.slane %v732_v3, 5  ;;  %v5581_v55 = vld [vmem:[#allocation2 + $0x24] sm:$0x1]  ;;  %v5590_v63 = vld [vmem:[#allocation2 + $0x2c] sm:$0x1]  ;;  %v5617_v31 = vld [vmem:[%s6289_s1 + $0x10] sm:$0xff]  }
  0x71   : > { %v4237_v41 = vcombine.low %v693_v59, %v707_v37  ;;  %v716_v42 = vrot.slane %v715_v32, 4  ;;  %v2287_v44 = vsel %vm5491_vm2, %v4359_v36, %v2286_v52  ;;  %v4360_v45 = vrot.slane %v2261_v34, 9  ;;  %v671_v52 = vld [vmem:[#allocation2 + $0x28] sm:$0xf]  ;;  %v673_v7 = vld [vmem:[#allocation2 + $0x30] sm:$0xf] }
  0x72   : > { %4722 = vmatmul.mubr.msk.bf16.gmra.mrb[4].mxu0 %vm583_vm15, %v4372_v9  ;;  %v730_v49 = vrot.slane %v729_v38, 4  ;;  %v4361_v47 = vrot.slane %v2262_v40, 9  ;;  %v4362_v54 = vrot.slane %v2263_v24, 9  ;;  %v737_v60 = vshrl.u32 %v669_v48, 16  ;;  %v5606_v8 = vld [vmem:[#allocation2 + $0x34] sm:$0x1] }
  0x73   : > { %4629 = vmatprep.mubr.msk.bf16.mxu1 %vm583_vm15, %v4237_v41  ;;  %v721_v61 = vsel %vm5404_vm8, %v716_v42, %v720_v21  ;;  %v2291_v10 = vsel %vm5491_vm2, %v4360_v45, %v2290_v26  ;;  %v740_v0 = vshll.u32 %v669_v48, 16  ;;  %v746_v1 = vshll.u32 %v5581_v55, 16  ;;  %v675_v11 = vld [vmem:[#allocation2 + $0x38] sm:$0xf]  ;;  %v5608_v21 = vld [vmem:[#allocation2 + $0x3c] sm:$0x1] }
  0x74   : > { %v735_v4 = vsel %vm5404_vm8, %v730_v49, %v734_v39  ;;  %v4382_v6 = vcombine.low %v2287_v44, %v2291_v10  ;;  %v2295_v14 = vsel %vm5491_vm2, %v4361_v47, %v2294_v56  ;;  %v2299_v26 = vsel %vm5491_vm2, %v4362_v54, %v2298_v43  ;;  %v2264_v27 = vld [vmem:[#allocation3 + $0x28] sm:$0xe]  ;;  %v5622_v59 = vld [vmem:[%s6290_s2 + $0x60] sm:$0xff]   ;;  %v2266_v42 = vld [vmem:[#allocation3 + $0x38] sm:$0xe] }
  0x75   : > { %v4238_v16 = vcombine.low %v721_v61, %v735_v4  ;;  %v4383_v17 = vcombine.low %v2295_v14, %v2299_v26  ;;  %v739_v18 = vrot.slane %v737_v60, 4  ;;  %v742_v20 = vrot.slane %v740_v0, 5  ;;  %v2265_v37 = vld [vmem:[#allocation3 + $0x30] sm:$0xe]  ;;  %v2267_v49 = vld [vmem:[#allocation3 + $0x40] sm:$0xe] }
  0x76   : > { %4729 = vmatprep.mubr.msk.bf16.mxu0 %vm479_vm5, %v4382_v6  ;;  %v748_v28 = vrot.slane %v746_v1, 5  ;;  %v751_v22 = vshrl.u32 %v671_v52, 16  ;;  %v754_v56 = vshll.u32 %v671_v52, 16  ;;  %v760_v33 = vshll.u32 %v5590_v63, 16  ;;  %v792_v1 = vld [vmem:[#allocation3] sm:$0xf] }
  0x77   : > { %4630 = vmatmul.mubr.msk.bf16.vlgmr.msra.gmra.mrb[0].mxu1 %vm583_vm15, %v4238_v16  ;;  %v743_v43 = vor.u32 %v742_v20, %v739_v18  ;;  %v765_v23 = vshrl.u32 %v673_v7, 16  ;;  %v768_v25 = vshll.u32 %v673_v7, 16  ;;  %v774_v3 = vshll.u32 %v5606_v8, 16  ;;  %v5639_v26 = vld [vmem:[#allocation3 + $0x4] sm:$0x1] }
  0x78   : > { %4638 = vmatpush3.bf16.msra.mxu1 %v5506_v15  ;;  %v753_v32 = vrot.slane %v751_v22, 4  ;;  %v756_v34 = vrot.slane %v754_v56, 5  ;;  %v762_v36 = vrot.slane %v760_v33, 5  ;;  %v779_v9 = vshrl.u32 %v675_v11, 16  ;;  %v794_v7 = vld [vmem:[#allocation3 + $0x8] sm:$0xf] }
  0x79   : > { %v744_v38 = vrot.slane %v743_v43, 4  ;;  %v767_v39 = vrot.slane %v765_v23, 4  ;;  %v770_v40 = vrot.slane %v768_v25, 5  ;;  %v776_v41 = vrot.slane %v774_v3, 5  ;;  %4639 = vmatprep.subr.bf16.mxu1 %v5036_v2  ;;  %v5648_v62 = vld [vmem:[#allocation3 + $0xc] sm:$0x1] }
  0x7a   : > { %4730 = vmatmul.mubr.msk.bf16.vlgmr.msra.gmra.mrb[0].mxu0 %vm479_vm5, %v4383_v17  ;;  %v757_v44 = vor.u32 %v756_v34, %v753_v32  ;;  %v781_v45 = vrot.slane %v779_v9, 4  ;;  %v782_v24 = vshll.u32 %v675_v11, 16  ;;  %v788_v48 = vshll.u32 %v5608_v21, 16  ;;  %v796_v20 = vld [vmem:[#allocation3 + $0x10] sm:$0xf] }
  0x7b   : > { %4738 = vmatpush3.bf16.msra.mxu0 %v5560_v13  ;;  %v749_v15 = vsel %vm5404_vm8, %v744_v38, %v748_v28  ;;  %v771_v47 = vor.u32 %v770_v40, %v767_v39  ;;  %v4363_v54 = vrot.slane %v2264_v27, 9  ;;  %v4364_v60 = vrot.slane %v2265_v37, 9  ;;  %v5653_v28 = vld [vmem:[#allocation3 + $0x14] sm:$0x1]  ;;  %v5657_v43 = vld [vmem:[#allocation3 + $0x1c] sm:$0x1] }
  0x7c   : > { %v758_v61 = vrot.slane %v757_v44, 4  ;;  %v784_v10 = vrot.slane %v782_v24, 5  ;;  %v790_v52 = vrot.slane %v788_v48, 5  ;;  %4640 = vmatpush3.bf16.msra.mxu1 %v5036_v2  ;;  %v4365_v0 = vrot.slane %v2266_v42, 9  ;;  %4747 = vmatprep.subr.bf16.mxu0 %v5622_v59  ;;  %v5038_v9 = vld [vmem:[#allocation2 + $0x10] ss:$8 sps:$4 sm:$0xff]  }
  0x7d   : > { %v772_v4 = vrot.slane %v771_v47, 4  ;;  %v2303_v13 = vsel %vm5491_vm2, %v4363_v54, %v2302_v50  ;;  %v2307_v6 = vsel %vm5491_vm2, %v4364_v60, %v2306_v51  ;;  %v4366_v14 = vrot.slane %v2267_v49, 9  ;;  %4649 = vmatprep.subr.bf16.mxu1 %v5617_v31 }
  0x7e   : > { %v763_v2 = vsel %vm5404_vm8, %v758_v61, %v762_v36  ;;  %v785_v11 = vor.u32 %v784_v10, %v781_v45  ;;  %v4384_v16 = vcombine.low %v2303_v13, %v2307_v6  ;;  %v2311_v58 = vsel %vm5491_vm2, %v4365_v0, %v2310_v53  ;;  %v798_v53 = vld [vmem:[#allocation3 + $0x18] sm:$0xf]  ;;  %v800_v13 = vld [vmem:[#allocation3 + $0x20] sm:$0xf] }
  0x7f   : > { %v4239_v50 = vcombine.low %v749_v15, %v763_v2  ;;  %v777_v51 = vsel %vm5404_vm8, %v772_v4, %v776_v41  ;;  %v2314_v17 = vrot.slane %v5439_v19, 5  ;;  %v809_v18 = vshrl.u32 %v792_v1, 16  ;;  %v5040_v10 = vld [vmem:[#allocation2 + $0x20] ss:$8 sps:$4 sm:$0xff]   ;;  %v802_v2 = vld [vmem:[#allocation3 + $0x28] sm:$0xf] }
  0x80   : > { %v786_v22 = vrot.slane %v785_v11, 4  ;;  %4733 = vmatprep.mubr.msk.bf16.mxu0 %vm479_vm5, %v4384_v16  ;;  %v812_v56 = vshll.u32 %v792_v1, 16  ;;  %v818_v12 = vshll.u32 %v5639_v26, 16  ;;  %v823_v33 = vshrl.u32 %v794_v7, 16  ;;  %v5674_v11 = vld [vmem:[#allocation3 + $0x2c] sm:$0x1] }
  0x81   : > { %4633 = vmatprep.mubr.msk.bf16.mxu1 %vm583_vm15, %v4239_v50  ;;  %v2315_v23 = vsel %vm5491_vm2, %v4366_v14, %v2314_v17  ;;  %v811_v19 = vrot.slane %v809_v18, 4  ;;  %v826_v25 = vshll.u32 %v794_v7, 16  ;;  %v832_v3 = vshll.u32 %v5648_v62, 16  ;;  %v5672_v7 = vld [vmem:[#allocation3 + $0x24] sm:$0x1] }
  0x82   : > { %v791_v27 = vsel %vm5404_vm8, %v786_v22, %v790_v52  ;;  %v4385_v32 = vcombine.low %v2311_v58, %v2315_v23  ;;  %v814_v34 = vrot.slane %v812_v56, 5  ;;  %v820_v36 = vrot.slane %v818_v12, 5  ;;  %v804_v17 = vld [vmem:[#allocation3 + $0x30] sm:$0xf]  ;;  %v5678_v18 = vld [vmem:[#allocation3 + $0x34] sm:$0x1] }
  0x83   : > { %v4240_v37 = vcombine.low %v777_v51, %v791_v27  ;;  %v825_v38 = vrot.slane %v823_v33, 4  ;;  %v828_v39 = vrot.slane %v826_v25, 5  ;;  %v834_v40 = vrot.slane %v832_v3, 5  ;;  %v806_v33 = vld [vmem:[#allocation3 + $0x38] sm:$0xf] }
  0x84   : > { %4734 = vmatmul.mubr.msk.bf16.gmra.mrb[4].mxu0 %vm479_vm5, %v4385_v32  ;;  %v815_v41 = vor.u32 %v814_v34, %v811_v19  ;;  %v837_v42 = vshrl.u32 %v796_v20, 16  ;;  %v840_v44 = vshll.u32 %v796_v20, 16  ;;  %v846_v45 = vshll.u32 %v5653_v28, 16  ;;  %v5684_v27 = vld [vmem:[#allocation3 + $0x3c] sm:$0x1] }
  0x85   : > { %4634 = vmatmul.mubr.msk.bf16.gmra.mrb[4].mxu1 %vm583_vm15, %v4240_v37  ;;  %v829_v24 = vor.u32 %v828_v39, %v825_v38  ;;  %v851_v48 = vshrl.u32 %v798_v53, 16  ;;  %v854_v49 = vshll.u32 %v798_v53, 16  ;;  %v860_v15 = vshll.u32 %v5657_v43, 16  ;;  %4739 = vmatprep.mubr.msk.bf16.mxu0 %vm583_vm15, %v5038_v9  ;;  %v5042_v53 = vld [vmem:[%s6290_s2 + $0x68] sm:$0xff]   ;;  %v5694_v37 = vld [vmem:[%s6290_s2 + $0x20] sm:$0xff]  }
  0x86   : > { %v816_v47 = vrot.slane %v815_v41, 4  ;;  %v839_v54 = vrot.slane %v837_v42, 4  ;;  %v842_v60 = vrot.slane %v840_v44, 5  ;;  %v848_v61 = vrot.slane %v846_v45, 5  ;;  %v5041_v42 = vld [vmem:[#allocation2 + $0x30] ss:$8 sps:$4 sm:$0xff]  }
  0x87   : > { %v830_v52 = vrot.slane %v829_v24, 4  ;;  %v853_v0 = vrot.slane %v851_v48, 4  ;;  %v856_v1 = vrot.slane %v854_v49, 5  ;;  %v862_v4 = vrot.slane %v860_v15, 5  ;;  %v5703_v49 = vld [vmem:[%s6289_s1 + $0x38] sm:$0xff]  }
  0x88   : > { %v821_v6 = vsel %vm5404_vm8, %v816_v47, %v820_v36  ;;  %v843_v14 = vor.u32 %v842_v60, %v839_v54  ;;  %v865_v50 = vshrl.u32 %v800_v13, 16  ;;  %v868_v51 = vshll.u32 %v800_v13, 16  ;;  %v5043_v13 = vld [vmem:[#allocation2 + $0x40] ss:$8 sps:$4 sm:$0xff]  }
  0x89   : > { %v835_v16 = vsel %vm5404_vm8, %v830_v52, %v834_v40  ;;  %v857_v58 = vor.u32 %v856_v1, %v853_v0  ;;  %v874_v56 = vshll.u32 %v5672_v7, 16  ;;  %v879_v12 = vshrl.u32 %v802_v2, 16 }
  0x8a   : > { %v4250_v20 = vcombine.low %v821_v6, %v835_v16  ;;  %v844_v22 = vrot.slane %v843_v14, 4  ;;  %v867_v19 = vrot.slane %v865_v50, 4  ;;  %v870_v25 = vrot.slane %v868_v51, 5  ;;  %v1140_v16 = vld [vmem:[#allocation2] sm:$0xe] }
  0x8b   : > { %v858_v23 = vrot.slane %v857_v58, 4  ;;  %v882_v3 = vshll.u32 %v802_v2, 16  ;;  %v876_v34 = vrot.slane %v874_v56, 5  ;;  %v881_v36 = vrot.slane %v879_v12, 4  ;;  %v1141_v58 = vld [vmem:[#allocation2 + $0x8] sm:$0xe] }
  0x8c   : > { %4641 = vmatprep.mubr.msk.bf16.mxu1 %vm479_vm5, %v4250_v20  ;;  %v849_v32 = vsel %vm5404_vm8, %v844_v22, %v848_v61  ;;  %4740 = vmatmul.mubr.msk.bf16.vlgmr.msra.gmra.mrb[0].mxu0 %vm583_vm15, %v5040_v10  ;;  %v888_v9 = vshll.u32 %v5674_v11, 16  ;;  %v871_v39 = vor.u32 %v870_v25, %v867_v19  ;;  %v893_v41 = vshrl.u32 %v804_v17, 16  ;;  %v1142_v20 = vld [vmem:[#allocation2 + $0x10] sm:$0xe] }
  0x8d   : > { %v863_v38 = vsel %vm5404_vm8, %v858_v23, %v862_v4  ;;  %4748 = vmatpush3.bf16.msra.mxu0 %v5622_v59  ;;  %v884_v40 = vrot.slane %v882_v3, 5  ;;  %v896_v24 = vshll.u32 %v804_v17, 16  ;;  %v902_v48 = vshll.u32 %v5678_v18, 16  ;;  %4743 = vmatprep.mubr.msk.bf16.mxu0 %vm583_vm15, %v5041_v42  ;;  %v1145_v42 = vld [vmem:[#allocation2 + $0x28] sm:$0xe] }
  0x8e   : > { %v4251_v44 = vcombine.low %v849_v32, %v863_v38  ;;  %v890_v45 = vrot.slane %v888_v9, 5  ;;  %4749 = vmatprep.subr.bf16.mxu0 %v5042_v53  ;;  %v872_v15 = vrot.slane %v871_v39, 4  ;;  %v895_v54 = vrot.slane %v893_v41, 4  ;;  %v5047_v39 = vld [vmem:[#allocation3 + $0x20] ss:$8 sps:$4 sm:$0xff]  }
  0x8f   : > { %v885_v47 = vor.u32 %v884_v40, %v881_v36  ;;  %v907_v60 = vshrl.u32 %v806_v33, 16  ;;  %v898_v59 = vrot.slane %v896_v24, 5  ;;  %v904_v61 = vrot.slane %v902_v48, 5  ;;  %v1144_v41 = vld [vmem:[#allocation2 + $0x20] sm:$0xe] }
  0x90   : > { %4642 = vmatmul.mubr.msk.bf16.vlgmr.msra.gmra.mrb[0].mxu1 %vm479_vm5, %v4251_v44  ;;  %v910_v10 = vshll.u32 %v806_v33, 16  ;;  %v916_v52 = vshll.u32 %v5684_v27, 16  ;;  %v877_v0 = vsel %vm5404_vm8, %v872_v15, %v876_v34  ;;  %v1169_v51 = vrot.slane %v5535_v5, 5 }
  0x91   : > { %4650 = vmatpush3.bf16.msra.mxu1 %v5617_v31  ;;  %v886_v1 = vrot.slane %v885_v47, 4  ;;  %v909_v4 = vrot.slane %v907_v60, 4  ;;  %4750 = vmatpush3.bf16.msra.mxu0 %v5042_v53  ;;  %v899_v6 = vor.u32 %v898_v59, %v895_v54  ;;  %v4260_v31 = vrot.slane %v1140_v16, 9  ;;  %v1143_v53 = vld [vmem:[#allocation2 + $0x18] sm:$0xe] }
  0x92   : > { %v912_v14 = vrot.slane %v910_v10, 5  ;;  %v918_v2 = vrot.slane %v916_v52, 5  ;;  %4659 = vmatprep.subr.bf16.mxu1 %v5694_v37  ;;  %4759 = vmatprep.subr.bf16.mxu0 %v5703_v49  ;;  %v4261_v17 = vrot.slane %v1141_v58, 9  ;;  %v1173_v33 = vrot.slane %v5548_v35, 5  ;;  %v5045_v35 = vld [vmem:[#allocation3 + $0x10] ss:$8 sps:$4 sm:$0xff]  }
  0x93   : > { %v891_v50 = vsel %vm5404_vm8, %v886_v1, %v890_v45  ;;  %v900_v56 = vrot.slane %v899_v6, 4  ;;  %v1170_v23 = vsel %vm5491_vm2, %v4260_v31, %v1169_v51  ;;  %v4262_v19 = vrot.slane %v1142_v20, 9  ;;  %v1146_v47 = vld [vmem:[#allocation2 + $0x30] sm:$0xe]  ;;  %v1147_v54 = vld [vmem:[#allocation2 + $0x38] sm:$0xe] }
  0x94   : > { %v4252_v22 = vcombine.low %v877_v0, %v891_v50  ;;  %v913_v12 = vor.u32 %v912_v14, %v909_v4  ;;  %4744 = vmatmul.mubr.msk.bf16.gmra.mrb[4].mxu0 %vm583_vm15, %v5043_v13  ;;  %v1177_v25 = vrot.slane %v5555_v46, 5  ;;  %v4263_v3 = vrot.slane %v1143_v53, 9  ;;  %v5732_v46 = vld [vmem:[%s6290_s2 + $0x70] sm:$0xff]   ;;  %v5049_v52 = vld [vmem:[#allocation3 + $0x30] ss:$8 sps:$4 sm:$0xff]  }
  0x95   : > { %v905_v5 = vsel %vm5404_vm8, %v900_v56, %v904_v61  ;;  %v1174_v34 = vsel %vm5491_vm2, %v4261_v17, %v1173_v33  ;;  %v1181_v36 = vrot.slane %v5564_v29, 5  ;;  %4751 = vmatprep.mubr.msk.bf16.mxu0 %vm479_vm5, %v5045_v35  ;;  %v1185_v44 = vrot.slane %v5581_v55, 5  ;;  %v1199_v1 = vld [vmem:[#allocation3] sm:$0xe]  ;;  %v1200_v4 = vld [vmem:[#allocation3 + $0x8] sm:$0xe] }
  0x96   : > { %4645 = vmatprep.mubr.msk.bf16.mxu1 %vm479_vm5, %v4252_v22  ;;  %v914_v32 = vrot.slane %v913_v12, 4  ;;  %v4278_v38 = vcombine.low %v1170_v23, %v1174_v34  ;;  %v1189_v29 = vrot.slane %v5590_v63, 5  ;;  %v1178_v45 = vsel %vm5491_vm2, %v4262_v19, %v1177_v25  ;;  %v1201_v16 = vld [vmem:[#allocation3 + $0x10] sm:$0xe]  ;;  %v5050_v50 = vld [vmem:[#allocation3 + $0x40] ss:$8 sps:$4 sm:$0xff]  }
  0x97   : > { %v1182_v24 = vsel %vm5491_vm2, %v4263_v3, %v1181_v36  ;;  %v4264_v48 = vrot.slane %v1144_v41, 9  ;;  %v4265_v15 = vrot.slane %v1145_v42, 9  ;;  %v4266_v60 = vrot.slane %v1146_v47, 9  ;;  %v1202_v31 = vld [vmem:[#allocation3 + $0x18] sm:$0xe] }
  0x98   : > { %v919_v9 = vsel %vm5404_vm8, %v914_v32, %v918_v2  ;;  %v1193_v59 = vrot.slane %v5606_v8, 5  ;;  %v4267_v61 = vrot.slane %v1147_v54, 9  ;;  %v1197_v55 = vrot.slane %v5608_v21, 5  ;;  %v2790_v12 = vld [vmem:[#allocation2 + $0x10] sm:$0xf] }
  0x99   : > { %v4253_v40 = vcombine.low %v905_v5, %v919_v9  ;;  %v1186_v63 = vsel %vm5491_vm2, %v4264_v48, %v1185_v44  ;;  %v1190_v10 = vsel %vm5491_vm2, %v4265_v15, %v1189_v29  ;;  %v4279_v0 = vcombine.low %v1178_v45, %v1182_v24  ;;  %v5775_v33 = vld [vmem:[#allocation2 + $0x14] sm:$0x1]  ;;  %v2792_v53 = vld [vmem:[#allocation2 + $0x18] sm:$0xf]  ;;  %v5783_v23 = vld [vmem:[#allocation2 + $0x1c] sm:$0x1] }
  0x9a   : > { %v5753_v8 = vsel %vm5491_vm2, %v4266_v60, %v1193_v59  ;;  %v5757_v21 = vsel %vm5491_vm2, %v4267_v61, %v1197_v55  ;;  %v4268_v13 = vrot.slane %v1199_v1, 9  ;;  %v1225_v6 = vrot.slane %v5639_v26, 5  ;;  %v5801_v48 = vld [vmem:[#allocation2 + $0x24] sm:$0x1]  ;;  %v2796_v15 = vld [vmem:[#allocation2 + $0x28] sm:$0xf] }
  0x9b   : > { %4646 = vmatmul.mubr.msk.bf16.gmra.mrb[4].mxu1 %vm479_vm5, %v4253_v40  ;;  %v4269_v14 = vrot.slane %v1200_v4, 9  ;;  %v1229_v2 = vrot.slane %v5648_v62, 5  ;;  %v4280_v58 = vcombine.low %v1186_v63, %v1190_v10  ;;  %v4270_v51 = vrot.slane %v1201_v16, 9  ;;  %v1203_v59 = vld [vmem:[#allocation3 + $0x20] sm:$0xe] }
  0x9c   : > { %4651 = vmatprep.mubr.msk.bf16.mxu1 %vm583_vm15, %v4278_v38  ;;  %4752 = vmatmul.mubr.msk.bf16.vlgmr.msra.gmra.mrb[0].mxu0 %vm479_vm5, %v5047_v39  ;;  %v1233_v17 = vrot.slane %v5653_v28, 5  ;;  %v1237_v20 = vrot.slane %v5657_v43, 5  ;;  %v1241_v22 = vrot.slane %v5672_v7, 5  ;;  %v4281_v56 = vcombine.low %v5753_v8, %v5757_v21  ;;  %v5781_v43 = vld [vmem:[%s6289_s1 + $0x18] sm:$0xff]   ;;  %v1205_v4 = vld [vmem:[#allocation3 + $0x30] sm:$0xe] }
  0x9d   : > { %4760 = vmatpush3.bf16.msra.mxu0 %v5703_v49  ;;  %v5048_v49 = vld [vmem:[%s6290_s2 + $0x28] sm:$0xff]   ;;  %4755 = vmatprep.mubr.msk.bf16.mxu0 %vm479_vm5, %v5049_v52  ;;  %v1226_v26 = vsel %vm5491_vm2, %v4268_v13, %v1225_v6  ;;  %v1230_v62 = vsel %vm5491_vm2, %v4269_v14, %v1229_v2  ;;  %v4271_v28 = vrot.slane %v1202_v31, 9  ;;  %v2807_v19 = vshrl.u32 %v2790_v12, 16  ;;  %v1204_v52 = vld [vmem:[#allocation3 + $0x28] sm:$0xe] }
  0x9e   : > { %4769 = vmatprep.subr.bf16.mxu0 %v5732_v46  ;;  %v2810_v25 = vshll.u32 %v2790_v12, 16  ;;  %v2816_v3 = vshll.u32 %v5775_v33, 16  ;;  %v2821_v5 = vshrl.u32 %v2792_v53, 16  ;;  %v2824_v32 = vshll.u32 %v2792_v53, 16  ;;  %v1206_v2 = vld [vmem:[#allocation3 + $0x38] sm:$0xe] }
  0x9f   : > { %v2830_v34 = vshll.u32 %v5783_v23, 16  ;;  %v1245_v36 = vrot.slane %v5674_v11, 5  ;;  %v2809_v35 = vrot.slane %v2807_v19, 4  ;;  %v1249_v39 = vrot.slane %v5678_v18, 5  ;;  %v5803_v18 = vld [vmem:[#allocation2 + $0x2c] sm:$0x1] }
  0xa0   : > { %v2812_v9 = vrot.slane %v2810_v25, 5  ;;  %v2818_v38 = vrot.slane %v2816_v3, 5  ;;  %v2823_v40 = vrot.slane %v2821_v5, 4  ;;  %v2826_v41 = vrot.slane %v2824_v32, 5  ;;  %v2800_v12 = vld [vmem:[#allocation2 + $0x38] sm:$0xf] }
  0xa1   : > { %v2832_v42 = vrot.slane %v2830_v34, 5  ;;  %v1253_v44 = vrot.slane %v5684_v27, 5  ;;  %v4291_v29 = vcombine.low %v1226_v26, %v1230_v62  ;;  %v5795_v45 = vsel %vm5491_vm2, %v4270_v51, %v1233_v17  ;;  %v2798_v51 = vld [vmem:[#allocation2 + $0x30] sm:$0xf]  ;;  %v5814_v62 = vld [vmem:[#allocation2 + $0x34] sm:$0x1] }
  0xa2   : > { %v5799_v11 = vsel %vm5491_vm2, %v4271_v28, %v1237_v20  ;;  %v2813_v24 = vor.u32 %v2812_v9, %v2809_v35  ;;  %v2827_v47 = vor.u32 %v2826_v41, %v2823_v40  ;;  %v2844_v27 = vshll.u32 %v5801_v48, 16  ;;  %v5829_v35 = vld [vmem:[#allocation2 + $0x3c] sm:$0x1]  ;;  %v2802_v7 = vld [vmem:[#allocation2 + $0x40] sm:$0xf] }
  0xa3   : > { %4652 = vmatmul.mubr.msk.bf16.vlgmr.msra.gmra.mrb[0].mxu1 %vm583_vm15, %v4279_v0  ;;  %v2849_v55 = vshrl.u32 %v2796_v15, 16  ;;  %v2852_v63 = vshll.u32 %v2796_v15, 16  ;;  %v2858_v10 = vshll.u32 %v5803_v18, 16  ;;  %v4273_v31 = vrot.slane %v1204_v52, 9  ;;  %v5835_v40 = vld [vmem:[#allocation2 + $0x44] sm:$0x1] }
  0xa4   : > { %4660 = vmatpush3.bf16.msra.mxu1 %v5694_v37  ;;  %4655 = vmatprep.mubr.msk.bf16.mxu1 %vm583_vm15, %v4280_v58  ;;  %v2794_v37 = vld [vmem:[#allocation2 + $0x20] sm:$0xf]  ;;  %v2814_v61 = vrot.slane %v2813_v24, 4  ;;  %v2828_v0 = vrot.slane %v2827_v47, 4  ;;  %v2846_v1 = vrot.slane %v2844_v27, 5  ;;  %v4274_v26 = vrot.slane %v1205_v4, 9 }
  0xa5   : > { %4661 = vmatprep.subr.bf16.mxu1 %v5048_v49  ;;  %4756 = vmatmul.mubr.msk.bf16.gmra.mrb[4].mxu0 %vm479_vm5, %v5050_v50  ;;  %v2835_v54 = vshrl.u32 %v2794_v37, 16  ;;  %v2838_v60 = vshll.u32 %v2794_v37, 16  ;;  %v2851_v13 = vrot.slane %v2849_v55, 4  ;;  %v2854_v6 = vrot.slane %v2852_v63, 5  ;;  %v2804_v41 = vld [vmem:[#allocation2 + $0x48] sm:$0xf] }
  0xa6   : > { %v2860_v14 = vrot.slane %v2858_v10, 5  ;;  %v2833_v16 = vsel %vm5404_vm8, %v2828_v0, %v2832_v42  ;;  %v4272_v50 = vrot.slane %v1203_v59, 9  ;;  %v1246_v19 = vsel %vm5491_vm2, %v4273_v31, %v1245_v36  ;;  %v5847_v47 = vld [vmem:[%s6290_s2 + $0x30] sm:$0xff]   ;;  %v5850_v59 = vld [vmem:[#allocation2 + $0x4c] sm:$0x1] }
  0xa7   : > { %v2837_v8 = vrot.slane %v2835_v54, 4  ;;  %v2840_v21 = vrot.slane %v2838_v60, 5  ;;  %v2855_v20 = vor.u32 %v2854_v6, %v2851_v13  ;;  %v2863_v25 = vshrl.u32 %v2798_v51, 16  ;;  %v5054_v6 = vld [vmem:[#allocation2 + $0x8] ss:$8 sps:$4 sm:$0xff]  }
  0xa8   : > { %4662 = vmatpush3.bf16.msra.mxu1 %v5048_v49  ;;  %v2819_v49 = vsel %vm5404_vm8, %v2814_v61, %v2818_v38  ;;  %v1242_v28 = vsel %vm5491_vm2, %v4272_v50, %v1241_v22  ;;  %v4292_v3 = vcombine.low %v5795_v45, %v5799_v11  ;;  %v5827_v34 = vsel %vm5491_vm2, %v4274_v26, %v1249_v39  ;;  %v5053_v45 = vld [vmem:[%s6290_s2 + $0x78] sm:$0xff]  }
  0xa9   : > { %4671 = vmatprep.subr.bf16.mxu1 %v5781_v43  ;;  %v2841_v58 = vor.u32 %v2840_v21, %v2837_v8  ;;  %v4419_v17 = vcombine.low %v2819_v49, %v2833_v16  ;;  %v2856_v5 = vrot.slane %v2855_v20, 4  ;;  %v4293_v32 = vcombine.low %v1242_v28, %v1246_v19  ;;  %v5871_v19 = vld [vmem:[#allocation3 + $0x1c] sm:$0x1] }
  0xaa   : > { %v2865_v9 = vrot.slane %v2863_v25, 4  ;;  %v2866_v38 = vshll.u32 %v2798_v51, 16  ;;  %v2872_v39 = vshll.u32 %v5814_v62, 16  ;;  %v2877_v37 = vshrl.u32 %v2800_v12, 16  ;;  %v2918_v51 = vld [vmem:[#allocation3 + $0x10] sm:$0xf] }
  0xab   : > { %4656 = vmatmul.mubr.msk.bf16.gmra.mrb[4].mxu1 %vm583_vm15, %v4281_v56  ;;  %v4275_v56 = vrot.slane %v1206_v2, 9  ;;  %v2842_v53 = vrot.slane %v2841_v58, 4  ;;  %4761 = vmatprep.mubr.msk.bf16.mxu0 %vm583_vm15, %v4419_v17  ;;  %v2861_v42 = vsel %vm5404_vm8, %v2856_v5, %v2860_v14  ;;  %v2891_v15 = vshrl.u32 %v2802_v7, 16 }
  0xac   : > { %4663 = vmatprep.mubr.msk.bf16.mxu1 %vm479_vm5, %v4291_v29  ;;  %v2880_v29 = vshll.u32 %v2800_v12, 16  ;;  %v2868_v24 = vrot.slane %v2866_v38, 5  ;;  %v2874_v54 = vrot.slane %v2872_v39, 5  ;;  %v2879_v60 = vrot.slane %v2877_v37, 4  ;;  %v2920_v12 = vld [vmem:[#allocation3 + $0x18] sm:$0xf] }
  0xad   : > { %v2847_v22 = vsel %vm5404_vm8, %v2842_v53, %v2846_v1  ;;  %v1254_v36 = vsel %vm5491_vm2, %v4275_v56, %v1253_v44  ;;  %v2886_v44 = vshll.u32 %v5829_v35, 16  ;;  %v2894_v61 = vshll.u32 %v2802_v7, 16  ;;  %v5869_v56 = vld [vmem:[#allocation3 + $0x14] sm:$0x1]  ;;  %v5055_v39 = vld [vmem:[#allocation2 + $0x18] ss:$8 sps:$4 sm:$0xff]  }
  0xae   : > { %v4420_v11 = vcombine.low %v2847_v22, %v2861_v42  ;;  %v2882_v27 = vrot.slane %v2880_v29, 5  ;;  %v2869_v55 = vor.u32 %v2868_v24, %v2865_v9  ;;  %v2893_v10 = vrot.slane %v2891_v15, 4 }
  0xaf   : > { %v2888_v63 = vrot.slane %v2886_v44, 5  ;;  %v2900_v52 = vshll.u32 %v5835_v40, 16  ;;  %v2896_v8 = vrot.slane %v2894_v61, 5  ;;  %v2905_v21 = vshrl.u32 %v2804_v41, 16 }
  0xb0   : > { %4762 = vmatmul.mubr.msk.bf16.vlgmr.msra.gmra.mrb[0].mxu0 %vm583_vm15, %v4420_v11  ;;  %v2883_v0 = vor.u32 %v2882_v27, %v2879_v60  ;;  %v2908_v1 = vshll.u32 %v2804_v41, 16  ;;  %v4294_v4 = vcombine.low %v5827_v34, %v1254_v36  ;;  %v2870_v49 = vrot.slane %v2869_v55, 4  ;;  %v5884_v11 = vld [vmem:[#allocation3 + $0x24] sm:$0x1]  ;;  %v5886_v60 = vld [vmem:[#allocation3 + $0x2c] sm:$0x1] }
  0xb1   : > { %4770 = vmatpush3.bf16.msra.mxu0 %v5732_v46  ;;  %v2914_v13 = vshll.u32 %v5850_v59, 16  ;;  %v5863_v46 = vld [vmem:[%s6289_s1 + $0x40] sm:$0xff]   ;;  %v2897_v2 = vor.u32 %v2896_v8, %v2893_v10  ;;  %v2907_v16 = vrot.slane %v2905_v21, 4  ;;  %v2935_v53 = vshrl.u32 %v2918_v51, 16 }
  0xb2   : > { %4771 = vmatprep.subr.bf16.mxu0 %v5053_v45  ;;  %v2884_v14 = vrot.slane %v2883_v0, 4  ;;  %v2910_v58 = vrot.slane %v2908_v1, 5  ;;  %v2875_v50 = vsel %vm5404_vm8, %v2870_v49, %v2874_v54  ;;  %v2938_v25 = vshll.u32 %v2918_v51, 16  ;;  %v2924_v54 = vld [vmem:[#allocation3 + $0x28] sm:$0xf] }
  0xb3   : > { %4664 = vmatmul.mubr.msk.bf16.vlgmr.msra.gmra.mrb[0].mxu1 %vm479_vm5, %v4292_v3  ;;  %v2916_v31 = vrot.slane %v2914_v13, 5  ;;  %v2898_v20 = vrot.slane %v2897_v2, 4  ;;  %v2944_v3 = vshll.u32 %v5869_v56, 16  ;;  %v2949_v5 = vshrl.u32 %v2920_v12, 16  ;;  %v5058_v13 = vld [vmem:[#allocation2 + $0x28] ss:$8 sps:$4 sm:$0xff]  }
  0xb4   : > { %4672 = vmatpush3.bf16.msra.mxu1 %v5781_v43  ;;  %4667 = vmatprep.mubr.msk.bf16.mxu1 %vm479_vm5, %v4293_v32  ;;  %v2902_v43 = vrot.slane %v2900_v52, 5  ;;  %v2889_v17 = vsel %vm5404_vm8, %v2884_v14, %v2888_v63  ;;  %v2911_v26 = vor.u32 %v2910_v58, %v2907_v16  ;;  %v2937_v7 = vrot.slane %v2935_v53, 4  ;;  %v5060_v52 = vld [vmem:[%s6290_s2 + $0x38] sm:$0xff]   ;;  %v5908_v53 = vld [vmem:[#allocation3 + $0x34] sm:$0x1] }
  0xb5   : > { %4681 = vmatprep.subr.bf16.mxu1 %v5847_v47  ;;  %4772 = vmatpush3.bf16.msra.mxu0 %v5053_v45  ;;  %v4421_v28 = vcombine.low %v2875_v50, %v2889_v17  ;;  %v2952_v22 = vshll.u32 %v2920_v12, 16  ;;  %v2940_v36 = vrot.slane %v2938_v25, 5  ;;  %v2951_v9 = vrot.slane %v2949_v5, 4  ;;  %v2922_v45 = vld [vmem:[#allocation3 + $0x20] sm:$0xf]  ;;  %v5904_v17 = vld [vmem:[%s6289_s1 + $0x20] sm:$0xff]  }
  0xb6   : > { %4781 = vmatprep.subr.bf16.mxu0 %v5863_v46  ;;  %v2903_v32 = vsel %vm5404_vm8, %v2898_v20, %v2902_v43  ;;  %v2912_v34 = vrot.slane %v2911_v26, 4  ;;  %v2958_v38 = vshll.u32 %v5871_v19, 16  ;;  %v3292_v41 = vrot.slane %v5775_v33, 5  ;;  %v2926_v12 = vld [vmem:[#allocation3 + $0x30] sm:$0xf] }
  0xb7   : > { %4765 = vmatprep.mubr.msk.bf16.mxu0 %vm583_vm15, %v4421_v28  ;;  %v2946_v37 = vrot.slane %v2944_v3, 5  ;;  %v2954_v29 = vrot.slane %v2952_v22, 5  ;;  %v2941_v44 = vor.u32 %v2940_v36, %v2937_v7  ;;  %v2963_v27 = vshrl.u32 %v2922_v45, 16  ;;  %v2928_v28 = vld [vmem:[#allocation3 + $0x38] sm:$0xf] }
  0xb8   : > { %v2917_v42 = vsel %vm5404_vm8, %v2912_v34, %v2916_v31  ;;  %v2960_v15 = vrot.slane %v2958_v38, 5  ;;  %v2966_v55 = vshll.u32 %v2922_v45, 16  ;;  %v2972_v63 = vshll.u32 %v5884_v11, 16  ;;  %v5059_v3 = vld [vmem:[#allocation2 + $0x38] ss:$8 sps:$4 sm:$0xff]  }
  0xb9   : > { %v4422_v24 = vcombine.low %v2903_v32, %v2917_v42  ;;  %v2955_v61 = vor.u32 %v2954_v29, %v2951_v9  ;;  %v2977_v10 = vshrl.u32 %v2924_v54, 16  ;;  %v2942_v0 = vrot.slane %v2941_v44, 4  ;;  %v5910_v5 = vld [vmem:[#allocation3 + $0x3c] sm:$0x1]  ;;  %v2930_v38 = vld [vmem:[#allocation3 + $0x40] sm:$0xf] }
  0xba   : > { %v2965_v8 = vrot.slane %v2963_v27, 4  ;;  %v2980_v21 = vshll.u32 %v2924_v54, 16  ;;  %v2986_v1 = vshll.u32 %v5886_v60, 16  ;;  %v2968_v49 = vrot.slane %v2966_v55, 5  ;;  %v5917_v45 = vld [vmem:[#allocation3 + $0x44] sm:$0x1] }
  0xbb   : > { %4668 = vmatmul.mubr.msk.bf16.gmra.mrb[4].mxu1 %vm479_vm5, %v4294_v4  ;;  %4766 = vmatmul.mubr.msk.bf16.gmra.mrb[4].mxu0 %vm583_vm15, %v4422_v24  ;;  %v2956_v4 = vrot.slane %v2955_v61, 4  ;;  %v2979_v43 = vrot.slane %v2977_v10, 4  ;;  %v2947_v14 = vsel %vm5404_vm8, %v2942_v0, %v2946_v37  ;;  %v3300_v16 = vrot.slane %v5801_v48, 5  ;;  %v2932_v27 = vld [vmem:[#allocation3 + $0x48] sm:$0xf]  ;;  %v5924_v61 = vld [vmem:[%s6290_s2 + $0x80] sm:$0xff]  }
  0xbc   : > { %4673 = vmatprep.mubr.msk.bf16.mxu1 %vm583_vm15, %v5054_v6  ;;  %v3296_v6 = vrot.slane %v5783_v23, 5  ;;  %v2982_v2 = vrot.slane %v2980_v21, 5  ;;  %v2969_v50 = vor.u32 %v2968_v49, %v2965_v8  ;;  %v2974_v31 = vrot.slane %v2972_v63, 5  ;;  %v5926_v10 = vld [vmem:[#allocation3 + $0x4c] sm:$0x1] }
  0xbd   : > { %v2961_v58 = vsel %vm5404_vm8, %v2956_v4, %v2960_v15  ;;  %v2988_v51 = vrot.slane %v2986_v1, 5  ;;  %v2991_v32 = vshrl.u32 %v2926_v12, 16  ;;  %v2994_v34 = vshll.u32 %v2926_v12, 16 }
  0xbe   : > { %v4432_v20 = vcombine.low %v2947_v14, %v2961_v58  ;;  %v2983_v26 = vor.u32 %v2982_v2, %v2979_v43  ;;  %v2970_v25 = vrot.slane %v2969_v50, 4  ;;  %v3000_v7 = vshll.u32 %v5908_v53, 16  ;;  %v5061_v2 = vld [vmem:[#allocation3 + $0x8] ss:$8 sps:$4 sm:$0xff]  }
  0xbf   : > { %v3008_v36 = vshll.u32 %v2928_v28, 16  ;;  %v3014_v9 = vshll.u32 %v5910_v5, 16  ;;  %v2996_v37 = vrot.slane %v2994_v34, 5  ;;  %v3019_v0 = vshrl.u32 %v2930_v38, 16 }
  0xc0   : > { %4773 = vmatprep.mubr.msk.bf16.mxu0 %vm479_vm5, %v4432_v20  ;;  %v2984_v22 = vrot.slane %v2983_v26, 4  ;;  %v2975_v42 = vsel %vm5404_vm8, %v2970_v25, %v2974_v31  ;;  %v3002_v29 = vrot.slane %v3000_v7, 5  ;;  %v3022_v8 = vshll.u32 %v2930_v38, 16  ;;  %v3268_v38 = vld [vmem:[#allocation2 + $0x20] sm:$0xe] }
  0xc1   : > { %v3010_v15 = vrot.slane %v3008_v36, 5  ;;  %v3016_v54 = vrot.slane %v3014_v9, 5  ;;  %v3028_v1 = vshll.u32 %v5917_v45, 16  ;;  %v3033_v4 = vshrl.u32 %v2932_v27, 16 }
  0xc2   : > { %v2989_v24 = vsel %vm5404_vm8, %v2984_v22, %v2988_v51  ;;  %v3036_v49 = vshll.u32 %v2932_v27, 16  ;;  %v3021_v43 = vrot.slane %v3019_v0, 4  ;;  %v3042_v14 = vshll.u32 %v5926_v10, 16  ;;  %v3267_v22 = vld [vmem:[#allocation2 + $0x18] sm:$0xe] }
  0xc3   : > { %4674 = vmatmul.mubr.msk.bf16.vlgmr.msra.gmra.mrb[0].mxu1 %vm583_vm15, %v5055_v39  ;;  %v2993_v39 = vrot.slane %v2991_v32, 4  ;;  %v4433_v55 = vcombine.low %v2975_v42, %v2989_v24  ;;  %v3030_v50 = vrot.slane %v3028_v1, 5  ;;  %v3035_v31 = vrot.slane %v3033_v4, 4  ;;  %v3266_v32 = vld [vmem:[#allocation2 + $0x10] sm:$0xe] }
  0xc4   : > { %4682 = vmatpush3.bf16.msra.mxu1 %v5847_v47  ;;  %4677 = vmatprep.mubr.msk.bf16.mxu1 %vm583_vm15, %v5058_v13  ;;  %v3005_v47 = vshrl.u32 %v2928_v28, 16  ;;  %v3024_v13 = vrot.slane %v3022_v8, 5  ;;  %v3038_v51 = vrot.slane %v3036_v49, 5  ;;  %v3044_v12 = vrot.slane %v3042_v14, 5  ;;  %v5062_v28 = vld [vmem:[#allocation3 + $0x18] ss:$8 sps:$4 sm:$0xff]  }
  0xc5   : > { %4683 = vmatprep.subr.bf16.mxu1 %v5060_v52  ;;  %v2997_v63 = vor.u32 %v2996_v37, %v2993_v39  ;;  %4774 = vmatmul.mubr.msk.bf16.vlgmr.msra.gmra.mrb[0].mxu0 %vm479_vm5, %v4433_v55  ;;  %v3304_v25 = vrot.slane %v5803_v18, 5  ;;  %v4443_v9 = vrot.slane %v3267_v22, 9  ;;  %v3269_v39 = vld [vmem:[#allocation2 + $0x28] sm:$0xe]  ;;  %v4444_v37 = vrot.slane %v3268_v38, 9 }
  0xc6   : > { %v3007_v44 = vrot.slane %v3005_v47, 4  ;;  %4782 = vmatpush3.bf16.msra.mxu0 %v5863_v46  ;;  %v3025_v26 = vor.u32 %v3024_v13, %v3021_v43  ;;  %v3039_v46 = vor.u32 %v3038_v51, %v3035_v31  ;;  %v4442_v47 = vrot.slane %v3266_v32, 9  ;;  %v5066_v0 = vld [vmem:[#allocation3 + $0x38] ss:$8 sps:$4 sm:$0xff]   ;;  %v5116_v4 = vld [vmem:[#allocation2 + $0xc] sm:$0x1] }
  0xc7   : > { %4791 = vmatprep.subr.bf16.mxu0 %v5924_v61  ;;  %v3297_v24 = vsel %vm5491_vm2, %v4443_v9, %v3296_v6  ;;  %v3312_v55 = vrot.slane %v5829_v35, 5  ;;  %v3270_v6 = vld [vmem:[#allocation2 + $0x30] sm:$0xe]  ;;  %v3320_v1 = vrot.slane %v5850_v59, 5  ;;  %v1754_v49 = vshll.u32 %v5116_v4, 16  ;;  %v5067_v22 = vld [vmem:[%s6290_s2 + $0x88] sm:$0xff]  }
  0xc8   : > { %4684 = vmatpush3.bf16.msra.mxu1 %v5060_v52  ;;  %v3011_v21 = vor.u32 %v3010_v15, %v3007_v44  ;;  %v2998_v52 = vrot.slane %v2997_v63, 4  ;;  %v3026_v7 = vrot.slane %v3025_v26, 4  ;;  %v3040_v36 = vrot.slane %v3039_v46, 4  ;;  %v5065_v15 = vld [vmem:[#allocation3 + $0x28] ss:$8 sps:$4 sm:$0xff]  }
  0xc9   : > { %4693 = vmatprep.subr.bf16.mxu1 %v5904_v17  ;;  %v3293_v18 = vsel %vm5491_vm2, %v4442_v47, %v3292_v41  ;;  %v4445_v44 = vrot.slane %v3269_v39, 9  ;;  %v3301_v41 = vsel %vm5491_vm2, %v4444_v37, %v3300_v16  ;;  %v4446_v8 = vrot.slane %v3270_v6, 9  ;;  %v3273_v16 = vld [vmem:[#allocation2 + $0x48] sm:$0xe] }
  0xca   : > { %v3012_v58 = vrot.slane %v3011_v21, 4  ;;  %v3003_v20 = vsel %vm5404_vm8, %v2998_v52, %v3002_v29  ;;  %v3031_v42 = vsel %vm5404_vm8, %v3026_v7, %v3030_v50  ;;  %v3045_v29 = vsel %vm5404_vm8, %v3040_v36, %v3044_v12  ;;  %v3272_v21 = vld [vmem:[#allocation2 + $0x40] sm:$0xe]  ;;  %v1728_v14 = vld [vmem:[#allocation2 + $0x8] sm:$0xf] }
  0xcb   : > { %4678 = vmatmul.mubr.msk.bf16.gmra.mrb[4].mxu1 %vm583_vm15, %v5059_v3  ;;  %v4435_v27 = vcombine.low %v3031_v42, %v3045_v29  ;;  %v4460_v33 = vcombine.low %v3293_v18, %v3297_v24  ;;  %v3305_v23 = vsel %vm5491_vm2, %v4445_v44, %v3304_v25  ;;  %v4448_v35 = vrot.slane %v3272_v21, 9  ;;  %v5118_v18 = vld [vmem:[#allocation2 + $0x1c] sm:$0x1]  ;;  %v3322_v24 = vld [vmem:[#allocation3 + $0x10] sm:$0xe] }
  0xcc   : > { %4685 = vmatprep.mubr.msk.bf16.mxu1 %vm479_vm5, %v5061_v2  ;;  %v3017_v3 = vsel %vm5404_vm8, %v3012_v58, %v3016_v54  ;;  %v3308_v54 = vrot.slane %v5814_v62, 5  ;;  %v3271_v62 = vld [vmem:[#allocation2 + $0x38] sm:$0xe]  ;;  %v4461_v63 = vcombine.low %v3301_v41, %v3305_v23  ;;  %v4449_v13 = vrot.slane %v3273_v16, 9  ;;  %v1730_v2 = vld [vmem:[#allocation2 + $0x10] sm:$0xf] }
  0xcd   : > { %v4434_v34 = vcombine.low %v3003_v20, %v3017_v3  ;;  %v4447_v48 = vrot.slane %v3271_v62, 9  ;;  %v5117_v58 = vld [vmem:[#allocation2 + $0x14] sm:$0x1]  ;;  %v1748_v59 = vshll.u32 %v1728_v14, 16  ;;  %v1732_v20 = vld [vmem:[#allocation2 + $0x18] sm:$0xf] }
  0xce   : > { %v3309_v52 = vsel %vm5491_vm2, %v4446_v8, %v3308_v54  ;;  %v1768_v50 = vshll.u32 %v5117_v58, 16  ;;  %v5979_v26 = vsel %vm5491_vm2, %v4449_v13, %v3320_v1  ;;  %v1756_v12 = vrot.slane %v1754_v49, 5  ;;  %v1734_v3 = vld [vmem:[#allocation2 + $0x20] sm:$0xf]  ;;  %v3323_v41 = vld [vmem:[#allocation3 + $0x18] sm:$0xe] }
  0xcf   : > { %4777 = vmatprep.mubr.msk.bf16.mxu0 %vm479_vm5, %v4434_v34  ;;  %v3313_v43 = vsel %vm5491_vm2, %v4447_v48, %v3312_v55  ;;  %v1762_v25 = vshll.u32 %v1730_v2, 16  ;;  %v1750_v34 = vrot.slane %v1748_v59, 5  ;;  %v1773_v9 = vshrl.u32 %v1732_v20, 16  ;;  %v1736_v13 = vld [vmem:[#allocation2 + $0x28] sm:$0xf] }
  0xd0   : > { %4778 = vmatmul.mubr.msk.bf16.gmra.mrb[4].mxu0 %vm479_vm5, %v4435_v27  ;;  %v4462_v31 = vcombine.low %v3309_v52, %v3313_v43  ;;  %v1770_v7 = vrot.slane %v1768_v50, 5  ;;  %v1776_v38 = vshll.u32 %v1732_v20, 16  ;;  %v1782_v39 = vshll.u32 %v5118_v18, 16  ;;  %v5119_v27 = vld [vmem:[#allocation2 + $0x24] sm:$0x1] }
  0xd1   : > { %4783 = vmatprep.mubr.msk.bf16.mxu0 %vm583_vm15, %v4460_v33  ;;  %v1764_v36 = vrot.slane %v1762_v25, 5  ;;  %v1787_v37 = vshrl.u32 %v1734_v3, 16  ;;  %v1790_v29 = vshll.u32 %v1734_v3, 16  ;;  %v1796_v33 = vshll.u32 %v5119_v27, 16 }
  0xd2   : > { %v1778_v54 = vrot.slane %v1776_v38, 5  ;;  %v1784_v23 = vrot.slane %v1782_v39, 5  ;;  %v4451_v1 = vrot.slane %v3323_v41, 9  ;;  %v3352_v52 = vrot.slane %v5871_v19, 5  ;;  %v1738_v19 = vld [vmem:[#allocation2 + $0x30] sm:$0xf] }
  0xd3   : > { %4686 = vmatmul.mubr.msk.bf16.vlgmr.msra.gmra.mrb[0].mxu1 %vm479_vm5, %v5062_v28  ;;  %v1759_v28 = vshrl.u32 %v1730_v2, 16  ;;  %v1789_v6 = vrot.slane %v1787_v37, 4  ;;  %v1792_v62 = vrot.slane %v1790_v29, 5  ;;  %v1798_v21 = vrot.slane %v1796_v33, 5 }
  0xd4   : > { %4694 = vmatpush3.bf16.msra.mxu1 %v5904_v17  ;;  %4689 = vmatprep.mubr.msk.bf16.mxu1 %vm479_vm5, %v5065_v15  ;;  %v3316_v17 = vrot.slane %v5835_v40, 5  ;;  %v1745_v40 = vshrl.u32 %v1728_v14, 16  ;;  %v1775_v15 = vrot.slane %v1773_v9, 4  ;;  %v3356_v50 = vrot.slane %v5884_v11, 5 }
  0xd5   : > { %v1761_v47 = vrot.slane %v1759_v28, 4  ;;  %v1801_v11 = vshrl.u32 %v1736_v13, 16  ;;  %v1804_v3 = vshll.u32 %v1736_v13, 16  ;;  %v3368_v13 = vrot.slane %v5910_v5, 5 }
  0xd6   : > { %v5975_v51 = vsel %vm5491_vm2, %v4448_v35, %v3316_v17  ;;  %v1747_v32 = vrot.slane %v1745_v40, 4  ;;  %v1779_v48 = vor.u32 %v1778_v54, %v1775_v15  ;;  %v1793_v35 = vor.u32 %v1792_v62, %v1789_v6  ;;  %v3326_v15 = vld [vmem:[#allocation3 + $0x30] sm:$0xe] }
  0xd7   : > { %v4463_v46 = vcombine.low %v5975_v51, %v5979_v26  ;;  %v1765_v44 = vor.u32 %v1764_v36, %v1761_v47  ;;  %v3348_v17 = vrot.slane %v5869_v56, 5  ;;  %v3360_v40 = vrot.slane %v5886_v60, 5  ;;  %v5120_v60 = vld [vmem:[#allocation2 + $0x2c] sm:$0x1]  ;;  %v1742_v36 = vld [vmem:[#allocation2 + $0x40] sm:$0xf] }
  0xd8   : > { %v1751_v42 = vor.u32 %v1750_v34, %v1747_v32  ;;  %4784 = vmatmul.mubr.msk.bf16.vlgmr.msra.gmra.mrb[0].mxu0 %vm583_vm15, %v4461_v63  ;;  %v4450_v63 = vrot.slane %v3322_v24, 9  ;;  %v1780_v49 = vrot.slane %v1779_v48, 4  ;;  %v1794_v2 = vrot.slane %v1793_v35, 4  ;;  %v5122_v24 = vld [vmem:[#allocation2 + $0x3c] sm:$0x1] }
  0xd9   : > { %4792 = vmatpush3.bf16.msra.mxu0 %v5924_v61  ;;  %4787 = vmatprep.mubr.msk.bf16.mxu0 %vm583_vm15, %v4462_v31  ;;  %v1766_v8 = vrot.slane %v1765_v44, 4  ;;  %v3325_v61 = vld [vmem:[#allocation3 + $0x28] sm:$0xe]  ;;  %v3353_v31 = vsel %vm5491_vm2, %v4451_v1, %v3352_v52  ;;  %v1810_v32 = vshll.u32 %v5120_v60, 16  ;;  %v1818_v47 = vshll.u32 %v1738_v19, 16 }
  0xda   : > { %v1752_v55 = vrot.slane %v1751_v42, 4  ;;  %4793 = vmatprep.subr.bf16.mxu0 %v5067_v22  ;;  %v3349_v58 = vsel %vm5491_vm2, %v4450_v63, %v3348_v17  ;;  %v1785_v56 = vsel %vm5404_vm8, %v1780_v49, %v1784_v23  ;;  %v4453_v51 = vrot.slane %v3325_v61, 9  ;;  %v5121_v42 = vld [vmem:[#allocation2 + $0x34] sm:$0x1] }
  0xdb   : > { %4690 = vmatmul.mubr.msk.bf16.gmra.mrb[4].mxu1 %vm479_vm5, %v5066_v0  ;;  %v3324_v0 = vld [vmem:[#allocation3 + $0x20] sm:$0xe]  ;;  %v1771_v4 = vsel %vm5404_vm8, %v1766_v8, %v1770_v7  ;;  %v1799_v59 = vsel %vm5404_vm8, %v1794_v2, %v1798_v21  ;;  %v4473_v20 = vcombine.low %v3349_v58, %v3353_v31  ;;  %v1803_v7 = vrot.slane %v1801_v11, 4  ;;  %v5123_v21 = vld [vmem:[#allocation2 + $0x44] sm:$0x1] }
  0xdc   : > { %v1757_v16 = vsel %vm5404_vm8, %v1752_v55, %v1756_v12  ;;  %v4452_v43 = vrot.slane %v3324_v0, 9  ;;  %v1740_v12 = vld [vmem:[#allocation2 + $0x38] sm:$0xf]  ;;  %v4329_v28 = vcombine.low %v1785_v56, %v1799_v59  ;;  %v3361_v25 = vsel %vm5491_vm2, %v4453_v51, %v3360_v40  ;;  %v3327_v0 = vld [vmem:[#allocation3 + $0x38] sm:$0xe] }
  0xdd   : > { %4794 = vmatpush3.bf16.msra.mxu0 %v5067_v22  ;;  %v4328_v14 = vcombine.low %v1757_v16, %v1771_v4  ;;  %v1815_v22 = vshrl.u32 %v1738_v19, 16  ;;  %v1806_v9 = vrot.slane %v1804_v3, 5  ;;  %v1812_v38 = vrot.slane %v1810_v32, 5  ;;  %v3328_v4 = vld [vmem:[#allocation3 + $0x40] sm:$0xe] }
  0xde   : > { %v3357_v26 = vsel %vm5491_vm2, %v4452_v43, %v3356_v50  ;;  %v1829_v18 = vshrl.u32 %v1740_v12, 16  ;;  %v1820_v37 = vrot.slane %v1818_v47, 5  ;;  %v1832_v29 = vshll.u32 %v1740_v12, 16 }
  0xdf   : > { %4695 = vmatprep.mubr.msk.bf16.mxu1 %vm583_vm15, %v4328_v14  ;;  %v4474_v34 = vcombine.low %v3357_v26, %v3361_v25  ;;  %v1817_v39 = vrot.slane %v1815_v22, 4  ;;  %v1838_v44 = vshll.u32 %v5122_v24, 16  ;;  %v1807_v54 = vor.u32 %v1806_v9, %v1803_v7  ;;  %v3329_v14 = vld [vmem:[#allocation3 + $0x48] sm:$0xe] }
  0xe0   : > { %4788 = vmatmul.mubr.msk.bf16.gmra.mrb[4].mxu0 %vm583_vm15, %v4463_v46  ;;  %v1824_v46 = vshll.u32 %v5121_v42, 16  ;;  %v1831_v33 = vrot.slane %v1829_v18, 4  ;;  %v1843_v41 = vshrl.u32 %v1742_v36, 16  ;;  %v1834_v23 = vrot.slane %v1832_v29, 5 }
  0xe1   : > { %4795 = vmatprep.mubr.msk.bf16.mxu0 %vm479_vm5, %v4473_v20  ;;  %v1821_v55 = vor.u32 %v1820_v37, %v1817_v39  ;;  %v1840_v6 = vrot.slane %v1838_v44, 5  ;;  %v1846_v62 = vshll.u32 %v1742_v36, 16  ;;  %v1808_v8 = vrot.slane %v1807_v54, 4 }
  0xe2   : > { %v1826_v27 = vrot.slane %v1824_v46, 5  ;;  %v1845_v48 = vrot.slane %v1843_v41, 4  ;;  %v1852_v63 = vshll.u32 %v5123_v21, 16  ;;  %v4454_v16 = vrot.slane %v3326_v15, 9 }
  0xe3   : > { %4696 = vmatmul.mubr.msk.bf16.vlgmr.msra.gmra.mrb[0].mxu1 %vm583_vm15, %v4329_v28  ;;  %v1822_v35 = vrot.slane %v1821_v55, 4  ;;  %v1835_v17 = vor.u32 %v1834_v23, %v1831_v33  ;;  %v1848_v1 = vrot.slane %v1846_v62, 5  ;;  %v3364_v61 = vrot.slane %v5908_v53, 5 }
  0xe4   : > { %v1813_v49 = vsel %vm5404_vm8, %v1808_v8, %v1812_v38  ;;  %v1854_v52 = vrot.slane %v1852_v63, 5  ;;  %v4455_v43 = vrot.slane %v3327_v0, 9  ;;  %v4456_v51 = vrot.slane %v3328_v4, 9  ;;  %v3653_v4 = vld [vmem:[#allocation4] sm:$0xff] }
  0xe5   : > { %v1827_v2 = vsel %vm5404_vm8, %v1822_v35, %v1826_v27  ;;  %v1836_v58 = vrot.slane %v1835_v17, 4  ;;  %v1849_v50 = vor.u32 %v1848_v1, %v1845_v48  ;;  %v3365_v56 = vsel %vm5491_vm2, %v4454_v16, %v3364_v61 }
  0xe6   : > { %v4330_v53 = vcombine.low %v1813_v49, %v1827_v2  ;;  %v3369_v31 = vsel %vm5491_vm2, %v4455_v43, %v3368_v13  ;;  %v3372_v40 = vrot.slane %v5917_v45, 5  ;;  %v4457_v20 = vrot.slane %v3329_v14, 9  ;;  %v3654_v43 = vld [vmem:[#allocation4 + $0x8] sm:$0xff]  ;;  %v3657_v13 = vld [vmem:[#allocation4 + $0x20] sm:$0xff]  ;;  %v3656_v14 = vld [vmem:[#allocation4 + $0x18] sm:$0xff] }
  0xe7   : > { %v1841_v19 = vsel %vm5404_vm8, %v1836_v58, %v1840_v6  ;;  %v1850_v5 = vrot.slane %v1849_v50, 4  ;;  %v4475_v59 = vcombine.low %v3365_v56, %v3369_v31  ;;  %v3376_v11 = vrot.slane %v5926_v10, 5  ;;  %v3659_v2 = vld [vmem:[#allocation4 + $0x30] sm:$0xff]  ;;  %v3658_v58 = vld [vmem:[#allocation4 + $0x28] sm:$0xff]  ;;  %v3660_v50 = vld [vmem:[#allocation4 + $0x38] sm:$0xff] }
  0xe8   : > { %4796 = vmatmul.mubr.msk.bf16.vlgmr.msra.gmra.mrb[0].mxu0 %vm479_vm5, %v4474_v34  ;;  %4699 = vmatprep.mubr.msk.bf16.mxu1 %vm583_vm15, %v4330_v53  ;;  %v3373_v26 = vsel %vm5491_vm2, %v4456_v51, %v3372_v40  ;;  %vm4013_vm3 = vcmask 257024   ;;  %vm4018_vm6 = vcmask 253952  }
  0xe9   : > { %v1855_v12 = vsel %vm5404_vm8, %v1850_v5, %v1854_v52  ;;  %4799 = vmatprep.mubr.msk.bf16.mxu0 %vm479_vm5, %v4475_v59  ;;  %v3377_v45 = vsel %vm5491_vm2, %v4457_v20, %v3376_v11  ;;  %v3655_v52 = vld [vmem:[#allocation4 + $0x10] sm:$0xff]  ;;  %vm6171_vm4 = vmand %vm4013_vm3, %vm372_vm11 }
  0xea   : > { %v4331_v28 = vcombine.low %v1841_v19, %v1855_v12  ;;  %v4476_v25 = vcombine.low %v3373_v26, %v3377_v45  ;;  %vm6180_vm7 = vmand %vm4018_vm6, %vm378_vm14 }
  0xec   : > { %4700 = vmatmul.mubr.msk.bf16.gmra.mrb[4].mxu1 %vm583_vm15, %v4331_v28 }
  0xf0   : > { %4800 = vmatmul.mubr.msk.bf16.gmra.mrb[4].mxu0 %vm479_vm5, %v4476_v25 }
 0x1b6   : > { %v4697_v3 = vpop.f32.mrb[0].mxu1 }
 0x1b7   : > { %v2051_v60 = vpop.f32.mrb[1].mxu1 }
 0x1b8   : > { %v4698_v32 = vpop.f32.mrb[2].mxu1 }
 0x1b9   : > { %v2054_v34 = vpop.f32.mrb[3].mxu1 }
 0x1bb   : > { %v4797_v7 = vpop.f32.mrb[0].mxu0 }
 0x1bc   : > { %v4803_v10 = vadd.f32 %v4797_v7, %v4697_v3  ;;  %v3559_v22 = vpop.f32.mrb[1].mxu0 }
 0x1bd   : > { %v4804_v47 = vadd.f32 %v3559_v22, %v2051_v60  ;;  %v4798_v36 = vpop.f32.mrb[2].mxu0 }
 0x1be   : > { %v6042_v57 = vadd.f32 %v4803_v10, %v4483_v30  ;;  %v4805_v9 = vadd.f32 %v4798_v36, %v4698_v32  ;;  %v3562_v38 = vpop.f32.mrb[3].mxu0 }
 0x1bf   : > { %v3605_v42 = vadd.f32 %v4804_v47, %v4483_v30  ;;  %v4806_v46 = vadd.f32 %v3562_v38, %v2054_v34  ;;  %v4701_v37 = vpop.f32.mrb[4].mxu1 }
 0x1c0   : > { %5068 = vtanh.f32 %v6042_v57  ;;  %v3608_v18 = vadd.f32 %v4805_v9, %v4483_v30  ;;  %v2067_v29 = vpop.f32.mrb[5].mxu1  ;;  %v3615_v56 = vmul.f32 0.5, %v6042_v57 }
 0x1c1   : > { %5070 = vtanh.f32 %v3605_v42  ;;  %v3606_v39 = vadd.f32 %v4806_v46, %v4483_v30  ;;  %v4702_v44 = vpop.f32.mrb[6].mxu1  ;;  %v3613_v53 = vmul.f32 0.5, %v3605_v42 }
 0x1c2   : > { %5072 = vtanh.f32 %v3608_v18  ;;  %v2070_v27 = vpop.f32.mrb[7].mxu1  ;;  %v3616_v31 = vmul.f32 0.5, %v3608_v18 }
 0x1c3   : > { %v4801_v24 = vpop.f32.mrb[4].mxu0  ;;  %5074 = vtanh.f32 %v3606_v39  ;;  %v3614_v51 = vmul.f32 0.5, %v3606_v39 }
 0x1c4   : > { %v4807_v15 = vadd.f32 %v4801_v24, %v4701_v37  ;;  %v3575_v54 = vpop.f32.mrb[5].mxu0 }
 0x1c5   : > { %v4808_v33 = vadd.f32 %v3575_v54, %v2067_v29  ;;  %v4802_v41 = vpop.f32.mrb[6].mxu0 }
 0x1c6   : > { %v4809_v55 = vadd.f32 %v4802_v41, %v4702_v44  ;;  %v3578_v23 = vpop.f32.mrb[7].mxu0  ;;  %v3611_v48 = vadd.f32 %v4807_v15, %v4483_v30 }
 0x1c7   : > { %v3609_v6 = vadd.f32 %v4808_v33, %v4483_v30  ;;  %v4810_v62 = vadd.f32 %v3578_v23, %v2070_v27 }
 0x1c8   : > { %v3612_v16 = vadd.f32 %v4809_v55, %v4483_v30  ;;  %v3619_v5 = vmul.f32 0.5, %v3611_v48 }
 0x1c9   : > { %5076 = vtanh.f32 %v3609_v6  ;;  %v3610_v21 = vadd.f32 %v4810_v62, %v4483_v30  ;;  %v3617_v40 = vmul.f32 0.5, %v3609_v6 }
 0x1ca   : > { %v5069_v0 = vpop.eup %5068  ;;  %5078 = vtanh.f32 %v3611_v48  ;;  %v3620_v12 = vmul.f32 0.5, %v3612_v16 }
 0x1cb   : > { %v5071_v8 = vpop.eup %5070  ;;  %3713 = vrot.lane.b32.xlu1 %v5069_v0, %s5222_s10  ;;  %5080 = vtanh.f32 %v3610_v21  ;;  %v3618_v59 = vmul.f32 0.5, %v3610_v21 }
 0x1cc   : > { %3709 = vrot.lane.b32.xlu0 %v5071_v8, %s5222_s10  ;;  %v5073_v63 = vpop.eup %5072  ;;  %5082 = vtanh.f32 %v3612_v16 }
 0x1cd   : > { %v5075_v35 = vpop.eup %5074  ;;  %5084 = vtanh.f32 %v3615_v56 }
 0x1ce   : > { %5086 = vtanh.f32 %v3613_v53 }
 0x1cf   : > { %3715 = vrot.lane.b32.xlu1 %v5073_v63, %s5222_s10  ;;  %5088 = vtanh.f32 %v3616_v31 }
 0x1d0   : > { %3711 = vrot.lane.b32.xlu0 %v5075_v35, %s5222_s10  ;;  %5090 = vtanh.f32 %v3614_v51 }
 0x1d1   : > { %5092 = vtanh.f32 %v3617_v40 }
 0x1d2   : > { %5094 = vtanh.f32 %v3619_v5 }
 0x1d3   : > { %v5077_v17 = vpop.eup %5076  ;;  %5096 = vtanh.f32 %v3618_v59 }
 0x1d4   : > { %3717 = vrot.lane.b32.xlu0 %v5077_v17, %s5222_s10  ;;  %v5079_v1 = vpop.eup %5078  ;;  %5098 = vtanh.f32 %v3620_v12 }
 0x1d5   : > { %v5081_v61 = vpop.eup %5080 }
 0x1d6   : > { %3719 = vrot.lane.b32.xlu1 %v5081_v61, %s5222_s10  ;;  %v5083_v49 = vpop.eup %5082 }
 0x1d7   : > { %v5085_v19 = vpop.eup %5084 }
 0x1d8   : > { %3721 = vrot.lane.b32.xlu0 %v5079_v1, %s5222_s10  ;;  %v3631_v20 = vadd.f32 1.0, %v5085_v19  ;;  %v5087_v26 = vpop.eup %5086 }
 0x1d9   : > { %v5089_v11 = vpop.eup %5088  ;;  %v3629_v45 = vadd.f32 1.0, %v5087_v26 }
 0x1da   : > { %3723 = vrot.lane.b32.xlu1 %v5083_v49, %s5222_s10  ;;  %v6062_v28 = vmul.f32 0.5, %v3631_v20  ;;  %v3632_v3 = vadd.f32 1.0, %v5089_v11  ;;  %v5091_v60 = vpop.eup %5090 }
 0x1db   : > { %v5093_v7 = vpop.eup %5092  ;;  %v6065_v30 = vmul.f32 0.5, %v3629_v45  ;;  %v3630_v22 = vadd.f32 1.0, %v5091_v60 }
 0x1dc   : > { %3669 = vrot.lane.b32.xlu0 %v3653_v4, %s5222_s10  ;;  %v6068_v10 = vmul.f32 0.5, %v3632_v3  ;;  %v3633_v9 = vadd.f32 1.0, %v5093_v7  ;;  %v5095_v38 = vpop.eup %5094 }
 0x1dd   : > { %v5097_v46 = vpop.eup %5096  ;;  %v6073_v18 = vmul.f32 0.5, %v3630_v22  ;;  %v3635_v29 = vadd.f32 1.0, %v5095_v38 }
 0x1de   : > { %3671 = vrot.lane.b32.xlu1 %v3654_v43, %s5222_s10  ;;  %v6077_v37 = vmul.f32 0.5, %v3633_v9  ;;  %v3634_v44 = vadd.f32 1.0, %v5097_v46  ;;  %v5099_v15 = vpop.eup %5098 }
 0x1df   : > { %v6082_v27 = vmul.f32 0.5, %v3635_v29  ;;  %v3636_v55 = vadd.f32 1.0, %v5099_v15 }
 0x1e0   : > { %3673 = vrot.lane.b32.xlu0 %v3655_v52, %s5222_s10  ;;  %v6084_v33 = vmul.f32 0.5, %v3634_v44 }
 0x1e1   : > { %v6089_v0 = vmul.f32 0.5, %v3636_v55 }
 0x1e2   : > { %3675 = vrot.lane.b32.xlu1 %v3656_v14, %s5222_s10 }
 0x1e4   : > { %3677 = vrot.lane.b32.xlu0 %v3657_v13, %s5222_s10 }
 0x1e6   : > { %3679 = vrot.lane.b32.xlu1 %v3658_v58, %s5222_s10 }
 0x1e8   : > { %3681 = vrot.lane.b32.xlu0 %v3659_v2, %s5222_s10 }
 0x1ea   : > { %3683 = vrot.lane.b32.xlu1 %v3660_v50, %s5222_s10 }
 0x23d   : > { %v3714_v25 = vpop.permute.xlu1 %3713 }
 0x23e   : > { %v3735_v32 = vmul.f32 %v3714_v25, %v6062_v28  ;;  %v3710_v34 = vpop.permute.xlu0 %3709 }
 0x23f   : > { %v3733_v47 = vmul.f32 %v3710_v34, %v6065_v30 }
 0x240   : > { %3753 = vrot.lane.b32.xlu0 %v3735_v32, %s5222_s10 }
 0x241   : > { %v3716_v36 = vpop.permute.xlu1 %3715 }
 0x242   : > { %v3736_v57 = vmul.f32 %v3716_v36, %v6068_v10  ;;  %v3712_v42 = vpop.permute.xlu0 %3711 }
 0x243   : > { %v3734_v39 = vmul.f32 %v3712_v42, %v6073_v18 }
 0x244   : > { %3749 = vrot.lane.b32.xlu0 %v3733_v47, %s5222_s10  ;;  %3755 = vrot.lane.b32.xlu1 %v3736_v57, %s5222_s10 }
 0x246   : > { %v3718_v24 = vpop.permute.xlu0 %3717 }
 0x247   : > { %v3737_v54 = vmul.f32 %v3718_v24, %v6077_v37 }
 0x248   : > { %3751 = vrot.lane.b32.xlu1 %v3734_v39, %s5222_s10  ;;  %v3720_v23 = vpop.permute.xlu1 %3719 }
 0x249   : > { %3757 = vrot.lane.b32.xlu0 %v3737_v54, %s5222_s10  ;;  %v3738_v62 = vmul.f32 %v3720_v23, %v6084_v33 }
 0x24a   : > { %v3722_v41 = vpop.permute.xlu0 %3721 }
 0x24b   : > { %v3739_v6 = vmul.f32 %v3722_v41, %v6082_v27 }
 0x24c   : > { %3759 = vrot.lane.b32.xlu1 %v3738_v62, %s5222_s10  ;;  %v3724_v8 = vpop.permute.xlu1 %3723 }
 0x24d   : > { %3761 = vrot.lane.b32.xlu0 %v3739_v6, %s5222_s10  ;;  %v3740_v48 = vmul.f32 %v3724_v8, %v6089_v0 }
 0x24e   : > { %v3670_v21 = vpop.permute.xlu0 %3669 }
 0x24f   : > { %v3693_v13 = vmul.f32 %v3670_v21, %v6065_v30 }
 0x250   : > { %3763 = vrot.lane.b32.xlu1 %v3740_v48, %s5222_s10  ;;  %v3672_v63 = vpop.permute.xlu1 %3671 }
 0x251   : > { %v3694_v53 = vmul.f32 %v3672_v63, %v6073_v18 }
 0x252   : > { %v3674_v16 = vpop.permute.xlu0 %3673 }
 0x253   : > { %v3695_v4 = vmul.f32 %v3674_v16, %v6062_v28 }
 0x254   : > { %v3676_v35 = vpop.permute.xlu1 %3675 }
 0x255   : > { %v3696_v14 = vmul.f32 %v3676_v35, %v6068_v10 }
 0x256   : > { %v3678_v17 = vpop.permute.xlu0 %3677 }
 0x257   : > { %v3697_v51 = vmul.f32 %v3678_v17, %v6077_v37 }
 0x258   : > { %v3680_v1 = vpop.permute.xlu1 %3679 }
 0x259   : > { %v3698_v26 = vmul.f32 %v3680_v1, %v6084_v33 }
 0x25a   : > { %v3682_v61 = vpop.permute.xlu0 %3681 }
 0x25b   : > { %v3699_v20 = vmul.f32 %v3682_v61, %v6082_v27 }
 0x25c   : > { %v3684_v52 = vpop.permute.xlu1 %3683 }
 0x25d   : > { %v3700_v32 = vmul.f32 %v3684_v52, %v6089_v0 }
 0x2b2   : > { %v3754_v49 = vpop.permute.xlu0 %3753 }
 0x2b3   : > { %v3775_v43 = vadd.f32 %v3754_v49, %v3695_v4 }
 0x2b5   : > { %5100 = vtanh.f32 %v3775_v43 }
 0x2b6   : > { %v3750_v2 = vpop.permute.xlu0 %3749  ;;  %v3756_v50 = vpop.permute.xlu1 %3755 }
 0x2b7   : > { %v3773_v58 = vadd.f32 %v3750_v2, %v3693_v13  ;;  %v3776_v56 = vadd.f32 %v3756_v50, %v3696_v14 }
 0x2b9   : > { %5102 = vtanh.f32 %v3773_v58 }
 0x2ba   : > { %5104 = vtanh.f32 %v3776_v56  ;;  %v3752_v31 = vpop.permute.xlu1 %3751 }
 0x2bb   : > { %v3774_v40 = vadd.f32 %v3752_v31, %v3694_v53  ;;  %v3758_v19 = vpop.permute.xlu0 %3757 }
 0x2bc   : > { %v3777_v5 = vadd.f32 %v3758_v19, %v3697_v51 }
 0x2bd   : > { %5106 = vtanh.f32 %v3774_v40 }
 0x2be   : > { %5108 = vtanh.f32 %v3777_v5  ;;  %v3760_v12 = vpop.permute.xlu1 %3759 }
 0x2bf   : > { %v5101_v59 = vpop.eup %5100  ;;  %v3762_v11 = vpop.permute.xlu0 %3761  ;;  %v3778_v3 = vadd.f32 %v3760_v12, %v3698_v26 }
 0x2c0   : > { %3801 = vrot.lane.b32.xlu0 %v5101_v59, %s5222_s10  ;;  %v6102_v45 = vadd.f32 %v3762_v11, %v3699_v20 }
 0x2c2   : > { %5110 = vtanh.f32 %v6102_v45  ;;  %v3764_v34 = vpop.permute.xlu1 %3763 }
 0x2c3   : > { %v5103_v25 = vpop.eup %5102  ;;  %5112 = vtanh.f32 %v3778_v3  ;;  %v6108_v7 = vadd.f32 %v3764_v34, %v3700_v32 }
 0x2c4   : > { %v5105_v60 = vpop.eup %5104  ;;  %3797 = vrot.lane.b32.xlu0 %v5103_v25, %s5222_s10 }
 0x2c5   : > { %3803 = vrot.lane.b32.xlu1 %v5105_v60, %s5222_s10  ;;  %5114 = vtanh.f32 %v6108_v7 }
 0x2c7   : > { %v5107_v22 = vpop.eup %5106 }
 0x2c8   : > { %v5109_v47 = vpop.eup %5108 }
 0x2c9   : > { %3799 = vrot.lane.b32.xlu1 %v5107_v22, %s5222_s10  ;;  %3805 = vrot.lane.b32.xlu0 %v5109_v47, %s5222_s10 }
 0x2cc   : > { %v5111_v36 = vpop.eup %5110 }
 0x2cd   : > { %v5113_v57 = vpop.eup %5112  ;;  %3809 = vrot.lane.b32.xlu0 %v5111_v36, %s5222_s10 }
 0x2ce   : > { %3807 = vrot.lane.b32.xlu1 %v5113_v57, %s5222_s10 }
 0x2cf   : > { %v5115_v9 = vpop.eup %5114 }
 0x2d1   : > { %3837 = vrot.lane.b32.xlu0 %v3773_v58, %s5223_s11 }
 0x2d2   : > { %3811 = vrot.lane.b32.xlu1 %v5115_v9, %s5222_s10  ;;  %s5225_s10 = smov [#allocation5]  }
 0x2d5   : > { %3841 = vrot.lane.b32.xlu0 %v3775_v43, %s5223_s11 }
 0x2d6   : > { %3839 = vrot.lane.b32.xlu1 %v3774_v40, %s5223_s11 }
 0x2d9   : > { %3845 = vrot.lane.b32.xlu0 %v3777_v5, %s5223_s11 }
 0x2da   : > { %3843 = vrot.lane.b32.xlu1 %v3776_v56, %s5223_s11 }
 0x2de   : > { %3847 = vrot.lane.b32.xlu1 %v3778_v3, %s5223_s11 }
 0x332   : > { %v3802_v38 = vpop.permute.xlu0 %3801 }
 0x333   : > { %v3823_v42 = vmul.f32 %v3802_v38, %v6062_v28 }
 0x335   : > { %v4500_v46 = vpack.c.bf16 %v3823_v42, %v3823_v42  ;;  %4077 = vrot.lane.b32.xlu1 %v3823_v42, %s5224_s12 }
 0x336   : > { %v3798_v39 = vpop.permute.xlu0 %3797 }
 0x337   : > { %v3918_v29 = vshrl.u32 %v4500_v46, 16  ;;  %v3821_v24 = vmul.f32 %v3798_v39, %v6065_v30  ;;  %v3804_v44 = vpop.permute.xlu1 %3803  ;;  %v3921_v41 = vshll.u32 %v4500_v46, 16 }
 0x338   : > { %v3824_v15 = vmul.f32 %v3804_v44, %v6068_v10 }
 0x339   : > { %v3920_v54 = vrot.slane %v3918_v29, 7  ;;  %v4498_v55 = vpack.c.bf16 %v3821_v24, %v3821_v24  ;;  %4073 = vrot.lane.b32.xlu1 %v3821_v24, %s5224_s12 }
 0x33a   : > { %4079 = vrot.lane.b32.xlu0 %v3824_v15, %s5224_s12  ;;  %v4501_v62 = vpack.c.bf16 %v3824_v15, %v3824_v15 }
 0x33b   : > { %v3800_v23 = vpop.permute.xlu1 %3799  ;;  %v3923_v28 = vor.u32 %v3921_v41, %v3920_v54  ;;  %v3902_v6 = vshrl.u32 %v4498_v55, 16  ;;  %v3806_v48 = vpop.permute.xlu0 %3805  ;;  %v3924_v21 = vrot.slane %v3920_v54, 4  ;;  %v3905_v17 = vshll.u32 %v4498_v55, 16 }
 0x33c   : > { %v3822_v8 = vmul.f32 %v3800_v23, %v6073_v18  ;;  %v3926_v10 = vshrl.u32 %v4501_v62, 16  ;;  %v3929_v50 = vshll.u32 %v4501_v62, 16 }
 0x33d   : > { %3973 = vrot.lane.b32.xlu1 %v3923_v28, %s5224_s12  ;;  %v3904_v30 = vrot.slane %v3902_v6, 7 }
 0x33e   : > { %4075 = vrot.lane.b32.xlu0 %v3822_v8, %s5224_s12  ;;  %v3928_v1 = vrot.slane %v3926_v10, 7  ;;  %v4499_v61 = vpack.c.bf16 %v3822_v8, %v3822_v8  ;;  %v4032_v8 = vld [vmem:[#allocation3 + $0x1c] sm:$0x1] }
 0x33f   : > { %v3810_v63 = vpop.permute.xlu0 %3809  ;;  %v3908_v18 = vrot.slane %v3904_v30, 4  ;;  %v3907_v52 = vor.u32 %v3905_v17, %v3904_v30 }
 0x340   : > { %v3808_v16 = vpop.permute.xlu1 %3807  ;;  %v3827_v35 = vmul.f32 %v3810_v63, %v6082_v27  ;;  %v3910_v43 = vshrl.u32 %v4499_v61, 16  ;;  %v3932_v13 = vrot.slane %v3928_v1, 4  ;;  %v3825_v27 = vmul.f32 %v3806_v48, %v6077_v37 }
 0x341   : > { %v3931_v37 = vor.u32 %v3929_v50, %v3928_v1  ;;  %v3913_v5 = vshll.u32 %v4499_v61, 16  ;;  %v4038_v1 = vld [vmem:[#allocation3 + $0x24] sm:$0x1] }
 0x342   : > { %3975 = vrot.lane.b32.xlu0 %v3924_v21, %s5224_s12  ;;  %4085 = vrot.lane.b32.xlu1 %v3827_v35, %s5224_s12  ;;  %v4504_v2 = vpack.c.bf16 %v3827_v35, %v3827_v35  ;;  %v3912_v56 = vrot.slane %v3910_v43, 7  ;;  %v4502_v31 = vpack.c.bf16 %v3825_v27, %v3825_v27  ;;  %v4020_v21 = vld [vmem:[#allocation3 + $0xc] sm:$0x1]  ;;  %v4035_v43 = vld [vmem:[#allocation3 + $0x20] sm:$0xf] }
 0x343   : > { %v3838_v4 = vpop.permute.xlu0 %3837 }
 0x344   : > { %v3812_v49 = vpop.permute.xlu1 %3811  ;;  %3861 = vst.msk [vmem:[#allocation4] sm:$0xff] %vm479_vm5, %v3838_v4  ;;  %v3950_v40 = vshrl.u32 %v4504_v2, 16  ;;  %v3916_v59 = vrot.slane %v3912_v56, 4  ;;  %v3934_v20 = vshrl.u32 %v4502_v31, 16  ;;  %v3915_v25 = vor.u32 %v3913_v5, %v3912_v56 }
 0x345   : > { %v3828_v53 = vmul.f32 %v3812_v49, %v6089_v0  ;;  %v3826_v0 = vmul.f32 %v3808_v16, %v6084_v33  ;;  %v3953_v3 = vshll.u32 %v4504_v2, 16  ;;  %v3937_v47 = vshll.u32 %v4502_v31, 16  ;;  %v4015_v16 = vld [vmem:[#allocation3 + $0x8] sm:$0xf] }
 0x346   : > { %3967 = vrot.lane.b32.xlu0 %v3908_v18, %s5224_s12  ;;  %3965 = vrot.lane.b32.xlu1 %v3907_v52, %s5224_s12  ;;  %v3952_v26 = vrot.slane %v3950_v40, 7  ;;  %v3936_v60 = vrot.slane %v3934_v20, 7 }
 0x347   : > { %v3842_v14 = vpop.permute.xlu0 %3841  ;;  %v4505_v11 = vpack.c.bf16 %v3828_v53, %v3828_v53  ;;  %v4503_v32 = vpack.c.bf16 %v3826_v0, %v3826_v0 }
 0x348   : > { %v3840_v58 = vpop.permute.xlu1 %3839  ;;  %3863 = vst.msk [vmem:[#allocation4 + $0x10] sm:$0xff] %vm479_vm5, %v3842_v14  ;;  %v3955_v22 = vor.u32 %v3953_v3, %v3952_v26  ;;  %v3956_v33 = vrot.slane %v3952_v26, 4  ;;  %v3939_v9 = vor.u32 %v3937_v47, %v3936_v60  ;;  %v3940_v42 = vrot.slane %v3936_v60, 4 }
 0x349   : > { %3862 = vst.msk [vmem:[#allocation4 + $0x8] sm:$0xff] %vm479_vm5, %v3840_v58  ;;  %v3958_v34 = vshrl.u32 %v4505_v11, 16  ;;  %v3942_v36 = vshrl.u32 %v4503_v32, 16  ;;  %v3961_v38 = vshll.u32 %v4505_v11, 16  ;;  %v3945_v29 = vshll.u32 %v4503_v32, 16 }
 0x34a   : > { %3979 = vrot.lane.b32.xlu0 %v3932_v13, %s5224_s12  ;;  %4081 = vrot.lane.b32.xlu1 %v3825_v27, %s5224_s12  ;;  %v4026_v27 = vld [vmem:[#allocation3 + $0x14] sm:$0x1]  ;;  %v4023_v58 = vld [vmem:[#allocation3 + $0x10] sm:$0xf] }
 0x34b   : > { %v3846_v51 = vpop.permute.xlu0 %3845  ;;  %v3960_v57 = vrot.slane %v3958_v34, 7  ;;  %v3944_v46 = vrot.slane %v3942_v36, 7 }
 0x34c   : > { %v3844_v19 = vpop.permute.xlu1 %3843  ;;  %3865 = vst.msk [vmem:[#allocation4 + $0x20] sm:$0xff] %vm479_vm5, %v3846_v51  ;;  %v4053_v51 = vld [vmem:[#allocation3 + $0x38] sm:$0xf] }
 0x34d   : > { %3864 = vst.msk [vmem:[#allocation4 + $0x18] sm:$0xff] %vm479_vm5, %v3844_v19  ;;  %v3963_v39 = vor.u32 %v3961_v38, %v3960_v57  ;;  %v3964_v24 = vrot.slane %v3960_v57, 4  ;;  %v3947_v44 = vor.u32 %v3945_v29, %v3944_v46  ;;  %v3948_v15 = vrot.slane %v3944_v46, 4  ;;  %v4056_v19 = vld [vmem:[#allocation3 + $0x3c] sm:$0x1] }
 0x34e   : > { %4087 = vrot.lane.b32.xlu0 %v3828_v53, %s5224_s12  ;;  %3977 = vrot.lane.b32.xlu1 %v3931_v37, %s5224_s12 }
 0x350   : > { %v3848_v12 = vpop.permute.xlu1 %3847 }
 0x351   : > { %3866 = vst.msk [vmem:[#allocation4 + $0x28] sm:$0xff] %vm479_vm5, %v3848_v12 }
 0x352   : > { %3971 = vrot.lane.b32.xlu0 %v3916_v59, %s5224_s12  ;;  %3969 = vrot.lane.b32.xlu1 %v3915_v25, %s5224_s12 }
 0x356   : > { %4083 = vrot.lane.b32.xlu0 %v3826_v0, %s5224_s12  ;;  %3989 = vrot.lane.b32.xlu1 %v3955_v22, %s5224_s12 }
 0x35a   : > { %3991 = vrot.lane.b32.xlu0 %v3956_v33, %s5224_s12  ;;  %3981 = vrot.lane.b32.xlu1 %v3939_v9, %s5224_s12 }
 0x35e   : > { %3983 = vrot.lane.b32.xlu0 %v3940_v42, %s5224_s12  ;;  %3993 = vrot.lane.b32.xlu1 %v3963_v39, %s5224_s12 }
 0x362   : > { %3995 = vrot.lane.b32.xlu0 %v3964_v24, %s5224_s12  ;;  %3985 = vrot.lane.b32.xlu1 %v3947_v44, %s5224_s12 }
 0x366   : > { %3987 = vrot.lane.b32.xlu0 %v3948_v15, %s5224_s12  ;;  %3851 = vrot.lane.b32.xlu1 %v6108_v7, %s5223_s11  ;;  %v4029_v7 = vld [vmem:[#allocation3 + $0x18] sm:$0xf] }
 0x36a   : > { %3849 = vrot.lane.b32.xlu0 %v6102_v45, %s5223_s11  ;;  %s5128_s11 = sshll.u32 %s5225_s10, 4  ;;  %s5129_s11 = int_to_ptr.vmem [resolvable:$false] %s5128_s11 }
 0x36b   : > { %s5130_s12 = scalar_lea.vmem %s5129_s11, 2048  ;;  %p5131_p5 = scmp.lt.s32.totalorder %s6205_s30, %s5129_s11 }
 0x36c   : > { %p5132_p6 = scmp.lt.s32.totalorder %s5130_s12, %s5124_s9 }
 0x36e   : > { %p5133_p7 = por %p5132_p6, %p5131_p5 }
 0x370   : > { %p5134_p9 = pnand %p5133_p7, %p5127_p4 }
 0x3a7   : > { %v4078_v54 = vpop.permute.xlu1 %4077 }
 0x3a8   : > { %4099 = vst.msk [vmem:[%s5336_s5 + $0x10] sm:$0xff] %vm479_vm5, %v4078_v54 }
 0x3ab   : > { %v4074_v41 = vpop.permute.xlu1 %4073 }
 0x3ac   : > { %v4080_v55 = vpop.permute.xlu0 %4079  ;;  %4097 = vst.msk [vmem:[%s5336_s5] sm:$0xff] %vm479_vm5, %v4074_v41 }
 0x3ad   : > { %4100 = vst.msk [vmem:[%s5336_s5 + $0x18] sm:$0xff] %vm479_vm5, %v4080_v55 }
 0x3af   : > { %v3974_v28 = vpop.permute.xlu1 %3973 }
 0x3b0   : > { %v4076_v45 = vpop.permute.xlu0 %4075  ;;  %v4030_v6 = vsel %vm6171_vm4, %v3974_v28, %v4029_v7 }
 0x3b1   : > { %4098 = vst.msk [vmem:[%s5336_s5 + $0x8] sm:$0xff] %vm479_vm5, %v4076_v45  ;;  %4031 = vst [vmem:[#allocation3 + $0x18] sm:$0xf] %v4030_v6 }
 0x3b4   : > { %v3976_v48 = vpop.permute.xlu0 %3975  ;;  %v4086_v10 = vpop.permute.xlu1 %4085 }
 0x3b5   : > { %v4033_v30 = vsel %vm6180_vm7, %v3976_v48, %v4032_v8  ;;  %4103 = vst.msk [vmem:[%s5336_s5 + $0x30] sm:$0xff] %vm479_vm5, %v4086_v10 }
 0x3b6   : > { %4034 = vst [vmem:[#allocation3 + $0x1c] sm:$0x1] %v4033_v30 }
 0x3b8   : > { %v3968_v63 = vpop.permute.xlu0 %3967  ;;  %v3966_v17 = vpop.permute.xlu1 %3965 }
 0x3b9   : > { %v4021_v35 = vsel %vm6180_vm7, %v3968_v63, %v4020_v21  ;;  %v4016_v61 = vsel %vm6171_vm4, %v3966_v17, %v4015_v16 }
 0x3ba   : > { %4022 = vst [vmem:[#allocation3 + $0xc] sm:$0x1] %v4021_v35  ;;  %4017 = vst [vmem:[#allocation3 + $0x8] sm:$0xf] %v4016_v61 }
 0x3bc   : > { %v3980_v18 = vpop.permute.xlu0 %3979  ;;  %v4082_v49 = vpop.permute.xlu1 %4081 }
 0x3bd   : > { %v4039_v4 = vsel %vm6180_vm7, %v3980_v18, %v4038_v1  ;;  %4101 = vst.msk [vmem:[%s5336_s5 + $0x20] sm:$0xff] %vm479_vm5, %v4082_v49 }
 0x3be   : > { %4040 = vst [vmem:[#allocation3 + $0x24] sm:$0x1] %v4039_v4 }
 0x3c0   : > { %v4088_v52 = vpop.permute.xlu0 %4087  ;;  %v3978_v13 = vpop.permute.xlu1 %3977 }
 0x3c1   : > { %4104 = vst.msk [vmem:[%s5336_s5 + $0x38] sm:$0xff] %vm479_vm5, %v4088_v52  ;;  %v4036_v14 = vsel %vm6171_vm4, %v3978_v13, %v4035_v43 }
 0x3c2   : > { %4037 = vst [vmem:[#allocation3 + $0x20] sm:$0xf] %v4036_v14 }
 0x3c4   : > { %v3972_v2 = vpop.permute.xlu0 %3971  ;;  %v3970_v56 = vpop.permute.xlu1 %3969 }
 0x3c5   : > { %v4027_v50 = vsel %vm6180_vm7, %v3972_v2, %v4026_v27  ;;  %v4024_v53 = vsel %vm6171_vm4, %v3970_v56, %v4023_v58 }
 0x3c6   : > { %4028 = vst [vmem:[#allocation3 + $0x14] sm:$0x1] %v4027_v50  ;;  %4025 = vst [vmem:[#allocation3 + $0x10] sm:$0xf] %v4024_v53 }
 0x3c8   : > { %v4084_v31 = vpop.permute.xlu0 %4083  ;;  %v3990_v40 = vpop.permute.xlu1 %3989 }
 0x3c9   : > { %4102 = vst.msk [vmem:[%s5336_s5 + $0x28] sm:$0xff] %vm479_vm5, %v4084_v31 }
 0x3ca   : > { %5137 = shalt.err (!%p5134_p9)
}
 0x3cb   : > { %s5138_s8 = scalar_lea.hbm %s6212_s27, 1024  ;;  %s5142_s14 = scalar_lea.hbm %s6292_s4, 8192 }
 0x3cc   : > { %p5139_p10 = scmp.ne.s32.totalorder %s6212_s27, %s5138_s8  ;;  %p5143_p13 = scmp.lt.u32.totalorder %s6212_s27, %s6292_s4 }
 0x3cd   : > { %p5144_p0 = scmp.lt.u32.totalorder %s5142_s14, %s5138_s8  ;;  %p5146_p2 = scmp.lt.u32.totalorder %s5138_s8, %s6212_s27 }
 0x3ce   : > { %p5140_p11 = pnand %p5139_p10, %p5304_p3 }
 0x3cf   : > { %p5145_p1 = por %p5144_p0, %p5143_p13 }
 0x3d0   : > { %p5141_p12 = pneg %p5140_p11 }
 0x3d1   : > { %p5147_p4 = por %p5146_p2, %p5145_p1 }
 0x3d3   : > { %p5148_p5 = pnand %p5147_p4, %p5141_p12 }
 0x3d5   : > { %5151 = shalt.err (!%p5148_p5)
}
 0x3d6   : > { %s5226_s19 = smov 128   ;;  %s5227_s24 = smov 8   ;;  %v4054_v37 = vsel %vm6171_vm4, %v3990_v40, %v4053_v51  ;;  %v3992_v5 = vpop.permute.xlu0 %3991  ;;  %v4041_v59 = vld [vmem:[#allocation3 + $0x28] sm:$0xf]  ;;  %v3982_v0 = vpop.permute.xlu1 %3981  ;;  %v4044_v26 = vld [vmem:[#allocation3 + $0x2c] sm:$0x1] }
 0x3d7   : > { %4939 = dma.vmem_to_hbm [thread:$0]  (%p5304_p3), %s6205_s30, 1024, %s6212_s27, %s6218_s6, %s5226_s19, %s5226_s19, %s5227_s24   ;;  %4055 = vst [vmem:[#allocation3 + $0x38] sm:$0xf] %v4054_v37  ;;  %v4057_v20 = vsel %vm6180_vm7, %v3992_v5, %v4056_v19  ;;  %v4042_v11 = vsel %vm6171_vm4, %v3982_v0, %v4041_v59  ;;  %v4059_v25 = vld [vmem:[#allocation3 + $0x40] sm:$0xf] }
 0x3d8   : > { %4058 = vst [vmem:[#allocation3 + $0x3c] sm:$0x1] %v4057_v20  ;;  %4043 = vst [vmem:[#allocation3 + $0x28] sm:$0xf] %v4042_v11  ;;  %v4062_v32 = vld [vmem:[#allocation3 + $0x44] sm:$0x1] }
 0x3d9   : > { %v4047_v47 = vld [vmem:[#allocation3 + $0x30] sm:$0xf]  ;;  %v4050_v57 = vld [vmem:[#allocation3 + $0x34] sm:$0x1] }
 0x3da   : > { %v3984_v12 = vpop.permute.xlu0 %3983  ;;  %v3994_v60 = vpop.permute.xlu1 %3993 }
 0x3db   : > { %v4045_v3 = vsel %vm6180_vm7, %v3984_v12, %v4044_v26  ;;  %v4060_v34 = vsel %vm6171_vm4, %v3994_v60, %v4059_v25 }
 0x3dc   : > { %4046 = vst [vmem:[#allocation3 + $0x2c] sm:$0x1] %v4045_v3  ;;  %4061 = vst [vmem:[#allocation3 + $0x40] sm:$0xf] %v4060_v34 }
 0x3de   : > { %v3996_v22 = vpop.permute.xlu0 %3995  ;;  %v3986_v36 = vpop.permute.xlu1 %3985 }
 0x3df   : > { %v4063_v33 = vsel %vm6180_vm7, %v3996_v22, %v4062_v32  ;;  %v4048_v9 = vsel %vm6171_vm4, %v3986_v36, %v4047_v47 }
 0x3e0   : > { %4064 = vst [vmem:[#allocation3 + $0x44] sm:$0x1] %v4063_v33  ;;  %4049 = vst [vmem:[#allocation3 + $0x30] sm:$0xf] %v4048_v9 }
 0x3e2   : > { %v3988_v38 = vpop.permute.xlu0 %3987  ;;  %v3852_v46 = vpop.permute.xlu1 %3851 }
 0x3e3   : > { %v4051_v42 = vsel %vm6180_vm7, %v3988_v38, %v4050_v57  ;;  %3868 = vst.msk [vmem:[#allocation4 + $0x38] sm:$0xff] %vm479_vm5, %v3852_v46 }
 0x3e4   : > { %4052 = vst [vmem:[#allocation3 + $0x34] sm:$0x1] %v4051_v42 }
 0x3e6   : > { %v3850_v39 = vpop.permute.xlu0 %3849 }
 0x3e7   : > { %3867 = vst.msk [vmem:[#allocation4 + $0x30] sm:$0xff] %vm479_vm5, %v3850_v39 }
 0x3e8 PF: > { %p4945_p3 = scmp.ge.s32.totalorder %s5218_s22, 2  ;;  %s4136_s28 = sand.u32 1, %s5190_s15  }
 0x3e9   : > { %s4137_s30 = scalar_lea.sflag [#allocation6], %s4136_s28 }
 0x3ea   : > { %p4942_p6 = pnand %p4945_p3, %p5313_p8 }
 0x3ec   : > { %5185 = dma.done.wait (!%p4942_p6), %s4137_s30, 1024  }
 0x3ed   : > { %5187 = vsyncadd (!%p4942_p6), %s4137_s30, 4294966272  ;;  %s17_s22 = sadd.s32 1, %s5218_s22   ;;  %s6307_s15 = smov %s5194_s16 }
 0x3ee   : > { %p14_p7 = scmp.ge.s32.totalorder %s17_s22, 10   ;;  %s6308_s16 = smov %s5198_s17 }
 0x3ef   : > { %s6309_s17 = smov %s5322_s7  ;;  %s6310_s18 = smov %s5210_s20 }
 0x3f0   : > { %s6311_s19 = smov %s5214_s21  ;;  %s6312_s20 = smov %s6315_s25 }
 0x3f1   : > { %s6313_s21 = smov %s6319_s26  ;;  %16 = sbr.rel (!%p14_p7) target bundleno = 5 (0x5), region = 95 }
 0x3f8   :  { %4142 = vsyncpa [#allocation6], 1 }
 0x3f9   :  { %4144 = vsyncpa [#allocation6 + $0x1], 1 }

// kernel: forward.2
= control target key start
LH: loop header
LB: loop body
LE: loop exit
PB: predicated region body
PF: predicated region fallthrough
CT: control target
= control target key end

     0   :  { %s5013_s15 = smov 0   ;;  %s5015_s16 = smov 0   ;;  %s5926_s0 = inlined_call_operand.vmem [shape: bf16[2,4,8,8,4], index: 0, kind: input, shape index: {}]   ;;  %s5927_s1 = inlined_call_operand.vmem [shape: bf16[9,4,64], index: 1, kind: input, shape index: {}]   ;;  %s5928_s2 = inlined_call_operand.vmem [shape: bf16[9,16,64], index: 2, kind: input, shape index: {}]   ;;  %s5929_s3 = inlined_call_operand.vmem [shape: f32[1,64], index: 3, kind: input, shape index: {}]   ;;  %s5930_s4 = inlined_call_operand.vmem [shape: bf16[2,4,64,16], index: 4, kind: output, shape index: {}]  }
   0x1   :  { %s5017_s17 = smov 0   ;;  %s5019_s18 = smov 0  }
   0x2   :  { %s5021_s19 = smov 0  }
   0x3 LB: > { %s23_s20 = sadd.s32 1, %s4972_s17  ;;  %s26_s21 = sadd.s32 1, %s4976_s18  ;;  %s4980_s19 = sphi %s5021_s19, %s14_s19   ;;  %s4976_s18 = sphi %s5019_s18, %s5946_s18   ;;  %s4972_s17 = sphi %s5017_s17, %s5945_s17   ;;  %s4968_s16 = sphi %s5015_s16, %s5944_s16   ;;  %s4964_s15 = sphi %s5013_s15, %s5943_s15  }
   0x4   : > { %p24_p0 = scmp.ge.s32.totalorder %s23_s20, 4  ;;  %p4124_p1 = scmp.ge.s32.totalorder %s4980_s19, 1 }
   0x5   : > { %p182_p2 = scmp.lt.s32.totalorder %s4980_s19, 9 }
   0x6   : > { %s5948_s20 = smov (%p24_p0, %s23_s20), 0  ;;  %s5950_s21 = smov (!%p24_p0, %s26_s21), %s4976_s18 }
   0x7   : > { %p183_p3 = pnand %p4124_p1, %p182_p2  ;;  %p28_p4 = scmp.ge.s32.totalorder %s5950_s21, 2 }
   0x8   : > { %p216_p5 = scmp.lt.s32.totalorder (!%p183_p3), %s4968_s16, 1  ;;  %p218_p6 = scmp.lt.s32.totalorder (!%p183_p3), %s4964_s15, 3 }
   0x9   : > { %s5952_s21 = smov (%p28_p4, %s5950_s21), 0  ;;  %186 = sbr.rel (%p183_p3) target bundleno = 980 (0x3d4), region = 36 }
   0xa   : > { %p4131_p7 = scmp.ne.s32.totalorder (!%p183_p3), %s4964_s15, 0 }
  0x10   : > { %s5954_s16 = smov (!%p216_p5, %s4968_s16), 1  ;;  %238 = sbr.rel (%p4131_p7) target bundleno = 43 (0x2b), region = 40 }
  0x11   : > { %s219_s22 = scalar_select %p218_p6, %s4964_s15, 3 }
  0x12   : > { %s4126_s23 = sshll.u32 %s5954_s16, 5  ;;  %vm239_vm0 = vcmask (!%p4131_p7), 27648   ;;  %vm241_vm1 = vcmask (!%p4131_p7), 24576   ;;  %vm261_vm2 = vcmask (!%p4131_p7), 125952   ;;  %v4982_v0 = vmov (!%p4131_p7), 0  }
  0x13   : > { %s4125_s24 = sshll.u32 %s219_s22, 3  ;;  %240 = vst.msk [vmem:[#allocation2] sm:$0xf] (!%p4131_p7), %vm239_vm0, %v4982_v0  ;;  %243 = vst.msk [vmem:[#allocation2 + $0x8] sm:$0xf] (!%p4131_p7), %vm239_vm0, %v4982_v0  ;;  %vm263_vm3 = vcmask (!%p4131_p7), 122880  }
  0x14   : > { %s222_s25 = sadd.s32 %s4126_s23, %s4125_s24  ;;  %245 = vst.msk [vmem:[#allocation2 + $0x10] sm:$0xf] (!%p4131_p7), %vm239_vm0, %v4982_v0  ;;  %247 = vst.msk [vmem:[#allocation2 + $0x18] sm:$0xf] (!%p4131_p7), %vm239_vm0, %v4982_v0  ;;  %vm283_vm4 = vcmask (!%p4131_p7), 130048   ;;  %v4983_v1 = vmov (!%p4131_p7), 0.0  }
  0x15   : > { %s4127_s26 = sshll.u32 %s222_s25, 2  ;;  %249 = vst.msk [vmem:[#allocation2 + $0x20] sm:$0xf] (!%p4131_p7), %vm239_vm0, %v4982_v0  ;;  %251 = vst.msk [vmem:[#allocation2 + $0x28] sm:$0xf] (!%p4131_p7), %vm239_vm0, %v4982_v0 }
  0x16   : > { %s5046_s29 = scalar_lea.vmem %s5926_s0, %s4127_s26  ;;  %s5051_s6 = scalar_lea.vmem %s5930_s4, %s4127_s26  ;;  %253 = vst.msk [vmem:[#allocation2 + $0x30] sm:$0xf] (!%p4131_p7), %vm239_vm0, %v4982_v0  ;;  %255 = vst.msk [vmem:[#allocation2 + $0x38] sm:$0xf] (!%p4131_p7), %vm239_vm0, %v4982_v0 }
  0x17   : > { %257 = vst.msk [vmem:[#allocation2 + $0x40] sm:$0xf] %vm239_vm0, %v4982_v0  ;;  %259 = vst.msk [vmem:[#allocation2 + $0x48] sm:$0xf] %vm239_vm0, %v4982_v0 }
  0x18   : > { %242 = vst.msk [vmem:[#allocation2 + $0x4] sm:$0x1] %vm241_vm1, %v4982_v0  ;;  %244 = vst.msk [vmem:[#allocation2 + $0xc] sm:$0x1] %vm241_vm1, %v4982_v0 }
  0x19   : > { %246 = vst.msk [vmem:[#allocation2 + $0x14] sm:$0x1] %vm241_vm1, %v4982_v0  ;;  %248 = vst.msk [vmem:[#allocation2 + $0x1c] sm:$0x1] %vm241_vm1, %v4982_v0 }
  0x1a   : > { %250 = vst.msk [vmem:[#allocation2 + $0x24] sm:$0x1] %vm241_vm1, %v4982_v0  ;;  %252 = vst.msk [vmem:[#allocation2 + $0x2c] sm:$0x1] %vm241_vm1, %v4982_v0 }
  0x1b   : > { %254 = vst.msk [vmem:[#allocation2 + $0x34] sm:$0x1] %vm241_vm1, %v4982_v0  ;;  %256 = vst.msk [vmem:[#allocation2 + $0x3c] sm:$0x1] %vm241_vm1, %v4982_v0 }
  0x1c   : > { %258 = vst.msk [vmem:[#allocation2 + $0x44] sm:$0x1] %vm241_vm1, %v4982_v0  ;;  %260 = vst.msk [vmem:[#allocation2 + $0x4c] sm:$0x1] %vm241_vm1, %v4982_v0 }
  0x1d   : > { %262 = vst.msk [vmem:[#allocation3] sm:$0xf] %vm261_vm2, %v4982_v0  ;;  %265 = vst.msk [vmem:[#allocation3 + $0x8] sm:$0xf] %vm261_vm2, %v4982_v0 }
  0x1e   : > { %267 = vst.msk [vmem:[#allocation3 + $0x10] sm:$0xf] %vm261_vm2, %v4982_v0  ;;  %269 = vst.msk [vmem:[#allocation3 + $0x18] sm:$0xf] %vm261_vm2, %v4982_v0 }
  0x1f   : > { %271 = vst.msk [vmem:[#allocation3 + $0x20] sm:$0xf] %vm261_vm2, %v4982_v0  ;;  %273 = vst.msk [vmem:[#allocation3 + $0x28] sm:$0xf] %vm261_vm2, %v4982_v0 }
  0x20   : > { %275 = vst.msk [vmem:[#allocation3 + $0x30] sm:$0xf] %vm261_vm2, %v4982_v0  ;;  %277 = vst.msk [vmem:[#allocation3 + $0x38] sm:$0xf] %vm261_vm2, %v4982_v0 }
  0x21   : > { %279 = vst.msk [vmem:[#allocation3 + $0x40] sm:$0xf] %vm261_vm2, %v4982_v0  ;;  %281 = vst.msk [vmem:[#allocation3 + $0x48] sm:$0xf] %vm261_vm2, %v4982_v0 }
  0x22   : > { %264 = vst.msk [vmem:[#allocation3 + $0x4] sm:$0x1] %vm263_vm3, %v4982_v0  ;;  %266 = vst.msk [vmem:[#allocation3 + $0xc] sm:$0x1] %vm263_vm3, %v4982_v0 }
  0x23   : > { %268 = vst.msk [vmem:[#allocation3 + $0x14] sm:$0x1] %vm263_vm3, %v4982_v0  ;;  %270 = vst.msk [vmem:[#allocation3 + $0x1c] sm:$0x1] %vm263_vm3, %v4982_v0 }
  0x24   : > { %272 = vst.msk [vmem:[#allocation3 + $0x24] sm:$0x1] %vm263_vm3, %v4982_v0  ;;  %274 = vst.msk [vmem:[#allocation3 + $0x2c] sm:$0x1] %vm263_vm3, %v4982_v0 }
  0x25   : > { %276 = vst.msk [vmem:[#allocation3 + $0x34] sm:$0x1] %vm263_vm3, %v4982_v0  ;;  %278 = vst.msk [vmem:[#allocation3 + $0x3c] sm:$0x1] %vm263_vm3, %v4982_v0 }
  0x26   : > { %280 = vst.msk [vmem:[#allocation3 + $0x44] sm:$0x1] %vm263_vm3, %v4982_v0  ;;  %282 = vst.msk [vmem:[#allocation3 + $0x4c] sm:$0x1] %vm263_vm3, %v4982_v0 }
  0x27   : > { %284 = vst.msk [vmem:[#allocation4] sm:$0xff] %vm283_vm4, %v4983_v1  ;;  %285 = vst.msk [vmem:[#allocation4 + $0x8] sm:$0xff] %vm283_vm4, %v4983_v1 }
  0x28   : > { %286 = vst.msk [vmem:[#allocation4 + $0x10] sm:$0xff] %vm283_vm4, %v4983_v1  ;;  %287 = vst.msk [vmem:[#allocation4 + $0x18] sm:$0xff] %vm283_vm4, %v4983_v1 }
  0x29   : > { %288 = vst.msk [vmem:[#allocation4 + $0x20] sm:$0xff] %vm283_vm4, %v4983_v1  ;;  %289 = vst.msk [vmem:[#allocation4 + $0x28] sm:$0xff] %vm283_vm4, %v4983_v1 }
  0x2a   : > { %290 = vst.msk [vmem:[#allocation4 + $0x30] sm:$0xff] %vm283_vm4, %v4983_v1  ;;  %291 = vst.msk [vmem:[#allocation4 + $0x38] sm:$0xff] %vm283_vm4, %v4983_v1 }
  0x2b PF: > { %v4853_v2 = vld [vmem:[%s5928_s2] sm:$0xff]   ;;  %vm480_vm5 = vcmask 130048   ;;  %v4854_v3 = vld [vmem:[#allocation3] ss:$8 sps:$4 sm:$0xff]   ;;  %vm591_vm6 = vcmask 1041408   ;;  %vm381_vm10 = vcmask 27648  }
  0x2c   : > { %4482 = vmatprep.subr.bf16.mxu1 %v4853_v2  ;;  %v4855_v4 = vld [vmem:[#allocation3 + $0x10] ss:$8 sps:$4 sm:$0xff]   ;;  %4484 = vmatprep.mubr.msk.bf16.mxu1 %vm480_vm5, %v4854_v3  ;;  %vm676_vm7 = vsmask.f32 3328  ;;  %v1819_v7 = vld [vmem:[#allocation3 + $0x8] sm:$0xf] }
  0x2d   : > { %4483 = vmatpush3.bf16.msra.mxu1 %v4853_v2  ;;  %v4856_v5 = vld [vmem:[%s5928_s2 + $0x20] sm:$0xff]   ;;  %v5092_v8 = vld [vmem:[#allocation3 + $0xc] sm:$0x1]  ;;  %v1836_v12 = vshrl.u32 %v1819_v7, 16  ;;  %v1839_v13 = vshll.u32 %v1819_v7, 16  ;;  %vm387_vm13 = vcmask 24576  }
  0x2e   : > { %v451_v6 = vld [vmem:[%s5927_s1] sm:$0x3]  ;;  %4572 = vmatprep.subr.bf16.mxu0 %v4856_v5  ;;  %v5096_v11 = vld [vmem:[#allocation3 + $0x14] sm:$0x1]  ;;  %v1845_v14 = vshll.u32 %v5092_v8, 16  ;;  %v2237_v46 = vrot.slane %v5092_v8, 5 }
  0x2f   : > { %4798 = vmatprep.subr.msk.bf16.mxu1 %vm591_vm6, %v451_v6  ;;  %v593_v9 = vsel %vm591_vm6, %v451_v6, 0  ;;  %4573 = vmatpush3.bf16.msra.mxu0 %v4856_v5  ;;  %v1821_v10 = vld [vmem:[#allocation3 + $0x10] sm:$0xf]  ;;  %v1859_v17 = vshll.u32 %v5096_v11, 16  ;;  %v4261_v18 = vld [vmem:[%s5927_s1 + $0xa] sm:$0x3] }
  0x30   : > { %4485 = vmatmul.mubr.msk.bf16.vlgmr.msra.gmra.mrb[0].mxu1 %vm480_vm5, %v4855_v4  ;;  %v1850_v15 = vshrl.u32 %v1821_v10, 16  ;;  %v1853_v16 = vshll.u32 %v1821_v10, 16  ;;  %vm677_vm8 = vsmask.f32 7440  ;;  %v1838_v19 = vrot.slane %v1836_v12, 4  ;;  %4803 = vmatprep.subr.msk.bf16.mxu0 %vm591_vm6, %v4261_v18  ;;  %s4984_s30 = smov 80  }
  0x31   : > { %4493 = vmatpush3.bf16.msra.mxu1 %v593_v9  ;;  %v1841_v20 = vrot.slane %v1839_v13, 5  ;;  %v1823_v21 = vld [vmem:[#allocation3 + $0x18] sm:$0xf]  ;;  %v1847_v22 = vrot.slane %v1845_v14, 5  ;;  %v1861_v25 = vrot.slane %v1859_v17, 5  ;;  %vm5110_vm9 = vmor %vm676_vm7, %vm677_vm8  ;;  %v2294_v52 = vsel %vm591_vm6, %v4261_v18, 0 }
  0x32   : > { %v1852_v23 = vrot.slane %v1850_v15, 4  ;;  %v1855_v24 = vrot.slane %v1853_v16, 5  ;;  %v5104_v26 = vld [vmem:[#allocation3 + $0x1c] sm:$0x1]  ;;  %v1825_v28 = vld [vmem:[#allocation3 + $0x20] sm:$0xf] }
  0x33   : > { %v1842_v27 = vor.u32 %v1841_v20, %v1838_v19  ;;  %v5106_v29 = vld [vmem:[#allocation3 + $0x24] sm:$0x1]  ;;  %v1864_v30 = vshrl.u32 %v1823_v21, 16  ;;  %v1867_v31 = vshll.u32 %v1823_v21, 16  ;;  %v1873_v34 = vshll.u32 %v5104_v26, 16  ;;  %v5140_v13 = vld [vmem:[%s5928_s2 + $0x28] sm:$0xff]  }
  0x34   : > { %v1856_v33 = vor.u32 %v1855_v24, %v1852_v23  ;;  %v1878_v35 = vshrl.u32 %v1825_v28, 16  ;;  %v1881_v36 = vshll.u32 %v1825_v28, 16  ;;  %v1887_v40 = vshll.u32 %v5106_v29, 16  ;;  %v4857_v44 = vld [vmem:[#allocation3 + $0x20] ss:$8 sps:$4 sm:$0xff]   ;;  %s4985_s5 = smov 16  }
  0x35   : > { %v1843_v37 = vrot.slane %v1842_v27, 4  ;;  %v1866_v38 = vrot.slane %v1864_v30, 4  ;;  %v1869_v39 = vrot.slane %v1867_v31, 5  ;;  %v1875_v48 = vrot.slane %v1873_v34, 5  ;;  %4488 = vmatprep.mubr.msk.bf16.mxu1 %vm480_vm5, %v4857_v44  ;;  %v4858_v53 = vld [vmem:[#allocation3 + $0x30] ss:$8 sps:$4 sm:$0xff]  }
  0x36   : > { %v1857_v41 = vrot.slane %v1856_v33, 4  ;;  %v1880_v42 = vrot.slane %v1878_v35, 4  ;;  %v1883_v43 = vrot.slane %v1881_v36, 5  ;;  %v1889_v51 = vrot.slane %v1887_v40, 5  ;;  %v1827_v54 = vld [vmem:[#allocation3 + $0x28] sm:$0xf] }
  0x37   : > { %v1848_v45 = vsel %vm5110_vm9, %v1843_v37, %v1847_v22  ;;  %v1870_v47 = vor.u32 %v1869_v39, %v1866_v38  ;;  %v5123_v57 = vld [vmem:[#allocation3 + $0x2c] sm:$0x1]  ;;  %v1829_v58 = vld [vmem:[#allocation3 + $0x30] sm:$0xf]  ;;  %v1892_v59 = vshrl.u32 %v1827_v54, 16  ;;  %v1895_v62 = vshll.u32 %v1827_v54, 16 }
  0x38   : > { %v1862_v49 = vsel %vm5110_vm9, %v1857_v41, %v1861_v25  ;;  %v1884_v50 = vor.u32 %v1883_v43, %v1880_v42  ;;  %4489 = vmatmul.mubr.msk.bf16.gmra.mrb[4].mxu1 %vm480_vm5, %v4858_v53  ;;  %v5126_v61 = vld [vmem:[#allocation3 + $0x34] sm:$0x1]  ;;  %v1901_v63 = vshll.u32 %v5123_v57, 16  ;;  %v1906_v0 = vshrl.u32 %v1829_v58, 16  ;;  %v1831_v5 = vld [vmem:[#allocation3 + $0x38] sm:$0xf] }
  0x39   : > { %v4236_v55 = vcombine.low %v1848_v45, %v1862_v49  ;;  %v1871_v56 = vrot.slane %v1870_v47, 4  ;;  %v1894_v2 = vrot.slane %v1892_v59, 4  ;;  %v1909_v3 = vshll.u32 %v1829_v58, 16  ;;  %v5135_v12 = vld [vmem:[#allocation3 + $0x3c] sm:$0x1]  ;;  %s4986_s7 = smov 112  }
  0x3a   : > { %v1885_v60 = vrot.slane %v1884_v50, 4  ;;  %v1915_v4 = vshll.u32 %v5126_v61, 16  ;;  %v1897_v7 = vrot.slane %v1895_v62, 5  ;;  %v1903_v9 = vrot.slane %v1901_v63, 5  ;;  %v1833_v17 = vld [vmem:[#allocation3 + $0x40] sm:$0xf] }
  0x3b   : > { %4574 = vmatprep.mubr.msk.bf16.mxu0 %vm480_vm5, %v4236_v55  ;;  %v1876_v1 = vsel %vm5110_vm9, %v1871_v56, %v1875_v48  ;;  %v1908_v10 = vrot.slane %v1906_v0, 4  ;;  %v1911_v15 = vrot.slane %v1909_v3, 5  ;;  %v5142_v18 = vld [vmem:[#allocation3 + $0x44] sm:$0x1]  ;;  %v1920_v20 = vshrl.u32 %v1831_v5, 16  ;;  %s4987_s8 = smov 96  }
  0x3c   : > { %v1890_v6 = vsel %vm5110_vm9, %v1885_v60, %v1889_v51  ;;  %v1917_v16 = vrot.slane %v1915_v4, 5  ;;  %v1898_v19 = vor.u32 %v1897_v7, %v1894_v2  ;;  %v1923_v21 = vshll.u32 %v1831_v5, 16  ;;  %v292_v28 = vld [vmem:[%s5046_s29] sm:$0xf]  ;;  %v293_v39 = vld [vmem:[%s5046_s29 + $0x4] sm:$0xf] }
  0x3d   : > { %v4237_v14 = vcombine.low %v1876_v1, %v1890_v6  ;;  %v1929_v22 = vshll.u32 %v5135_v12, 16  ;;  %v1912_v23 = vor.u32 %v1911_v15, %v1908_v10  ;;  %v1934_v24 = vshrl.u32 %v1833_v17, 16  ;;  %v294_v44 = vld [vmem:[%s5046_s29 + $0x8] sm:$0xf]  ;;  %v4149_v54 = vld [vmem:[%s5927_s1 + $0x2] sm:$0x3] }
  0x3e   : > { %v1937_v25 = vshll.u32 %v1833_v17, 16  ;;  %v1943_v27 = vshll.u32 %v5142_v18, 16  ;;  %v2241_v30 = vrot.slane %v5096_v11, 5  ;;  %v1899_v31 = vrot.slane %v1898_v19, 4  ;;  %v384_v49 = vld [vmem:[#allocation2 + $0x8] sm:$0xf]  ;;  %4799 = vmatprep.subr.msk.bf16.mxu1 %vm591_vm6, %v4149_v54 }
  0x3f   : > { %4575 = vmatmul.mubr.msk.bf16.vlgmr.msra.gmra.mrb[0].mxu0 %vm480_vm5, %v4237_v14  ;;  %v1922_v33 = vrot.slane %v1920_v20, 4  ;;  %v1925_v34 = vrot.slane %v1923_v21, 5  ;;  %v1913_v35 = vrot.slane %v1912_v23, 4  ;;  %v1931_v36 = vrot.slane %v1929_v22, 5  ;;  %v393_v62 = vld [vmem:[#allocation2 + $0x10] sm:$0xf] }
  0x40   : > { %4583 = vmatpush3.bf16.msra.mxu0 %v2294_v52  ;;  %v1936_v37 = vrot.slane %v1934_v24, 4  ;;  %v1939_v38 = vrot.slane %v1937_v25, 5  ;;  %v1904_v40 = vsel %vm5110_vm9, %v1899_v31, %v1903_v9  ;;  %v301_v42 = vshrl.u32 %v292_v28, 16  ;;  %v390_v63 = vld [vmem:[#allocation2 + $0xc] sm:$0x1] }
  0x41   : > { %4592 = vmatprep.subr.bf16.mxu0 %v5140_v13  ;;  %v1926_v41 = vor.u32 %v1925_v34, %v1922_v33  ;;  %v304_v43 = vshll.u32 %v292_v28, 16  ;;  %v1918_v45 = vsel %vm5110_vm9, %v1913_v35, %v1917_v16  ;;  %v1945_v48 = vrot.slane %v1943_v27, 5  ;;  %v399_v4 = vld [vmem:[#allocation2 + $0x18] sm:$0xf]  ;;  %v396_v5 = vld [vmem:[#allocation2 + $0x14] sm:$0x1] }
  0x42   : > { %v1940_v47 = vor.u32 %v1939_v38, %v1936_v37  ;;  %vm382_vm11 = vsmask.f32 7938  ;;  %v4238_v50 = vcombine.low %v1904_v40, %v1918_v45  ;;  %v303_v52 = vrot.slane %v301_v42, 7  ;;  %v295_v17 = vld [vmem:[%s5046_s29 + $0xc] sm:$0xf] }
  0x43   : > { %v1927_v51 = vrot.slane %v1926_v41, 4  ;;  %v309_v53 = vshrl.u32 %v293_v39, 16  ;;  %vm5161_vm12 = vmand %vm381_vm10, %vm382_vm11  ;;  %v312_v58 = vshll.u32 %v293_v39, 16  ;;  %v317_v59 = vshrl.u32 %v294_v44, 16  ;;  %v402_v19 = vld [vmem:[#allocation2 + $0x1c] sm:$0x1] }
  0x44   : > { %v1941_v55 = vrot.slane %v1940_v47, 4  ;;  %v320_v60 = vshll.u32 %v294_v44, 16  ;;  %4578 = vmatprep.mubr.msk.bf16.mxu0 %vm480_vm5, %v4238_v50  ;;  %v306_v1 = vor.u32 %v304_v43, %v303_v52  ;;  %v307_v2 = vrot.slane %v303_v52, 4  ;;  %v296_v28 = vld [vmem:[%s5046_s29 + $0x10] sm:$0xf] }
  0x45   : > { %v1932_v0 = vsel %vm5110_vm9, %v1927_v51, %v1931_v36  ;;  %v311_v3 = vrot.slane %v309_v53, 7  ;;  %v319_v7 = vrot.slane %v317_v59, 7  ;;  %vm388_vm14 = vsmask.f32 256  ;;  %v297_v36 = vld [vmem:[%s5046_s29 + $0x14] sm:$0xf] }
  0x46   : > { %v1946_v6 = vsel %vm5110_vm9, %v1941_v55, %v1945_v48  ;;  %v385_v10 = vsel %vm5161_vm12, %v306_v1, %v384_v49  ;;  %vm5174_vm15 = vmand %vm387_vm13, %vm388_vm14  ;;  %v2245_v20 = vrot.slane %v5104_v26, 5  ;;  %v2249_v24 = vrot.slane %v5106_v29, 5  ;;  %v298_v37 = vld [vmem:[%s5046_s29 + $0x18] sm:$0xf]  ;;  %v405_v38 = vld [vmem:[#allocation2 + $0x20] sm:$0xf] }
  0x47   : > { %v4239_v9 = vcombine.low %v1932_v0, %v1946_v6  ;;  %v314_v14 = vor.u32 %v312_v58, %v311_v3  ;;  %v315_v15 = vrot.slane %v311_v3, 4  ;;  %386 = vst [vmem:[#allocation2 + $0x8] sm:$0xf] %v385_v10  ;;  %v322_v21 = vor.u32 %v320_v60, %v319_v7  ;;  %v408_v39 = vld [vmem:[#allocation2 + $0x24] sm:$0x1]  ;;  %v5210_v10 = vld [vmem:[%s5928_s2 + $0x8] sm:$0xff]  }
  0x48   : > { %v323_v22 = vrot.slane %v319_v7, 4  ;;  %v391_v23 = vsel %vm5174_vm15, %v307_v2, %v390_v63  ;;  %vm578_vm0 = vcmask 31744   ;;  %v325_v33 = vshrl.u32 %v295_v17, 16  ;;  %v411_v45 = vld [vmem:[#allocation2 + $0x28] sm:$0xf] }
  0x49   : > { %4579 = vmatmul.mubr.msk.bf16.gmra.mrb[4].mxu0 %vm480_vm5, %v4239_v9  ;;  %v394_v25 = vsel %vm5161_vm12, %v314_v14, %v393_v62  ;;  %392 = vst [vmem:[#allocation2 + $0xc] sm:$0x1] %v391_v23  ;;  %v397_v27 = vsel %vm5174_vm15, %v315_v15, %v396_v5  ;;  %v400_v31 = vsel %vm5161_vm12, %v322_v21, %v399_v4  ;;  %v328_v34 = vshll.u32 %v295_v17, 16  ;;  %v417_v52 = vld [vmem:[#allocation2 + $0x30] sm:$0xf] }
  0x4a   : > { %395 = vst [vmem:[#allocation2 + $0x10] sm:$0xf] %v394_v25  ;;  %398 = vst [vmem:[#allocation2 + $0x14] sm:$0x1] %v397_v27  ;;  %v403_v35 = vsel %vm5174_vm15, %v323_v22, %v402_v19  ;;  %v333_v40 = vshrl.u32 %v296_v28, 16  ;;  %v336_v41 = vshll.u32 %v296_v28, 16 }
  0x4b   : > { %401 = vst [vmem:[#allocation2 + $0x18] sm:$0xf] %v400_v31  ;;  %404 = vst [vmem:[#allocation2 + $0x1c] sm:$0x1] %v403_v35  ;;  %v341_v42 = vshrl.u32 %v297_v36, 16  ;;  %v344_v43 = vshll.u32 %v297_v36, 16 }
  0x4c   : > { %vm1151_vm1 = vcmask 1042432   ;;  %vm1152_vm2 = vcmask 1046532   ;;  %v327_v44 = vrot.slane %v325_v33, 7  ;;  %v349_v47 = vshrl.u32 %v298_v37, 16  ;;  %v423_v59 = vld [vmem:[#allocation2 + $0x38] sm:$0xf] }
  0x4d   : > { %v946_v48 = vsel %vm591_vm6, %v4149_v54, 0  ;;  %v335_v49 = vrot.slane %v333_v40, 7  ;;  %v343_v50 = vrot.slane %v341_v42, 7  ;;  %v352_v51 = vshll.u32 %v298_v37, 16  ;;  %v414_v60 = vld [vmem:[#allocation2 + $0x2c] sm:$0x1]  ;;  %vm5198_vm3 = vmor %vm1151_vm1, %vm1152_vm2 }
  0x4e   : > { %v330_v53 = vor.u32 %v328_v34, %v327_v44  ;;  %v331_v55 = vrot.slane %v327_v44, 4  ;;  %v351_v58 = vrot.slane %v349_v47, 7  ;;  %v4859_v62 = vld [vmem:[#allocation2] ss:$8 sps:$4 sm:$0xff]   ;;  %v420_v7 = vld [vmem:[#allocation2 + $0x34] sm:$0x1] }
  0x4f   : > { %v2155_v63 = vld [vmem:[#allocation2 + $0x8] sm:$0xe]  ;;  %v338_v0 = vor.u32 %v336_v41, %v335_v49  ;;  %v346_v1 = vor.u32 %v344_v43, %v343_v50  ;;  %v339_v6 = vrot.slane %v335_v49, 4  ;;  %v299_v9 = vld [vmem:[%s5046_s29 + $0x1c] sm:$0xf]  ;;  %4494 = vmatprep.mubr.msk.bf16.mxu1 %vm578_vm0, %v4859_v62  ;;  %v347_v35 = vrot.slane %v343_v50, 4 }
  0x50   : > { %v1692_v54 = vld [vmem:[#allocation2 + $0xc] sm:$0x1]  ;;  %v4245_v3 = vrot.slane %v2155_v63, 9  ;;  %v406_v4 = vsel %vm5161_vm12, %v330_v53, %v405_v38  ;;  %v409_v5 = vsel %vm5174_vm15, %v331_v55, %v408_v39  ;;  %v354_v19 = vor.u32 %v352_v51, %v351_v58  ;;  %v426_v22 = vld [vmem:[#allocation2 + $0x3c] sm:$0x1] }
  0x51   : > { %v1694_v14 = vld [vmem:[#allocation2 + $0x14] sm:$0x1]  ;;  %v2156_v15 = vld [vmem:[#allocation2 + $0x10] sm:$0xe]  ;;  %407 = vst [vmem:[#allocation2 + $0x20] sm:$0xf] %v406_v4  ;;  %v412_v17 = vsel %vm5161_vm12, %v338_v0, %v411_v45  ;;  %v418_v21 = vsel %vm5161_vm12, %v346_v1, %v417_v52  ;;  %v415_v28 = vsel %vm5174_vm15, %v339_v6, %v414_v60  ;;  %v421_v42 = vsel %vm5174_vm15, %v347_v35, %v420_v7 }
  0x52   : > { %410 = vst [vmem:[#allocation2 + $0x24] sm:$0x1] %v409_v5  ;;  %v4860_v23 = vld [vmem:[#allocation2 + $0x10] ss:$8 sps:$4 sm:$0xff]   ;;  %v2181_v25 = vrot.slane %v1692_v54, 5  ;;  %v4246_v27 = vrot.slane %v2156_v15, 9  ;;  %v424_v36 = vsel %vm5161_vm12, %v354_v19, %v423_v59 }
  0x53   : > { %413 = vst [vmem:[#allocation2 + $0x28] sm:$0xf] %v412_v17  ;;  %419 = vst [vmem:[#allocation2 + $0x30] sm:$0xf] %v418_v21  ;;  %v2185_v31 = vrot.slane %v1694_v14, 5  ;;  %4495 = vmatmul.mubr.msk.bf16.vlgmr.msra.gmra.mrb[0].mxu1 %vm578_vm0, %v4860_v23  ;;  %v355_v40 = vrot.slane %v351_v58, 4 }
  0x54   : > { %v1696_v33 = vld [vmem:[#allocation2 + $0x1c] sm:$0x1]  ;;  %v2157_v34 = vld [vmem:[#allocation2 + $0x18] sm:$0xe]  ;;  %416 = vst [vmem:[#allocation2 + $0x2c] sm:$0x1] %v415_v28  ;;  %v2182_v37 = vsel %vm5198_vm3, %v4245_v3, %v2181_v25  ;;  %4503 = vmatpush3.bf16.msra.mxu1 %v946_v48 }
  0x55   : > { %v4247_v38 = vrot.slane %v2157_v34, 9  ;;  %v2189_v39 = vrot.slane %v1696_v33, 5  ;;  %425 = vst [vmem:[#allocation2 + $0x38] sm:$0xf] %v424_v36  ;;  %v2186_v41 = vsel %vm5198_vm3, %v4246_v27, %v2185_v31  ;;  %v357_v43 = vshrl.u32 %v299_v9, 16  ;;  %4512 = vmatprep.subr.bf16.mxu1 %v5210_v10 }
  0x56   : > { %v360_v44 = vshll.u32 %v299_v9, 16  ;;  %v660_v45 = vld [vmem:[#allocation2] sm:$0xf]  ;;  %v5228_v47 = vld [vmem:[#allocation2 + $0x4] sm:$0x1]  ;;  %v4262_v49 = vcombine.low %v2182_v37, %v2186_v41  ;;  %v427_v50 = vsel %vm5174_vm15, %v355_v40, %v426_v22  ;;  %v2253_v53 = vrot.slane %v5123_v57, 5 }
  0x57   : > { %422 = vst [vmem:[#allocation2 + $0x34] sm:$0x1] %v421_v42  ;;  %v662_v51 = vld [vmem:[#allocation2 + $0x8] sm:$0xf]  ;;  %v680_v52 = vshrl.u32 %v660_v45, 16  ;;  %v359_v48 = vrot.slane %v357_v43, 7  ;;  %v2190_v0 = vsel %vm5198_vm3, %v4247_v38, %v2189_v39 }
  0x58   : > { %428 = vst [vmem:[#allocation2 + $0x3c] sm:$0x1] %v427_v50  ;;  %v429_v55 = vld [vmem:[#allocation2 + $0x40] sm:$0xf]  ;;  %v683_v58 = vshll.u32 %v660_v45, 16  ;;  %v689_v59 = vshll.u32 %v5228_v47, 16  ;;  %4584 = vmatprep.mubr.msk.bf16.mxu0 %vm578_vm0, %v4262_v49 }
  0x59   : > { %v694_v60 = vshrl.u32 %v662_v51, 16  ;;  %v1698_v62 = vld [vmem:[#allocation2 + $0x24] sm:$0x1]  ;;  %v2158_v63 = vld [vmem:[#allocation2 + $0x20] sm:$0xe]  ;;  %v362_v4 = vor.u32 %v360_v44, %v359_v48  ;;  %v363_v33 = vrot.slane %v359_v48, 4 }
  0x5a   : > { %v4248_v1 = vrot.slane %v2158_v63, 9  ;;  %v2193_v54 = vrot.slane %v1698_v62, 5  ;;  %v4862_v3 = vld [vmem:[#allocation2 + $0x20] ss:$8 sps:$4 sm:$0xff]   ;;  %v432_v7 = vld [vmem:[#allocation2 + $0x44] sm:$0x1] }
  0x5b   : > { %v1700_v5 = vld [vmem:[#allocation2 + $0x2c] sm:$0x1]  ;;  %v2159_v6 = vld [vmem:[#allocation2 + $0x28] sm:$0xe]  ;;  %4498 = vmatprep.mubr.msk.bf16.mxu1 %vm578_vm0, %v4862_v3  ;;  %v2160_v15 = vld [vmem:[#allocation2 + $0x30] sm:$0xe]  ;;  %v430_v17 = vsel %vm5161_vm12, %v362_v4, %v429_v55  ;;  %v433_v41 = vsel %vm5174_vm15, %v363_v33, %v432_v7 }
  0x5c   : > { %v2194_v9 = vsel %vm5198_vm3, %v4248_v1, %v2193_v54  ;;  %v4863_v14 = vld [vmem:[#allocation2 + $0x30] ss:$8 sps:$4 sm:$0xff]   ;;  %v5243_v19 = vld [vmem:[#allocation2 + $0xc] sm:$0x1]  ;;  %v4249_v23 = vrot.slane %v2159_v6, 9  ;;  %v2197_v25 = vrot.slane %v1700_v5, 5 }
  0x5d   : > { %v664_v21 = vld [vmem:[#allocation2 + $0x10] sm:$0xf]  ;;  %v4263_v22 = vcombine.low %v2190_v0, %v2194_v9  ;;  %v4250_v27 = vrot.slane %v2160_v15, 9  ;;  %431 = vst [vmem:[#allocation2 + $0x40] sm:$0xf] %v430_v17  ;;  %4499 = vmatmul.mubr.msk.bf16.gmra.mrb[4].mxu1 %vm578_vm0, %v4863_v14  ;;  %v682_v35 = vrot.slane %v680_v52, 4 }
  0x5e   : > { %v2161_v28 = vld [vmem:[#allocation2 + $0x38] sm:$0xe]  ;;  %v1702_v31 = vld [vmem:[#allocation2 + $0x34] sm:$0x1]  ;;  %v685_v36 = vrot.slane %v683_v58, 5  ;;  %v2198_v56 = vsel %vm5198_vm3, %v4249_v23, %v2197_v25  ;;  %v691_v39 = vrot.slane %v689_v59, 5 }
  0x5f   : > { %v4251_v34 = vrot.slane %v2161_v28, 9  ;;  %4585 = vmatmul.mubr.msk.bf16.vlgmr.msra.gmra.mrb[0].mxu0 %vm578_vm0, %v4263_v22  ;;  %v2201_v37 = vrot.slane %v1702_v31, 5  ;;  %v1704_v38 = vld [vmem:[#allocation2 + $0x3c] sm:$0x1]  ;;  %v696_v40 = vrot.slane %v694_v60, 4  ;;  %v697_v44 = vshll.u32 %v662_v51, 16 }
  0x60   : > { %4593 = vmatpush3.bf16.msra.mxu0 %v5140_v13  ;;  %v2205_v42 = vrot.slane %v1704_v38, 5  ;;  %v686_v43 = vor.u32 %v685_v36, %v682_v35  ;;  %v5252_v45 = vld [vmem:[#allocation2 + $0x14] sm:$0x1]  ;;  %v666_v49 = vld [vmem:[#allocation2 + $0x18] sm:$0xf]  ;;  %v703_v52 = vshll.u32 %v5243_v19, 16 }
  0x61   : > { %v2202_v50 = vsel %vm5198_vm3, %v4250_v27, %v2201_v37  ;;  %434 = vst [vmem:[#allocation2 + $0x44] sm:$0x1] %v433_v41  ;;  %v5257_v48 = vld [vmem:[#allocation2 + $0x1c] sm:$0x1]  ;;  %v708_v55 = vshrl.u32 %v664_v21, 16  ;;  %v711_v58 = vshll.u32 %v664_v21, 16 }
  0x62   : > { %v4264_v13 = vcombine.low %v2198_v56, %v2202_v50  ;;  %v5261_v16 = vsel %vm5198_vm3, %v4251_v34, %v2205_v42  ;;  %v687_v59 = vrot.slane %v686_v43, 4  ;;  %v699_v51 = vrot.slane %v697_v44, 5  ;;  %v2211_v1 = vld [vmem:[#allocation3 + $0x8] sm:$0xe]  ;;  %v2212_v7 = vld [vmem:[#allocation3 + $0x10] sm:$0xe] }
  0x63   : > { %v705_v60 = vrot.slane %v703_v52, 5  ;;  %v710_v62 = vrot.slane %v708_v55, 4  ;;  %v713_v63 = vrot.slane %v711_v58, 5  ;;  %v717_v0 = vshll.u32 %v5252_v45, 16  ;;  %v4281_v21 = vld [vmem:[%s5927_s1 + $0xc] sm:$0x3] }
  0x64   : > { %4588 = vmatprep.mubr.msk.bf16.mxu0 %vm578_vm0, %v4264_v13  ;;  %v2162_v54 = vld [vmem:[#allocation2 + $0x40] sm:$0xe]  ;;  %v692_v3 = vsel %vm5110_vm9, %v687_v59, %v691_v39  ;;  %v700_v4 = vor.u32 %v699_v51, %v696_v40  ;;  %v722_v5 = vshrl.u32 %v666_v49, 16  ;;  %v725_v6 = vshll.u32 %v666_v49, 16  ;;  %4804 = vmatprep.subr.msk.bf16.mxu0 %vm591_vm6, %v4281_v21  ;;  %v2213_v28 = vld [vmem:[#allocation3 + $0x18] sm:$0xe] }
  0x65   : > { %v4252_v9 = vrot.slane %v2162_v54, 9  ;;  %v714_v14 = vor.u32 %v713_v63, %v710_v62  ;;  %v719_v15 = vrot.slane %v717_v0, 5  ;;  %v731_v17 = vshll.u32 %v5257_v48, 16  ;;  %v2214_v35 = vld [vmem:[#allocation3 + $0x20] sm:$0xe] }
  0x66   : > { %v701_v22 = vrot.slane %v700_v4, 4  ;;  %v724_v23 = vrot.slane %v722_v5, 4  ;;  %v727_v25 = vrot.slane %v725_v6, 5  ;;  %v4253_v27 = vrot.slane %v2211_v1, 9  ;;  %v668_v41 = vld [vmem:[#allocation2 + $0x20] sm:$0xf] }
  0x67   : > { %v715_v31 = vrot.slane %v714_v14, 4  ;;  %v733_v33 = vrot.slane %v731_v17, 5  ;;  %v4254_v34 = vrot.slane %v2212_v7, 9  ;;  %v4255_v36 = vrot.slane %v2213_v28, 9  ;;  %v5284_v50 = vld [vmem:[#allocation2 + $0x24] sm:$0x1] }
  0x68   : > { %v1706_v56 = vld [vmem:[#allocation2 + $0x44] sm:$0x1]  ;;  %v706_v37 = vsel %vm5110_vm9, %v701_v22, %v705_v60  ;;  %v728_v38 = vor.u32 %v727_v25, %v724_v23  ;;  %v2238_v39 = vsel %vm5198_vm3, %v4253_v27, %v2237_v46  ;;  %v4256_v40 = vrot.slane %v2214_v35, 9  ;;  %v670_v11 = vld [vmem:[#allocation2 + $0x28] sm:$0xf] }
  0x69   : > { %v2209_v42 = vrot.slane %v1706_v56, 5  ;;  %v4150_v43 = vcombine.low %v692_v3, %v706_v37  ;;  %v720_v44 = vsel %vm5110_vm9, %v715_v31, %v719_v15  ;;  %v2242_v49 = vsel %vm5198_vm3, %v4254_v34, %v2241_v30  ;;  %v672_v29 = vld [vmem:[#allocation2 + $0x30] sm:$0xf]  ;;  %v5312_v62 = vld [vmem:[#allocation2 + $0x34] sm:$0x1] }
  0x6a   : > { %v729_v52 = vrot.slane %v728_v38, 4  ;;  %v4272_v55 = vcombine.low %v2238_v39, %v2242_v49  ;;  %v5290_v8 = vsel %vm5198_vm3, %v4255_v36, %v2245_v20  ;;  %v5296_v46 = vsel %vm5198_vm3, %v4256_v40, %v2249_v24  ;;  %v5306_v20 = vld [vmem:[#allocation2 + $0x2c] sm:$0x1]  ;;  %v674_v3 = vld [vmem:[#allocation2 + $0x38] sm:$0xf] }
  0x6b   : > { %v2210_v30 = vsel %vm5198_vm3, %v4252_v9, %v2209_v42  ;;  %4504 = vmatprep.mubr.msk.bf16.mxu1 %vm578_vm0, %v4150_v43  ;;  %v4273_v58 = vcombine.low %v5290_v8, %v5296_v46  ;;  %v5304_v26 = vsel %vm591_vm6, %v4281_v21, 0  ;;  %v736_v13 = vshrl.u32 %v668_v41, 16  ;;  %v2215_v21 = vld [vmem:[#allocation3 + $0x28] sm:$0xe]  ;;  %v2216_v28 = vld [vmem:[#allocation3 + $0x30] sm:$0xe] }
  0x6c   : > { %v4265_v59 = vcombine.low %v5261_v16, %v2210_v30  ;;  %v734_v24 = vsel %vm5110_vm9, %v729_v52, %v733_v33  ;;  %v739_v51 = vshll.u32 %v668_v41, 16  ;;  %v745_v60 = vshll.u32 %v5284_v50, 16  ;;  %v5316_v16 = vld [vmem:[#allocation2 + $0x3c] sm:$0x1]  ;;  %v2217_v39 = vld [vmem:[#allocation3 + $0x38] sm:$0xe] }
  0x6d   : > { %v4151_v63 = vcombine.low %v720_v44, %v734_v24  ;;  %v738_v0 = vrot.slane %v736_v13, 4  ;;  %v750_v1 = vshrl.u32 %v670_v11, 16  ;;  %v753_v54 = vshll.u32 %v670_v11, 16  ;;  %v791_v8 = vld [vmem:[#allocation3] sm:$0xf] }
  0x6e   : > { %4589 = vmatmul.mubr.msk.bf16.gmra.mrb[4].mxu0 %vm578_vm0, %v4265_v59  ;;  %v741_v4 = vrot.slane %v739_v51, 5  ;;  %v747_v5 = vrot.slane %v745_v60, 5  ;;  %v759_v6 = vshll.u32 %v5306_v20, 16  ;;  %v764_v7 = vshrl.u32 %v672_v29, 16  ;;  %v5333_v46 = vld [vmem:[%s5928_s2 + $0x30] sm:$0xff]  }
  0x6f   : > { %4505 = vmatmul.mubr.msk.bf16.vlgmr.msra.gmra.mrb[0].mxu1 %vm578_vm0, %v4151_v63  ;;  %4594 = vmatprep.mubr.msk.bf16.mxu0 %vm480_vm5, %v4272_v55  ;;  %v752_v9 = vrot.slane %v750_v1, 4  ;;  %v755_v14 = vrot.slane %v753_v54, 5  ;;  %v767_v15 = vshll.u32 %v672_v29, 16  ;;  %v773_v17 = vshll.u32 %v5312_v62, 16  ;;  %v5337_v59 = vld [vmem:[#allocation3 + $0x4] sm:$0x1] }
  0x70   : > { %4513 = vmatpush3.bf16.msra.mxu1 %v5210_v10  ;;  %v742_v22 = vor.u32 %v741_v4, %v738_v0  ;;  %v761_v23 = vrot.slane %v759_v6, 5  ;;  %v766_v25 = vrot.slane %v764_v7, 4  ;;  %v778_v27 = vshrl.u32 %v674_v3, 16  ;;  %v2218_v10 = vld [vmem:[#allocation3 + $0x40] sm:$0xe] }
  0x71   : > { %v756_v31 = vor.u32 %v755_v14, %v752_v9  ;;  %v769_v33 = vrot.slane %v767_v15, 5  ;;  %v775_v34 = vrot.slane %v773_v17, 5  ;;  %v781_v35 = vshll.u32 %v674_v3, 16  ;;  %v793_v57 = vld [vmem:[#allocation3 + $0x8] sm:$0xf] }
  0x72   : > { %v743_v36 = vrot.slane %v742_v22, 4  ;;  %v780_v56 = vrot.slane %v778_v27, 4  ;;  %v787_v37 = vshll.u32 %v5316_v16, 16  ;;  %v4257_v38 = vrot.slane %v2215_v21, 9  ;;  %v5343_v60 = vld [vmem:[#allocation3 + $0xc] sm:$0x1] }
  0x73   : > { %v757_v40 = vrot.slane %v756_v31, 4  ;;  %v770_v41 = vor.u32 %v769_v33, %v766_v25  ;;  %v783_v42 = vrot.slane %v781_v35, 5  ;;  %v4258_v43 = vrot.slane %v2216_v28, 9  ;;  %v4185_v63 = vld [vmem:[%s5927_s1 + $0x4] sm:$0x3] }
  0x74   : > { %v748_v44 = vsel %vm5110_vm9, %v743_v36, %v747_v5  ;;  %v789_v49 = vrot.slane %v787_v37, 5  ;;  %v2254_v52 = vsel %vm5198_vm3, %v4257_v38, %v2253_v53  ;;  %v2257_v55 = vrot.slane %v5126_v61, 5  ;;  %v795_v3 = vld [vmem:[#allocation3 + $0x10] sm:$0xf]  ;;  %v5352_v4 = vld [vmem:[#allocation3 + $0x14] sm:$0x1]  ;;  %4800 = vmatprep.subr.msk.bf16.mxu1 %vm591_vm6, %v4185_v63 }
  0x75   : > { %v762_v11 = vsel %vm5110_vm9, %v757_v40, %v761_v23  ;;  %v771_v30 = vrot.slane %v770_v41, 4  ;;  %v784_v13 = vor.u32 %v783_v42, %v780_v56  ;;  %v4259_v29 = vrot.slane %v2217_v39, 9  ;;  %v797_v23 = vld [vmem:[#allocation3 + $0x18] sm:$0xf]  ;;  %v4865_v33 = vld [vmem:[#allocation2 + $0x10] ss:$8 sps:$4 sm:$0xff]  }
  0x76   : > { %4595 = vmatmul.mubr.msk.bf16.vlgmr.msra.gmra.mrb[0].mxu0 %vm480_vm5, %v4273_v58  ;;  %v4152_v53 = vcombine.low %v748_v44, %v762_v11  ;;  %v2258_v61 = vsel %vm5198_vm3, %v4258_v43, %v2257_v55  ;;  %v2261_v24 = vrot.slane %v5135_v12, 5  ;;  %v4260_v51 = vrot.slane %v2218_v10, 9  ;;  %v5367_v35 = vld [vmem:[#allocation3 + $0x1c] sm:$0x1]  ;;  %v799_v42 = vld [vmem:[#allocation3 + $0x20] sm:$0xf] }
  0x77   : > { %4603 = vmatpush3.bf16.msra.mxu0 %v5304_v26  ;;  %v776_v0 = vsel %vm5110_vm9, %v771_v30, %v775_v34  ;;  %v785_v1 = vrot.slane %v784_v13, 4  ;;  %v4274_v58 = vcombine.low %v2254_v52, %v2258_v61  ;;  %v2265_v54 = vrot.slane %v5142_v18, 5  ;;  %v5373_v30 = vld [vmem:[#allocation3 + $0x24] sm:$0x1]  ;;  %v801_v61 = vld [vmem:[#allocation3 + $0x28] sm:$0xf] }
  0x78   : > { %4508 = vmatprep.mubr.msk.bf16.mxu1 %vm578_vm0, %v4152_v53  ;;  %v2262_v12 = vsel %vm5198_vm3, %v4259_v29, %v2261_v24  ;;  %v808_v5 = vshrl.u32 %v791_v8, 16  ;;  %v811_v6 = vshll.u32 %v791_v8, 16  ;;  %v817_v26 = vshll.u32 %v5337_v59, 16  ;;  %4612 = vmatprep.subr.bf16.mxu0 %v5333_v46  ;;  %v4867_v53 = vld [vmem:[#allocation2 + $0x20] ss:$8 sps:$4 sm:$0xff]  }
  0x79   : > { %v790_v7 = vsel %vm5110_vm9, %v785_v1, %v789_v49  ;;  %4598 = vmatprep.mubr.msk.bf16.mxu0 %vm480_vm5, %v4274_v58  ;;  %v2266_v18 = vsel %vm5198_vm3, %v4260_v51, %v2265_v54  ;;  %v822_v9 = vshrl.u32 %v793_v57, 16  ;;  %v825_v14 = vshll.u32 %v793_v57, 16  ;;  %v5378_v24 = vld [vmem:[#allocation3 + $0x2c] sm:$0x1] }
  0x7a   : > { %v4153_v15 = vcombine.low %v776_v0, %v790_v7  ;;  %v4275_v17 = vcombine.low %v2262_v12, %v2266_v18  ;;  %v810_v21 = vrot.slane %v808_v5, 4  ;;  %v813_v22 = vrot.slane %v811_v6, 5  ;;  %v5383_v7 = vld [vmem:[#allocation3 + $0x34] sm:$0x1] }
  0x7b   : > { %v819_v25 = vrot.slane %v817_v26, 5  ;;  %v824_v27 = vrot.slane %v822_v9, 4  ;;  %v827_v28 = vrot.slane %v825_v14, 5  ;;  %v831_v31 = vshll.u32 %v5343_v60, 16 }
  0x7c   : > { %4509 = vmatmul.mubr.msk.bf16.gmra.mrb[4].mxu1 %vm578_vm0, %v4153_v15  ;;  %v814_v34 = vor.u32 %v813_v22, %v810_v21  ;;  %v836_v36 = vshrl.u32 %v795_v3, 16  ;;  %v839_v56 = vshll.u32 %v795_v3, 16  ;;  %v845_v37 = vshll.u32 %v5352_v4, 16  ;;  %v803_v3 = vld [vmem:[#allocation3 + $0x30] sm:$0xf] }
  0x7d   : > { %v828_v38 = vor.u32 %v827_v28, %v824_v27  ;;  %v833_v39 = vrot.slane %v831_v31, 5  ;;  %v850_v40 = vshrl.u32 %v797_v23, 16  ;;  %v853_v41 = vshll.u32 %v797_v23, 16 }
  0x7e   : > { %4599 = vmatmul.mubr.msk.bf16.gmra.mrb[4].mxu0 %vm480_vm5, %v4275_v17  ;;  %v815_v43 = vrot.slane %v814_v34, 4  ;;  %v838_v10 = vrot.slane %v836_v36, 4  ;;  %v841_v44 = vrot.slane %v839_v56, 5  ;;  %v847_v49 = vrot.slane %v845_v37, 5  ;;  %v4868_v17 = vld [vmem:[#allocation2 + $0x30] ss:$8 sps:$4 sm:$0xff]  }
  0x7f   : > { %v829_v52 = vrot.slane %v828_v38, 4  ;;  %v852_v55 = vrot.slane %v850_v40, 4  ;;  %v855_v8 = vrot.slane %v853_v41, 5  ;;  %v859_v11 = vshll.u32 %v5367_v35, 16  ;;  %4604 = vmatprep.mubr.msk.bf16.mxu0 %vm578_vm0, %v4865_v33  ;;  %v5391_v34 = vld [vmem:[#allocation3 + $0x3c] sm:$0x1] }
  0x80   : > { %v820_v13 = vsel %vm5110_vm9, %v815_v43, %v819_v25  ;;  %v842_v29 = vor.u32 %v841_v44, %v838_v10  ;;  %v1269_v57 = vsel %vm591_vm6, %v4185_v63, 0  ;;  %v864_v51 = vshrl.u32 %v799_v42, 16  ;;  %v805_v63 = vld [vmem:[#allocation3 + $0x38] sm:$0xf]  ;;  %v5397_v40 = vld [vmem:[%s5928_s2 + $0x10] sm:$0xff]  }
  0x81   : > { %v834_v0 = vsel %vm5110_vm9, %v829_v52, %v833_v39  ;;  %v856_v1 = vor.u32 %v855_v8, %v852_v55  ;;  %v861_v58 = vrot.slane %v859_v11, 5  ;;  %v867_v54 = vshll.u32 %v799_v42, 16  ;;  %v1127_v39 = vld [vmem:[#allocation2] sm:$0xe]  ;;  %v1128_v8 = vld [vmem:[#allocation2 + $0x8] sm:$0xe] }
  0x82   : > { %v4160_v12 = vcombine.low %v820_v13, %v834_v0  ;;  %v843_v5 = vrot.slane %v842_v29, 4  ;;  %v866_v6 = vrot.slane %v864_v51, 4  ;;  %v873_v26 = vshll.u32 %v5373_v30, 16  ;;  %v4869_v55 = vld [vmem:[#allocation2 + $0x40] ss:$8 sps:$4 sm:$0xff]  }
  0x83   : > { %v857_v18 = vrot.slane %v856_v1, 4  ;;  %v869_v9 = vrot.slane %v867_v54, 5  ;;  %v878_v14 = vshrl.u32 %v801_v61, 16  ;;  %v881_v15 = vshll.u32 %v801_v61, 16 }
  0x84   : > { %4514 = vmatprep.mubr.msk.bf16.mxu1 %vm480_vm5, %v4160_v12  ;;  %v848_v21 = vsel %vm5110_vm9, %v843_v5, %v847_v49  ;;  %v875_v22 = vrot.slane %v873_v26, 5  ;;  %v887_v23 = vshll.u32 %v5378_v24, 16  ;;  %v892_v25 = vshrl.u32 %v803_v3, 16 }
  0x85   : > { %v862_v27 = vsel %vm5110_vm9, %v857_v18, %v861_v58  ;;  %v870_v28 = vor.u32 %v869_v9, %v866_v6  ;;  %v880_v31 = vrot.slane %v878_v14, 4  ;;  %v883_v33 = vrot.slane %v881_v15, 5  ;;  %v4871_v9 = vld [vmem:[#allocation3 + $0x10] ss:$8 sps:$4 sm:$0xff]  }
  0x86   : > { %v4161_v36 = vcombine.low %v848_v21, %v862_v27  ;;  %4605 = vmatmul.mubr.msk.bf16.vlgmr.msra.gmra.mrb[0].mxu0 %vm578_vm0, %v4867_v53  ;;  %v889_v56 = vrot.slane %v887_v23, 5  ;;  %v894_v37 = vrot.slane %v892_v25, 4  ;;  %v895_v38 = vshll.u32 %v803_v3, 16  ;;  %v1129_v53 = vld [vmem:[#allocation2 + $0x10] sm:$0xe] }
  0x87   : > { %4613 = vmatpush3.bf16.msra.mxu0 %v5333_v46  ;;  %v871_v41 = vrot.slane %v870_v28, 4  ;;  %v884_v42 = vor.u32 %v883_v33, %v880_v31  ;;  %v901_v43 = vshll.u32 %v5383_v7, 16  ;;  %v906_v10 = vshrl.u32 %v805_v63, 16  ;;  %4608 = vmatprep.mubr.msk.bf16.mxu0 %vm578_vm0, %v4868_v17  ;;  %v1130_v3 = vld [vmem:[#allocation2 + $0x18] sm:$0xe] }
  0x88   : > { %4515 = vmatmul.mubr.msk.bf16.vlgmr.msra.gmra.mrb[0].mxu1 %vm480_vm5, %v4161_v36  ;;  %v897_v44 = vrot.slane %v895_v38, 5  ;;  %v909_v49 = vshll.u32 %v805_v63, 16  ;;  %v915_v52 = vshll.u32 %v5391_v34, 16  ;;  %v4169_v29 = vrot.slane %v1127_v39, 9  ;;  %v4301_v17 = vld [vmem:[%s5927_s1 + $0xe] sm:$0x3] }
  0x89   : > { %4523 = vmatpush3.bf16.msra.mxu1 %v1269_v57  ;;  %v876_v11 = vsel %vm5110_vm9, %v871_v41, %v875_v22  ;;  %v885_v46 = vrot.slane %v884_v42, 4  ;;  %v908_v13 = vrot.slane %v906_v10, 4  ;;  %v903_v51 = vrot.slane %v901_v43, 5  ;;  %4805 = vmatprep.subr.msk.bf16.mxu0 %vm591_vm6, %v4301_v17  ;;  %v1131_v31 = vld [vmem:[#allocation2 + $0x20] sm:$0xe] }
  0x8a   : > { %v898_v61 = vor.u32 %v897_v44, %v894_v37  ;;  %v911_v0 = vrot.slane %v909_v49, 5  ;;  %v1156_v1 = vrot.slane %v5228_v47, 5  ;;  %4532 = vmatprep.subr.bf16.mxu1 %v5397_v40  ;;  %v4170_v54 = vrot.slane %v1128_v8, 9  ;;  %v1132_v33 = vld [vmem:[#allocation2 + $0x28] sm:$0xe] }
  0x8b   : > { %v890_v58 = vsel %vm5110_vm9, %v885_v46, %v889_v56  ;;  %v1160_v57 = vrot.slane %v5243_v19, 5  ;;  %v917_v26 = vrot.slane %v915_v52, 5  ;;  %v4171_v47 = vrot.slane %v1129_v53, 9  ;;  %v1133_v36 = vld [vmem:[#allocation2 + $0x30] sm:$0xe]  ;;  %v5447_v52 = vld [vmem:[%s5928_s2 + $0x38] sm:$0xff]  }
  0x8c   : > { %v4162_v12 = vcombine.low %v876_v11, %v890_v58  ;;  %v899_v5 = vrot.slane %v898_v61, 4  ;;  %v912_v6 = vor.u32 %v911_v0, %v908_v13  ;;  %v1157_v63 = vsel %vm5198_vm3, %v4169_v29, %v1156_v1  ;;  %v4873_v10 = vld [vmem:[#allocation3 + $0x30] ss:$8 sps:$4 sm:$0xff]   ;;  %v1187_v11 = vld [vmem:[#allocation3 + $0x8] sm:$0xe] }
  0x8d   : > { %v1161_v18 = vsel %vm5198_vm3, %v4170_v54, %v1160_v57  ;;  %v1164_v19 = vrot.slane %v5252_v45, 5  ;;  %v4172_v21 = vrot.slane %v1130_v3, 9  ;;  %v1168_v22 = vrot.slane %v5257_v48, 5  ;;  %v4872_v45 = vld [vmem:[#allocation3 + $0x20] ss:$8 sps:$4 sm:$0xff]  }
  0x8e   : > { %4518 = vmatprep.mubr.msk.bf16.mxu1 %vm480_vm5, %v4162_v12  ;;  %v904_v14 = vsel %vm5110_vm9, %v899_v5, %v903_v51  ;;  %v913_v15 = vrot.slane %v912_v6, 4  ;;  %4609 = vmatmul.mubr.msk.bf16.gmra.mrb[4].mxu0 %vm578_vm0, %v4869_v55  ;;  %v1172_v23 = vrot.slane %v5284_v50, 5  ;;  %v1176_v25 = vrot.slane %v5306_v20, 5  ;;  %v1134_v48 = vld [vmem:[#allocation2 + $0x38] sm:$0xe] }
  0x8f   : > { %4614 = vmatprep.mubr.msk.bf16.mxu0 %vm480_vm5, %v4871_v9  ;;  %v4186_v28 = vcombine.low %v1157_v63, %v1161_v18  ;;  %v4173_v37 = vrot.slane %v1131_v31, 9  ;;  %v4174_v38 = vrot.slane %v1132_v33, 9  ;;  %v4175_v39 = vrot.slane %v1133_v36, 9  ;;  %v1188_v29 = vld [vmem:[#allocation3 + $0x10] sm:$0xe] }
  0x90   : > { %v918_v27 = vsel %vm5110_vm9, %v913_v15, %v917_v26  ;;  %v1180_v41 = vrot.slane %v5312_v62, 5  ;;  %v4176_v42 = vrot.slane %v1134_v48, 9  ;;  %v1184_v50 = vrot.slane %v5316_v16, 5  ;;  %v1189_v61 = vld [vmem:[#allocation3 + $0x18] sm:$0xe] }
  0x91   : > { %v4163_v56 = vcombine.low %v904_v14, %v918_v27  ;;  %v1212_v20 = vrot.slane %v5337_v59, 5  ;;  %v1165_v43 = vsel %vm5198_vm3, %v4171_v47, %v1164_v19  ;;  %v1169_v44 = vsel %vm5198_vm3, %v4172_v21, %v1168_v22  ;;  %v1186_v59 = vld [vmem:[#allocation3] sm:$0xe]  ;;  %v5480_v26 = vld [vmem:[#allocation2 + $0x14] sm:$0x1] }
  0x92   : > { %v3000_v49 = vsel %vm591_vm6, %v4301_v17, 0  ;;  %v1173_v62 = vsel %vm5198_vm3, %v4173_v37, %v1172_v23  ;;  %v1177_v16 = vsel %vm5198_vm3, %v4174_v38, %v1176_v25  ;;  %v5451_v55 = vsel %vm5198_vm3, %v4175_v39, %v1180_v41  ;;  %v4874_v5 = vld [vmem:[#allocation3 + $0x40] ss:$8 sps:$4 sm:$0xff]   ;;  %v5482_v18 = vld [vmem:[#allocation2 + $0x1c] sm:$0x1] }
  0x93   : > { %4519 = vmatmul.mubr.msk.bf16.gmra.mrb[4].mxu1 %vm480_vm5, %v4163_v56  ;;  %v5455_v8 = vsel %vm5198_vm3, %v4176_v42, %v1184_v50  ;;  %v4177_v46 = vrot.slane %v1186_v59, 9  ;;  %v1216_v13 = vrot.slane %v5343_v60, 5  ;;  %v4178_v53 = vrot.slane %v1187_v11, 9  ;;  %v2717_v60 = vld [vmem:[#allocation2 + $0x10] sm:$0xf] }
  0x94   : > { %4524 = vmatprep.mubr.msk.bf16.mxu1 %vm578_vm0, %v4186_v28  ;;  %v4179_v51 = vrot.slane %v1188_v29, 9  ;;  %v1220_v0 = vrot.slane %v5352_v4, 5  ;;  %v1224_v1 = vrot.slane %v5367_v35, 5  ;;  %v4187_v58 = vcombine.low %v1165_v43, %v1169_v44  ;;  %v5478_v35 = vld [vmem:[%s5927_s1 + $0x6] sm:$0x3] }
  0x95   : > { %v5464_v54 = vsel %vm5198_vm3, %v4177_v46, %v1212_v20  ;;  %v4180_v57 = vrot.slane %v1189_v61, 9  ;;  %v1228_v3 = vrot.slane %v5373_v30, 5  ;;  %v4188_v12 = vcombine.low %v1173_v62, %v1177_v16  ;;  %v2719_v63 = vld [vmem:[#allocation2 + $0x18] sm:$0xf]  ;;  %v2721_v22 = vld [vmem:[#allocation2 + $0x20] sm:$0xf] }
  0x96   : > { %4615 = vmatmul.mubr.msk.bf16.vlgmr.msra.gmra.mrb[0].mxu0 %vm480_vm5, %v4872_v45  ;;  %v5469_v6 = vsel %vm5198_vm3, %v4178_v53, %v1216_v13  ;;  %v5473_v4 = vsel %vm5198_vm3, %v4179_v51, %v1220_v0  ;;  %v4189_v30 = vcombine.low %v5451_v55, %v5455_v8  ;;  %v2734_v9 = vshrl.u32 %v2717_v60, 16  ;;  %v5498_v45 = vld [vmem:[#allocation2 + $0x24] sm:$0x1]  ;;  %v2723_v56 = vld [vmem:[#allocation2 + $0x28] sm:$0xf] }
  0x97   : > { %4623 = vmatpush3.bf16.msra.mxu0 %v3000_v49  ;;  %4618 = vmatprep.mubr.msk.bf16.mxu0 %vm480_vm5, %v4873_v10  ;;  %v5489_v47 = vsel %vm5198_vm3, %v4180_v57, %v1224_v1  ;;  %v2737_v14 = vshll.u32 %v2717_v60, 16  ;;  %v4196_v15 = vcombine.low %v5464_v54, %v5469_v6  ;;  %v2743_v19 = vshll.u32 %v5480_v26, 16  ;;  %v5504_v39 = vld [vmem:[#allocation2 + $0x2c] sm:$0x1]  ;;  %v1190_v10 = vld [vmem:[#allocation3 + $0x20] sm:$0xe] }
  0x98   : > { %4632 = vmatprep.subr.bf16.mxu0 %v5447_v52  ;;  %v2748_v17 = vshrl.u32 %v2719_v63, 16  ;;  %v2751_v21 = vshll.u32 %v2719_v63, 16  ;;  %v4197_v23 = vcombine.low %v5473_v4, %v5489_v47  ;;  %v2736_v25 = vrot.slane %v2734_v9, 4  ;;  %v1191_v59 = vld [vmem:[#allocation3 + $0x28] sm:$0xe] }
  0x99   : > { %v2739_v27 = vrot.slane %v2737_v14, 5  ;;  %v2757_v28 = vshll.u32 %v5482_v18, 16  ;;  %v2745_v31 = vrot.slane %v2743_v19, 5  ;;  %v2762_v37 = vshrl.u32 %v2721_v22, 16  ;;  %v1192_v13 = vld [vmem:[#allocation3 + $0x30] sm:$0xe] }
  0x9a   : > { %v2750_v33 = vrot.slane %v2748_v17, 4  ;;  %v2753_v36 = vrot.slane %v2751_v21, 5  ;;  %v2765_v41 = vshll.u32 %v2721_v22, 16  ;;  %v2771_v42 = vshll.u32 %v5498_v45, 16  ;;  %v1193_v0 = vld [vmem:[#allocation3 + $0x38] sm:$0xe] }
  0x9b   : > { %4525 = vmatmul.mubr.msk.bf16.vlgmr.msra.gmra.mrb[0].mxu1 %vm578_vm0, %v4187_v58  ;;  %v2740_v38 = vor.u32 %v2739_v27, %v2736_v25  ;;  %v2759_v48 = vrot.slane %v2757_v28, 5  ;;  %v2764_v50 = vrot.slane %v2762_v37, 4  ;;  %v2776_v20 = vshrl.u32 %v2723_v56, 16  ;;  %v2725_v60 = vld [vmem:[#allocation2 + $0x30] sm:$0xf] }
  0x9c   : > { %4533 = vmatpush3.bf16.msra.mxu1 %v5397_v40  ;;  %4528 = vmatprep.mubr.msk.bf16.mxu1 %vm578_vm0, %v4188_v12  ;;  %v2754_v40 = vor.u32 %v2753_v36, %v2750_v33  ;;  %v2779_v43 = vshll.u32 %v2723_v56, 16  ;;  %v2767_v49 = vrot.slane %v2765_v41, 5  ;;  %v2773_v62 = vrot.slane %v2771_v42, 5  ;;  %v5516_v12 = vld [vmem:[#allocation2 + $0x34] sm:$0x1]  ;;  %v5549_v41 = vld [vmem:[%s5928_s2 + $0x18] sm:$0xff]  }
  0x9d   : > { %4801 = vmatprep.subr.msk.bf16.mxu1 %vm591_vm6, %v5478_v35  ;;  %v2741_v44 = vrot.slane %v2740_v38, 4  ;;  %v2785_v16 = vshll.u32 %v5504_v39, 16  ;;  %v2778_v8 = vrot.slane %v2776_v20, 4  ;;  %v4181_v46 = vrot.slane %v1190_v10, 9  ;;  %v2727_v14 = vld [vmem:[#allocation2 + $0x38] sm:$0xf] }
  0x9e   : > { %4619 = vmatmul.mubr.msk.bf16.gmra.mrb[4].mxu0 %vm480_vm5, %v4874_v5  ;;  %v2755_v55 = vrot.slane %v2754_v40, 4  ;;  %v2781_v11 = vrot.slane %v2779_v43, 5  ;;  %v2768_v53 = vor.u32 %v2767_v49, %v2764_v50  ;;  %v4182_v51 = vrot.slane %v1191_v59, 9  ;;  %v5524_v21 = vld [vmem:[#allocation2 + $0x3c] sm:$0x1] }
  0x9f   : > { %v2746_v29 = vsel %vm5110_vm9, %v2741_v44, %v2745_v31  ;;  %v2787_v61 = vrot.slane %v2785_v16, 5  ;;  %v1229_v54 = vsel %vm5198_vm3, %v4181_v46, %v1228_v3  ;;  %v1232_v57 = vrot.slane %v5378_v24, 5  ;;  %v5531_v27 = vld [vmem:[#allocation2 + $0x44] sm:$0x1]  ;;  %v2731_v36 = vld [vmem:[#allocation2 + $0x48] sm:$0xf] }
  0xa0   : > { %v2760_v1 = vsel %vm5110_vm9, %v2755_v55, %v2759_v48  ;;  %v2782_v58 = vor.u32 %v2781_v11, %v2778_v8  ;;  %v2769_v6 = vrot.slane %v2768_v53, 4  ;;  %v4183_v63 = vrot.slane %v1192_v13, 9  ;;  %v5544_v48 = vld [vmem:[#allocation2 + $0x4c] sm:$0x1]  ;;  %v5562_v4 = vld [vmem:[#allocation3 + $0x14] sm:$0x1] }
  0xa1   : > { %v4302_v5 = vcombine.low %v2746_v29, %v2760_v1  ;;  %v1236_v9 = vrot.slane %v5383_v7, 5  ;;  %v1233_v17 = vsel %vm5198_vm3, %v4182_v51, %v1232_v57  ;;  %v4184_v3 = vrot.slane %v1193_v0, 9  ;;  %v2845_v1 = vld [vmem:[#allocation3 + $0x10] sm:$0xf] }
  0xa2   : > { %v2783_v19 = vrot.slane %v2782_v58, 4  ;;  %v1240_v24 = vrot.slane %v5391_v34, 5  ;;  %v2774_v7 = vsel %vm5110_vm9, %v2769_v6, %v2773_v62  ;;  %v4198_v22 = vcombine.low %v1229_v54, %v1233_v17  ;;  %v5569_v6 = vld [vmem:[#allocation3 + $0x1c] sm:$0x1]  ;;  %v4337_v17 = vld [vmem:[%s5927_s1 + $0x10] sm:$0x3] }
  0xa3   : > { %4529 = vmatmul.mubr.msk.bf16.gmra.mrb[4].mxu1 %vm578_vm0, %v4189_v30  ;;  %4624 = vmatprep.mubr.msk.bf16.mxu0 %vm578_vm0, %v4302_v5  ;;  %v1502_v30 = vsel %vm591_vm6, %v5478_v35, 0  ;;  %v2790_v25 = vshrl.u32 %v2725_v60, 16  ;;  %v5537_v34 = vsel %vm5198_vm3, %v4183_v63, %v1236_v9  ;;  %v2793_v31 = vshll.u32 %v2725_v60, 16  ;;  %v4876_v60 = vld [vmem:[#allocation2 + $0x8] ss:$8 sps:$4 sm:$0xff]  }
  0xa4   : > { %4534 = vmatprep.mubr.msk.bf16.mxu1 %vm480_vm5, %v4196_v15  ;;  %v2729_v15 = vld [vmem:[#allocation2 + $0x40] sm:$0xf]  ;;  %v2788_v28 = vsel %vm5110_vm9, %v2783_v19, %v2787_v61  ;;  %v2799_v33 = vshll.u32 %v5516_v12, 16  ;;  %v5542_v56 = vsel %vm5198_vm3, %v4184_v3, %v1240_v24  ;;  %v2804_v38 = vshrl.u32 %v2727_v14, 16  ;;  %v2847_v5 = vld [vmem:[#allocation3 + $0x18] sm:$0xf] }
  0xa5   : > { %v4303_v35 = vcombine.low %v2774_v7, %v2788_v28  ;;  %v2792_v37 = vrot.slane %v2790_v25, 4  ;;  %v2795_v42 = vrot.slane %v2793_v31, 5  ;;  %v2807_v50 = vshll.u32 %v2727_v14, 16  ;;  %v5580_v31 = vld [vmem:[#allocation3 + $0x24] sm:$0x1] }
  0xa6   : > { %v2801_v40 = vrot.slane %v2799_v33, 5  ;;  %v2813_v20 = vshll.u32 %v5524_v21, 16  ;;  %v2806_v43 = vrot.slane %v2804_v38, 4  ;;  %v2818_v10 = vshrl.u32 %v2729_v15, 16 }
  0xa7   : > { %4625 = vmatmul.mubr.msk.bf16.vlgmr.msra.gmra.mrb[0].mxu0 %vm578_vm0, %v4303_v35  ;;  %v2821_v44 = vshll.u32 %v2729_v15, 16  ;;  %v2827_v49 = vshll.u32 %v5531_v27, 16  ;;  %v2796_v62 = vor.u32 %v2795_v42, %v2792_v37  ;;  %v2809_v16 = vrot.slane %v2807_v50, 5  ;;  %v2851_v37 = vld [vmem:[#allocation3 + $0x28] sm:$0xf] }
  0xa8   : > { %4633 = vmatpush3.bf16.msra.mxu0 %v5447_v52  ;;  %v2815_v59 = vrot.slane %v2813_v20, 5  ;;  %v2832_v55 = vshrl.u32 %v2731_v36, 16  ;;  %v2820_v8 = vrot.slane %v2818_v10, 4  ;;  %v2835_v13 = vshll.u32 %v2731_v36, 16 }
  0xa9   : > { %v2823_v11 = vrot.slane %v2821_v44, 5  ;;  %v2829_v46 = vrot.slane %v2827_v49, 5  ;;  %v2797_v29 = vrot.slane %v2796_v62, 4  ;;  %v2810_v53 = vor.u32 %v2809_v16, %v2806_v43  ;;  %4806 = vmatprep.subr.msk.bf16.mxu0 %vm591_vm6, %v4337_v17  ;;  %v5588_v44 = vld [vmem:[#allocation3 + $0x2c] sm:$0x1] }
  0xaa   : > { %v2834_v61 = vrot.slane %v2832_v55, 4  ;;  %v2841_v52 = vshll.u32 %v5544_v48, 16  ;;  %v2837_v0 = vrot.slane %v2835_v13, 5  ;;  %v3207_v47 = vrot.slane %v5480_v26, 5  ;;  %v4877_v62 = vld [vmem:[#allocation2 + $0x18] ss:$8 sps:$4 sm:$0xff]  }
  0xab   : > { %4535 = vmatmul.mubr.msk.bf16.vlgmr.msra.gmra.mrb[0].mxu1 %vm480_vm5, %v4197_v23  ;;  %v2824_v51 = vor.u32 %v2823_v11, %v2820_v8  ;;  %v4199_v23 = vcombine.low %v5537_v34, %v5542_v56  ;;  %v2802_v58 = vsel %vm5110_vm9, %v2797_v29, %v2801_v40  ;;  %v2811_v54 = vrot.slane %v2810_v53, 4 }
  0xac   : > { %4543 = vmatpush3.bf16.msra.mxu1 %v1502_v30  ;;  %4538 = vmatprep.mubr.msk.bf16.mxu1 %vm480_vm5, %v4198_v22  ;;  %v2843_v57 = vrot.slane %v2841_v52, 5  ;;  %v2838_v9 = vor.u32 %v2837_v0, %v2834_v61  ;;  %v2862_v14 = vshrl.u32 %v2845_v1, 16  ;;  %v2865_v19 = vshll.u32 %v2845_v1, 16  ;;  %v2849_v22 = vld [vmem:[#allocation3 + $0x20] sm:$0xf] }
  0xad   : > { %4552 = vmatprep.subr.bf16.mxu1 %v5549_v41  ;;  %v2825_v63 = vrot.slane %v2824_v51, 4  ;;  %v2816_v3 = vsel %vm5110_vm9, %v2811_v54, %v2815_v59  ;;  %v2871_v24 = vshll.u32 %v5562_v4, 16  ;;  %v2876_v30 = vshrl.u32 %v2847_v5, 16  ;;  %v4879_v0 = vld [vmem:[#allocation2 + $0x28] ss:$8 sps:$4 sm:$0xff]  }
  0xae   : > { %v2879_v7 = vshll.u32 %v2847_v5, 16  ;;  %v4304_v25 = vcombine.low %v2802_v58, %v2816_v3  ;;  %v2839_v28 = vrot.slane %v2838_v9, 4  ;;  %v2864_v34 = vrot.slane %v2862_v14, 4  ;;  %v2853_v54 = vld [vmem:[#allocation3 + $0x30] sm:$0xf] }
  0xaf   : > { %v2830_v15 = vsel %vm5110_vm9, %v2825_v63, %v2829_v46  ;;  %v2867_v33 = vrot.slane %v2865_v19, 5  ;;  %v2873_v36 = vrot.slane %v2871_v24, 5  ;;  %v2878_v35 = vrot.slane %v2876_v30, 4  ;;  %v2855_v14 = vld [vmem:[#allocation3 + $0x38] sm:$0xf] }
  0xb0   : > { %v2881_v56 = vrot.slane %v2879_v7, 5  ;;  %4628 = vmatprep.mubr.msk.bf16.mxu0 %vm578_vm0, %v4304_v25  ;;  %v2844_v38 = vsel %vm5110_vm9, %v2839_v28, %v2843_v57  ;;  %v2885_v42 = vshll.u32 %v5569_v6, 16  ;;  %v2890_v40 = vshrl.u32 %v2849_v22, 16  ;;  %v5598_v57 = vld [vmem:[#allocation3 + $0x34] sm:$0x1] }
  0xb1   : > { %v2893_v50 = vshll.u32 %v2849_v22, 16  ;;  %v4305_v20 = vcombine.low %v2830_v15, %v2844_v38  ;;  %v2868_v43 = vor.u32 %v2867_v33, %v2864_v34  ;;  %v2899_v49 = vshll.u32 %v5580_v31, 16  ;;  %v5601_v19 = vld [vmem:[#allocation3 + $0x3c] sm:$0x1]  ;;  %v2857_v7 = vld [vmem:[#allocation3 + $0x40] sm:$0xf] }
  0xb2   : > { %v2882_v10 = vor.u32 %v2881_v56, %v2878_v35  ;;  %v2887_v16 = vrot.slane %v2885_v42, 5  ;;  %v2892_v59 = vrot.slane %v2890_v40, 4  ;;  %v2904_v8 = vshrl.u32 %v2851_v37, 16  ;;  %v5609_v34 = vld [vmem:[#allocation3 + $0x44] sm:$0x1] }
  0xb3   : > { %4539 = vmatmul.mubr.msk.bf16.gmra.mrb[4].mxu1 %vm480_vm5, %v4199_v23  ;;  %v2895_v55 = vrot.slane %v2893_v50, 5  ;;  %4629 = vmatmul.mubr.msk.bf16.gmra.mrb[4].mxu0 %vm578_vm0, %v4305_v20  ;;  %v2869_v11 = vrot.slane %v2868_v43, 4  ;;  %v2901_v13 = vrot.slane %v2899_v49, 5  ;;  %v2907_v29 = vshll.u32 %v2851_v37, 16  ;;  %v2859_v37 = vld [vmem:[#allocation3 + $0x48] sm:$0xf] }
  0xb4   : > { %4544 = vmatprep.mubr.msk.bf16.mxu1 %vm578_vm0, %v4876_v60  ;;  %v2883_v46 = vrot.slane %v2882_v10, 4  ;;  %v2906_v61 = vrot.slane %v2904_v8, 4  ;;  %v2913_v52 = vshll.u32 %v5588_v44, 16  ;;  %v3320_v51 = vsel %vm591_vm6, %v4337_v17, 0  ;;  %v4880_v38 = vld [vmem:[#allocation2 + $0x38] ss:$8 sps:$4 sm:$0xff]  }
  0xb5   : > { %v2896_v53 = vor.u32 %v2895_v55, %v2892_v59  ;;  %v2874_v1 = vsel %vm5110_vm9, %v2869_v11, %v2873_v36  ;;  %v2909_v58 = vrot.slane %v2907_v29, 5  ;;  %v3211_v60 = vrot.slane %v5482_v18, 5  ;;  %v5613_v20 = vld [vmem:[#allocation3 + $0x4c] sm:$0x1] }
  0xb6   : > { %v2888_v23 = vsel %vm5110_vm9, %v2883_v46, %v2887_v16  ;;  %v2915_v9 = vrot.slane %v2913_v52, 5  ;;  %v2918_v3 = vshrl.u32 %v2853_v54, 16  ;;  %v2921_v24 = vshll.u32 %v2853_v54, 16  ;;  %v5621_v16 = vld [vmem:[%s5928_s2 + $0x40] sm:$0xff]  }
  0xb7   : > { %v4312_v5 = vcombine.low %v2874_v1, %v2888_v23  ;;  %v2897_v63 = vrot.slane %v2896_v53, 4  ;;  %v2910_v17 = vor.u32 %v2909_v58, %v2906_v61  ;;  %v2927_v30 = vshll.u32 %v5598_v57, 16  ;;  %v4881_v46 = vld [vmem:[#allocation3 + $0x8] ss:$8 sps:$4 sm:$0xff]  }
  0xb8   : > { %v2932_v25 = vshrl.u32 %v2855_v14, 16  ;;  %v2935_v15 = vshll.u32 %v2855_v14, 16  ;;  %v2941_v28 = vshll.u32 %v5601_v19, 16  ;;  %v2920_v36 = vrot.slane %v2918_v3, 4 }
  0xb9   : > { %4634 = vmatprep.mubr.msk.bf16.mxu0 %vm480_vm5, %v4312_v5  ;;  %v2902_v22 = vsel %vm5110_vm9, %v2897_v63, %v2901_v13  ;;  %v2911_v33 = vrot.slane %v2910_v17, 4  ;;  %v2923_v35 = vrot.slane %v2921_v24, 5  ;;  %v2929_v56 = vrot.slane %v2927_v30, 5  ;;  %v4225_v63 = vld [vmem:[%s5927_s1 + $0x8] sm:$0x3] }
  0xba   : > { %v2934_v42 = vrot.slane %v2932_v25, 4  ;;  %v2937_v40 = vrot.slane %v2935_v15, 5  ;;  %v2943_v50 = vrot.slane %v2941_v28, 5  ;;  %v2946_v43 = vshrl.u32 %v2857_v7, 16  ;;  %v3183_v25 = vld [vmem:[#allocation2 + $0x20] sm:$0xe] }
  0xbb   : > { %4545 = vmatmul.mubr.msk.bf16.vlgmr.msra.gmra.mrb[0].mxu1 %vm578_vm0, %v4877_v62  ;;  %v2916_v10 = vsel %vm5110_vm9, %v2911_v33, %v2915_v9  ;;  %v2924_v49 = vor.u32 %v2923_v35, %v2920_v36  ;;  %v2949_v62 = vshll.u32 %v2857_v7, 16  ;;  %v2960_v11 = vshrl.u32 %v2859_v37, 16  ;;  %v3181_v9 = vld [vmem:[#allocation2 + $0x10] sm:$0xe]  ;;  %v3184_v28 = vld [vmem:[#allocation2 + $0x28] sm:$0xe] }
  0xbc   : > { %4553 = vmatpush3.bf16.msra.mxu1 %v5549_v41  ;;  %4548 = vmatprep.mubr.msk.bf16.mxu1 %vm578_vm0, %v4879_v0  ;;  %v2955_v41 = vshll.u32 %v5609_v34, 16  ;;  %v4313_v59 = vcombine.low %v2902_v22, %v2916_v10  ;;  %v2938_v55 = vor.u32 %v2937_v40, %v2934_v42  ;;  %v2948_v8 = vrot.slane %v2946_v43, 4  ;;  %v4884_v42 = vld [vmem:[#allocation3 + $0x28] ss:$8 sps:$4 sm:$0xff]   ;;  %v3185_v43 = vld [vmem:[#allocation2 + $0x30] sm:$0xe] }
  0xbd   : > { %v2925_v13 = vrot.slane %v2924_v49, 4  ;;  %v2951_v29 = vrot.slane %v2949_v62, 5  ;;  %v2963_v61 = vshll.u32 %v2859_v37, 16  ;;  %v2962_v0 = vrot.slane %v2960_v11, 4  ;;  %4802 = vmatprep.subr.msk.bf16.mxu1 %vm591_vm6, %v4225_v63  ;;  %v3186_v10 = vld [vmem:[#allocation2 + $0x38] sm:$0xe] }
  0xbe   : > { %v2957_v53 = vrot.slane %v2955_v41, 5  ;;  %4635 = vmatmul.mubr.msk.bf16.vlgmr.msra.gmra.mrb[0].mxu0 %vm480_vm5, %v4313_v59  ;;  %v2939_v52 = vrot.slane %v2938_v55, 4  ;;  %v2969_v1 = vshll.u32 %v5613_v20, 16  ;;  %v3215_v23 = vrot.slane %v5498_v45, 5  ;;  %v3182_v45 = vld [vmem:[#allocation2 + $0x18] sm:$0xe] }
  0xbf   : > { %4643 = vmatpush3.bf16.msra.mxu0 %v3320_v51  ;;  %v2930_v58 = vsel %vm5110_vm9, %v2925_v13, %v2929_v56  ;;  %v2952_v54 = vor.u32 %v2951_v29, %v2948_v8  ;;  %v2965_v5 = vrot.slane %v2963_v61, 5  ;;  %v3219_v14 = vrot.slane %v5504_v39, 5  ;;  %v4882_v56 = vld [vmem:[#allocation3 + $0x18] ss:$8 sps:$4 sm:$0xff]   ;;  %v3187_v55 = vld [vmem:[#allocation2 + $0x40] sm:$0xe] }
  0xc0   : > { %v2944_v17 = vsel %vm5110_vm9, %v2939_v52, %v2943_v50  ;;  %v2971_v3 = vrot.slane %v2969_v1, 5  ;;  %v4321_v51 = vrot.slane %v3181_v9, 9  ;;  %v4322_v22 = vrot.slane %v3182_v45, 9  ;;  %4652 = vmatprep.subr.bf16.mxu0 %v5621_v16  ;;  %v3188_v8 = vld [vmem:[#allocation2 + $0x48] sm:$0xe] }
  0xc1   : > { %v4314_v24 = vcombine.low %v2930_v58, %v2944_v17  ;;  %v2953_v30 = vrot.slane %v2952_v54, 4  ;;  %v2966_v7 = vor.u32 %v2965_v5, %v2962_v0  ;;  %v1974_v15 = vsel %vm591_vm6, %v4225_v63, 0  ;;  %v1693_v61 = vld [vmem:[#allocation2 + $0x10] sm:$0xf]  ;;  %v1695_v1 = vld [vmem:[#allocation2 + $0x18] sm:$0xf] }
  0xc2   : > { %v3208_v39 = vsel %vm5198_vm3, %v4321_v51, %v3207_v47  ;;  %v4323_v33 = vrot.slane %v3183_v25, 9  ;;  %v3212_v37 = vsel %vm5198_vm3, %v4322_v22, %v3211_v60  ;;  %v4324_v26 = vrot.slane %v3184_v28, 9  ;;  %v4934_v58 = vld [vmem:[#allocation2 + $0xc] sm:$0x1]  ;;  %v1697_v17 = vld [vmem:[#allocation2 + $0x20] sm:$0xf] }
  0xc3   : > { %4549 = vmatmul.mubr.msk.bf16.gmra.mrb[4].mxu1 %vm578_vm0, %v4880_v38  ;;  %4638 = vmatprep.mubr.msk.bf16.mxu0 %vm480_vm5, %v4314_v24  ;;  %v2958_v36 = vsel %vm5110_vm9, %v2953_v30, %v2957_v53  ;;  %v2967_v35 = vrot.slane %v2966_v7, 4  ;;  %v4338_v38 = vcombine.low %v3208_v39, %v3212_v37  ;;  %v3223_v18 = vrot.slane %v5516_v12, 5  ;;  %v1691_v53 = vld [vmem:[#allocation2 + $0x8] sm:$0xf]  ;;  %v4935_v24 = vld [vmem:[#allocation2 + $0x14] sm:$0x1] }
  0xc4   : > { %4554 = vmatprep.mubr.msk.bf16.mxu1 %vm480_vm5, %v4881_v46  ;;  %v5652_v47 = vsel %vm5198_vm3, %v4323_v33, %v3215_v23  ;;  %v5658_v50 = vsel %vm5198_vm3, %v4324_v26, %v3219_v14  ;;  %v3227_v60 = vrot.slane %v5524_v21, 5  ;;  %v4325_v41 = vrot.slane %v3185_v43, 9  ;;  %v3237_v33 = vld [vmem:[#allocation3 + $0x10] sm:$0xe] }
  0xc5   : > { %v2972_v40 = vsel %vm5110_vm9, %v2967_v35, %v2971_v3  ;;  %v4339_v62 = vcombine.low %v5652_v47, %v5658_v50  ;;  %v4326_v59 = vrot.slane %v3186_v10, 9  ;;  %v4327_v11 = vrot.slane %v3187_v55, 9  ;;  %v4885_v3 = vld [vmem:[#allocation3 + $0x38] ss:$8 sps:$4 sm:$0xff]   ;;  %v4937_v10 = vld [vmem:[#allocation2 + $0x24] sm:$0x1] }
  0xc6   : > { %v4315_v49 = vcombine.low %v2958_v36, %v2972_v40  ;;  %v3231_v46 = vrot.slane %v5531_v27, 5  ;;  %v4328_v13 = vrot.slane %v3188_v8, 9  ;;  %v3235_v29 = vrot.slane %v5544_v48, 5  ;;  %v3238_v40 = vld [vmem:[#allocation3 + $0x18] sm:$0xe] }
  0xc7   : > { %v3224_v12 = vsel %vm5198_vm3, %v4325_v41, %v3223_v18  ;;  %v3228_v21 = vsel %vm5198_vm3, %v4326_v59, %v3227_v60  ;;  %v1708_v52 = vshrl.u32 %v1691_v53, 16  ;;  %v1711_v0 = vshll.u32 %v1691_v53, 16 }
  0xc8   : > { %4639 = vmatmul.mubr.msk.bf16.gmra.mrb[4].mxu0 %vm480_vm5, %v4315_v49  ;;  %v4340_v27 = vcombine.low %v3224_v12, %v3228_v21  ;;  %v5675_v48 = vsel %vm5198_vm3, %v4327_v11, %v3231_v46  ;;  %v5679_v23 = vsel %vm5198_vm3, %v4328_v13, %v3235_v29  ;;  %v1717_v54 = vshll.u32 %v4934_v58, 16  ;;  %v3239_v49 = vld [vmem:[#allocation3 + $0x20] sm:$0xe]  ;;  %v3240_v11 = vld [vmem:[#allocation3 + $0x28] sm:$0xe] }
  0xc9   : > { %4644 = vmatprep.mubr.msk.bf16.mxu0 %vm578_vm0, %v4338_v38  ;;  %v4341_v5 = vcombine.low %v5675_v48, %v5679_v23  ;;  %v1710_v63 = vrot.slane %v1708_v52, 4  ;;  %v1713_v9 = vrot.slane %v1711_v0, 5  ;;  %v1722_v14 = vshrl.u32 %v1693_v61, 16  ;;  %v1699_v52 = vld [vmem:[#allocation2 + $0x28] sm:$0xf] }
  0xca   : > { %v1719_v45 = vrot.slane %v1717_v54, 5  ;;  %v1725_v51 = vshll.u32 %v1693_v61, 16  ;;  %v1731_v30 = vshll.u32 %v4935_v24, 16  ;;  %v1736_v7 = vshrl.u32 %v1695_v1, 16  ;;  %v3241_v23 = vld [vmem:[#allocation3 + $0x30] sm:$0xe] }
  0xcb   : > { %4555 = vmatmul.mubr.msk.bf16.vlgmr.msra.gmra.mrb[0].mxu1 %vm480_vm5, %v4882_v56  ;;  %v1714_v22 = vor.u32 %v1713_v9, %v1710_v63  ;;  %v1724_v25 = vrot.slane %v1722_v14, 4  ;;  %v1739_v39 = vshll.u32 %v1695_v1, 16  ;;  %v1750_v37 = vshrl.u32 %v1697_v17, 16 }
  0xcc   : > { %4563 = vmatpush3.bf16.msra.mxu1 %v1974_v15  ;;  %4558 = vmatprep.mubr.msk.bf16.mxu1 %vm480_vm5, %v4884_v42  ;;  %v4936_v15 = vld [vmem:[#allocation2 + $0x1c] sm:$0x1]  ;;  %v1727_v36 = vrot.slane %v1725_v51, 5  ;;  %v1733_v35 = vrot.slane %v1731_v30, 5  ;;  %v1738_v56 = vrot.slane %v1736_v7, 4  ;;  %v1753_v42 = vshll.u32 %v1697_v17, 16 }
  0xcd   : > { %v1745_v28 = vshll.u32 %v4936_v15, 16  ;;  %v1715_v26 = vrot.slane %v1714_v22, 4  ;;  %v1741_v38 = vrot.slane %v1739_v39, 5  ;;  %v1752_v43 = vrot.slane %v1750_v37, 4  ;;  %v1703_v7 = vld [vmem:[#allocation2 + $0x38] sm:$0xf] }
  0xce   : > { %v1728_v50 = vor.u32 %v1727_v36, %v1724_v25  ;;  %v1759_v18 = vshll.u32 %v4937_v10, 16  ;;  %v4329_v60 = vrot.slane %v3237_v33, 9  ;;  %v1755_v55 = vrot.slane %v1753_v42, 5  ;;  %v4939_v37 = vld [vmem:[#allocation2 + $0x34] sm:$0x1] }
  0xcf   : > { %v1747_v47 = vrot.slane %v1745_v28, 5  ;;  %v1720_v41 = vsel %vm5110_vm9, %v1715_v26, %v1719_v45  ;;  %v1742_v59 = vor.u32 %v1741_v38, %v1738_v56  ;;  %v3263_v8 = vrot.slane %v5562_v4, 5  ;;  %v4938_v45 = vld [vmem:[#allocation2 + $0x2c] sm:$0x1]  ;;  %v1705_v28 = vld [vmem:[#allocation2 + $0x40] sm:$0xf] }
  0xd0   : > { %4645 = vmatmul.mubr.msk.bf16.vlgmr.msra.gmra.mrb[0].mxu0 %vm578_vm0, %v4339_v62  ;;  %v1729_v46 = vrot.slane %v1728_v50, 4  ;;  %v1761_v13 = vrot.slane %v1759_v18, 5  ;;  %v4330_v29 = vrot.slane %v3238_v40, 9  ;;  %v3267_v53 = vrot.slane %v5569_v6, 5  ;;  %v4940_v40 = vld [vmem:[#allocation2 + $0x3c] sm:$0x1] }
  0xd1   : > { %4653 = vmatpush3.bf16.msra.mxu0 %v5621_v16  ;;  %4648 = vmatprep.mubr.msk.bf16.mxu0 %vm578_vm0, %v4340_v27  ;;  %v1743_v62 = vrot.slane %v1742_v59, 4  ;;  %v1756_v12 = vor.u32 %v1755_v55, %v1752_v43  ;;  %v3264_v21 = vsel %vm5198_vm3, %v4329_v60, %v3263_v8  ;;  %v4331_v61 = vrot.slane %v3239_v49, 9  ;;  %v1701_v27 = vld [vmem:[#allocation2 + $0x30] sm:$0xf]  ;;  %v3242_v49 = vld [vmem:[#allocation3 + $0x38] sm:$0xe] }
  0xd2   : > { %v1734_v4 = vsel %vm5110_vm9, %v1729_v46, %v1733_v35  ;;  %v3268_v16 = vsel %vm5198_vm3, %v4330_v29, %v3267_v53  ;;  %v3271_v0 = vrot.slane %v5580_v31, 5  ;;  %v4332_v1 = vrot.slane %v3240_v11, 9 }
  0xd3   : > { %4559 = vmatmul.mubr.msk.bf16.gmra.mrb[4].mxu1 %vm480_vm5, %v4885_v3  ;;  %v4226_v58 = vcombine.low %v1720_v41, %v1734_v4  ;;  %v1748_v6 = vsel %vm5110_vm9, %v1743_v62, %v1747_v47  ;;  %v1757_v54 = vrot.slane %v1756_v12, 4  ;;  %v4348_v63 = vcombine.low %v3264_v21, %v3268_v16  ;;  %v3243_v62 = vld [vmem:[#allocation3 + $0x40] sm:$0xe]  ;;  %v3244_v4 = vld [vmem:[#allocation3 + $0x48] sm:$0xe] }
  0xd4   : > { %v3272_v9 = vsel %vm5198_vm3, %v4331_v61, %v3271_v0  ;;  %v3275_v14 = vrot.slane %v5588_v44, 5  ;;  %v1764_v17 = vshrl.u32 %v1699_v52, 16  ;;  %v1767_v3 = vshll.u32 %v1699_v52, 16 }
  0xd5   : > { %4564 = vmatprep.mubr.msk.bf16.mxu1 %vm578_vm0, %v4226_v58  ;;  %v1762_v31 = vsel %vm5110_vm9, %v1757_v54, %v1761_v13  ;;  %v1773_v51 = vshll.u32 %v4938_v45, 16  ;;  %v1778_v24 = vshrl.u32 %v1701_v27, 16  ;;  %v1781_v30 = vshll.u32 %v1701_v27, 16  ;;  %v4941_v13 = vld [vmem:[#allocation2 + $0x44] sm:$0x1] }
  0xd6   : > { %v4227_v22 = vcombine.low %v1748_v6, %v1762_v31  ;;  %v3276_v25 = vsel %vm5198_vm3, %v4332_v1, %v3275_v14  ;;  %v1766_v39 = vrot.slane %v1764_v17, 4  ;;  %v1769_v15 = vrot.slane %v1767_v3, 5 }
  0xd7   : > { %v4349_v44 = vcombine.low %v3272_v9, %v3276_v25  ;;  %v1775_v33 = vrot.slane %v1773_v51, 5  ;;  %v1780_v36 = vrot.slane %v1778_v24, 4  ;;  %v1783_v35 = vrot.slane %v1781_v30, 5 }
  0xd8   : > { %4649 = vmatmul.mubr.msk.bf16.gmra.mrb[4].mxu0 %vm578_vm0, %v4341_v5  ;;  %v1770_v56 = vor.u32 %v1769_v15, %v1766_v39  ;;  %v1787_v26 = vshll.u32 %v4939_v37, 16  ;;  %v1792_v38 = vshrl.u32 %v1703_v7, 16  ;;  %v1795_v47 = vshll.u32 %v1703_v7, 16 }
  0xd9   : > { %4654 = vmatprep.mubr.msk.bf16.mxu0 %vm480_vm5, %v4348_v63  ;;  %v1784_v42 = vor.u32 %v1783_v35, %v1780_v36  ;;  %v1801_v50 = vshll.u32 %v4940_v40, 16  ;;  %v1806_v43 = vshrl.u32 %v1705_v28, 16  ;;  %v1809_v48 = vshll.u32 %v1705_v28, 16 }
  0xda   : > { %v1771_v5 = vrot.slane %v1770_v56, 4  ;;  %v1789_v10 = vrot.slane %v1787_v26, 5  ;;  %v1794_v18 = vrot.slane %v1792_v38, 4  ;;  %v1797_v60 = vrot.slane %v1795_v47, 5 }
  0xdb   : > { %4565 = vmatmul.mubr.msk.bf16.vlgmr.msra.gmra.mrb[0].mxu1 %vm578_vm0, %v4227_v22  ;;  %v1785_v41 = vrot.slane %v1784_v42, 4  ;;  %v1803_v59 = vrot.slane %v1801_v50, 5  ;;  %v1808_v55 = vrot.slane %v1806_v43, 4  ;;  %v1811_v8 = vrot.slane %v1809_v48, 5  ;;  %v4357_v22 = vld [vmem:[%s5929_s3] ss:$0 sm:$0xff] }
  0xdc   : > { %v1776_v11 = vsel %vm5110_vm9, %v1771_v5, %v1775_v33  ;;  %v1798_v46 = vor.u32 %v1797_v60, %v1794_v18  ;;  %v1815_v29 = vshll.u32 %v4941_v13, 16  ;;  %v4333_v53 = vrot.slane %v3241_v23, 9 }
  0xdd   : > { %v1790_v12 = vsel %vm5110_vm9, %v1785_v41, %v1789_v10  ;;  %v1812_v21 = vor.u32 %v1811_v8, %v1808_v55  ;;  %v3279_v61 = vrot.slane %v5598_v57, 5  ;;  %v4334_v52 = vrot.slane %v3242_v49, 9 }
  0xde   : > { %v4228_v16 = vcombine.low %v1776_v11, %v1790_v12  ;;  %v1799_v0 = vrot.slane %v1798_v46, 4  ;;  %v1817_v1 = vrot.slane %v1815_v29, 5  ;;  %v3283_v27 = vrot.slane %v5601_v19, 5 }
  0xdf   : > { %v1813_v58 = vrot.slane %v1812_v21, 4  ;;  %v3280_v6 = vsel %vm5198_vm3, %v4333_v53, %v3279_v61  ;;  %v4335_v54 = vrot.slane %v3243_v62, 9  ;;  %v3287_v63 = vrot.slane %v5609_v34, 5  ;;  %v3556_v62 = vld [vmem:[#allocation4] sm:$0xff]  ;;  %v3557_v21 = vld [vmem:[#allocation4 + $0x8] sm:$0xff]  ;;  %v3558_v61 = vld [vmem:[#allocation4 + $0x10] sm:$0xff] }
  0xe0   : > { %4655 = vmatmul.mubr.msk.bf16.vlgmr.msra.gmra.mrb[0].mxu0 %vm480_vm5, %v4349_v44  ;;  %4568 = vmatprep.mubr.msk.bf16.mxu1 %vm578_vm0, %v4228_v16  ;;  %v1804_v57 = vsel %vm5110_vm9, %v1799_v0, %v1803_v59  ;;  %v3284_v9 = vsel %vm5198_vm3, %v4334_v52, %v3283_v27  ;;  %v4336_v14 = vrot.slane %v3244_v4, 9  ;;  %v3291_v19 = vrot.slane %v5613_v20, 5  ;;  %v3559_v52 = vld [vmem:[#allocation4 + $0x18] sm:$0xff]  ;;  %v3560_v4 = vld [vmem:[#allocation4 + $0x20] sm:$0xff]  ;;  %v3561_v16 = vld [vmem:[#allocation4 + $0x28] sm:$0xff] }
  0xe1   : > { %v1818_v17 = vsel %vm5110_vm9, %v1813_v58, %v1817_v1  ;;  %v4350_v3 = vcombine.low %v3280_v6, %v3284_v9  ;;  %v3288_v31 = vsel %vm5198_vm3, %v4335_v54, %v3287_v63  ;;  %v3562_v0 = vld [vmem:[#allocation4 + $0x30] sm:$0xff]  ;;  %v3563_v1 = vld [vmem:[#allocation4 + $0x38] sm:$0xff]  ;;  %vm3916_vm4 = vcmask 125952  }
  0xe2   : > { %v4229_v45 = vcombine.low %v1804_v57, %v1818_v17  ;;  %v3292_v34 = vsel %vm5198_vm3, %v4336_v14, %v3291_v19  ;;  %vm5869_vm7 = vmand %vm3916_vm4, %vm382_vm11 }
  0xe3   : > { %4658 = vmatprep.mubr.msk.bf16.mxu0 %vm480_vm5, %v4350_v3  ;;  %v4351_v51 = vcombine.low %v3288_v31, %v3292_v34 }
  0xe4   : > { %4569 = vmatmul.mubr.msk.bf16.gmra.mrb[4].mxu1 %vm578_vm0, %v4229_v45 }
  0xe8   : > { %4659 = vmatmul.mubr.msk.bf16.gmra.mrb[4].mxu0 %vm480_vm5, %v4351_v51 }
 0x1ae   : > { %v4566_v24 = vpop.f32.mrb[0].mxu1 }
 0x1af   : > { %v2010_v20 = vpop.f32.mrb[1].mxu1 }
 0x1b0   : > { %v4567_v30 = vpop.f32.mrb[2].mxu1 }
 0x1b1   : > { %v2013_v32 = vpop.f32.mrb[3].mxu1 }
 0x1b3   : > { %v4656_v7 = vpop.f32.mrb[0].mxu0 }
 0x1b4   : > { %v4662_v25 = vadd.f32 %v4656_v7, %v4566_v24  ;;  %v3462_v39 = vpop.f32.mrb[1].mxu0 }
 0x1b5   : > { %v4663_v2 = vadd.f32 %v3462_v39, %v2010_v20  ;;  %v4657_v15 = vpop.f32.mrb[2].mxu0 }
 0x1b6   : > { %v5743_v28 = vadd.f32 %v4662_v25, %v4357_v22  ;;  %v4664_v44 = vadd.f32 %v4657_v15, %v4567_v30  ;;  %v3465_v33 = vpop.f32.mrb[3].mxu0 }
 0x1b7   : > { %v5745_v36 = vadd.f32 %v4663_v2, %v4357_v22  ;;  %v4665_v35 = vadd.f32 %v3465_v33, %v2013_v32  ;;  %v4570_v56 = vpop.f32.mrb[4].mxu1 }
 0x1b8   : > { %4886 = vtanh.f32 %v5743_v28  ;;  %v3511_v37 = vadd.f32 %v4664_v44, %v4357_v22  ;;  %v2026_v26 = vpop.f32.mrb[5].mxu1  ;;  %v3518_v27 = vmul.f32 0.5, %v5743_v28 }
 0x1b9   : > { %4888 = vtanh.f32 %v5745_v36  ;;  %v4571_v38 = vpop.f32.mrb[6].mxu1  ;;  %v3509_v47 = vadd.f32 %v4665_v35, %v4357_v22  ;;  %v3516_v58 = vmul.f32 0.5, %v5745_v36 }
 0x1ba   : > { %v2029_v42 = vpop.f32.mrb[7].mxu1  ;;  %4890 = vtanh.f32 %v3511_v37  ;;  %v3519_v6 = vmul.f32 0.5, %v3511_v37 }
 0x1bb   : > { %v4660_v40 = vpop.f32.mrb[4].mxu0  ;;  %4892 = vtanh.f32 %v3509_v47  ;;  %v3517_v54 = vmul.f32 0.5, %v3509_v47 }
 0x1bc   : > { %v4666_v50 = vadd.f32 %v4660_v40, %v4570_v56  ;;  %v3478_v43 = vpop.f32.mrb[5].mxu0 }
 0x1bd   : > { %v4667_v48 = vadd.f32 %v3478_v43, %v2026_v26  ;;  %v4661_v23 = vpop.f32.mrb[6].mxu0 }
 0x1be   : > { %v4668_v5 = vadd.f32 %v4661_v23, %v4571_v38  ;;  %v3481_v10 = vpop.f32.mrb[7].mxu0  ;;  %v3514_v41 = vadd.f32 %v4666_v50, %v4357_v22 }
 0x1bf   : > { %v3512_v18 = vadd.f32 %v4667_v48, %v4357_v22  ;;  %v4669_v60 = vadd.f32 %v3481_v10, %v2029_v42 }
 0x1c0   : > { %v3515_v11 = vadd.f32 %v4668_v5, %v4357_v22  ;;  %v3522_v9 = vmul.f32 0.5, %v3514_v41 }
 0x1c1   : > { %4894 = vtanh.f32 %v3512_v18  ;;  %v3513_v55 = vadd.f32 %v4669_v60, %v4357_v22  ;;  %v3520_v63 = vmul.f32 0.5, %v3512_v18 }
 0x1c2   : > { %v4887_v49 = vpop.eup %4886  ;;  %4896 = vtanh.f32 %v3514_v41  ;;  %v3523_v31 = vmul.f32 0.5, %v3515_v11 }
 0x1c3   : > { %v4889_v59 = vpop.eup %4888  ;;  %3616 = vrot.lane.b32.xlu1 %v4887_v49, %s4984_s30  ;;  %4898 = vtanh.f32 %v3513_v55  ;;  %v3521_v14 = vmul.f32 0.5, %v3513_v55 }
 0x1c4   : > { %3612 = vrot.lane.b32.xlu0 %v4889_v59, %s4984_s30  ;;  %v4891_v8 = vpop.eup %4890  ;;  %4900 = vtanh.f32 %v3515_v11 }
 0x1c5   : > { %v4893_v46 = vpop.eup %4892  ;;  %4902 = vtanh.f32 %v3518_v27 }
 0x1c6   : > { %4904 = vtanh.f32 %v3516_v58 }
 0x1c7   : > { %3618 = vrot.lane.b32.xlu1 %v4891_v8, %s4984_s30  ;;  %4906 = vtanh.f32 %v3519_v6 }
 0x1c8   : > { %3614 = vrot.lane.b32.xlu0 %v4893_v46, %s4984_s30  ;;  %4908 = vtanh.f32 %v3517_v54 }
 0x1c9   : > { %4910 = vtanh.f32 %v3520_v63 }
 0x1ca   : > { %4912 = vtanh.f32 %v3522_v9 }
 0x1cb   : > { %v4895_v13 = vpop.eup %4894  ;;  %4914 = vtanh.f32 %v3521_v14 }
 0x1cc   : > { %3620 = vrot.lane.b32.xlu0 %v4895_v13, %s4984_s30  ;;  %v4897_v29 = vpop.eup %4896  ;;  %4916 = vtanh.f32 %v3523_v31 }
 0x1cd   : > { %v4899_v53 = vpop.eup %4898 }
 0x1ce   : > { %3622 = vrot.lane.b32.xlu1 %v4899_v53, %s4984_s30  ;;  %v4901_v12 = vpop.eup %4900 }
 0x1cf   : > { %v4903_v57 = vpop.eup %4902 }
 0x1d0   : > { %3624 = vrot.lane.b32.xlu0 %v4897_v29, %s4984_s30  ;;  %v3534_v19 = vadd.f32 1.0, %v4903_v57  ;;  %v4905_v17 = vpop.eup %4904 }
 0x1d1   : > { %v4907_v3 = vpop.eup %4906  ;;  %v3532_v34 = vadd.f32 1.0, %v4905_v17 }
 0x1d2   : > { %3626 = vrot.lane.b32.xlu1 %v4901_v12, %s4984_s30  ;;  %v5759_v45 = vmul.f32 0.5, %v3534_v19  ;;  %v3535_v24 = vadd.f32 1.0, %v4907_v3  ;;  %v4909_v20 = vpop.eup %4908 }
 0x1d3   : > { %v4911_v7 = vpop.eup %4910  ;;  %v5762_v22 = vmul.f32 0.5, %v3532_v34  ;;  %v3533_v39 = vadd.f32 1.0, %v4909_v20 }
 0x1d4   : > { %3572 = vrot.lane.b32.xlu0 %v3556_v62, %s4985_s5  ;;  %v5765_v25 = vmul.f32 0.5, %v3535_v24  ;;  %v4913_v28 = vpop.eup %4912  ;;  %v3536_v33 = vadd.f32 1.0, %v4911_v7 }
 0x1d5   : > { %v4915_v36 = vpop.eup %4914  ;;  %v5770_v56 = vmul.f32 0.5, %v3533_v39  ;;  %v3538_v47 = vadd.f32 1.0, %v4913_v28 }
 0x1d6   : > { %3574 = vrot.lane.b32.xlu1 %v3557_v21, %s4985_s5  ;;  %v5774_v26 = vmul.f32 0.5, %v3536_v33  ;;  %v3537_v38 = vadd.f32 1.0, %v4915_v36  ;;  %v4917_v42 = vpop.eup %4916 }
 0x1d7   : > { %v5781_v48 = vmul.f32 0.5, %v3538_v47  ;;  %v3539_v23 = vadd.f32 1.0, %v4917_v42 }
 0x1d8   : > { %3576 = vrot.lane.b32.xlu0 %v3558_v61, %s4985_s5  ;;  %v5778_v43 = vmul.f32 0.5, %v3537_v38 }
 0x1d9   : > { %v5785_v49 = vmul.f32 0.5, %v3539_v23 }
 0x1da   : > { %3578 = vrot.lane.b32.xlu1 %v3559_v52, %s4985_s5 }
 0x1dc   : > { %3580 = vrot.lane.b32.xlu0 %v3560_v4, %s4985_s5 }
 0x1de   : > { %3582 = vrot.lane.b32.xlu1 %v3561_v16, %s4985_s5 }
 0x1e0   : > { %3584 = vrot.lane.b32.xlu0 %v3562_v0, %s4985_s5 }
 0x1e2   : > { %3586 = vrot.lane.b32.xlu1 %v3563_v1, %s4985_s5 }
 0x235   : > { %v3617_v51 = vpop.permute.xlu1 %3616 }
 0x236   : > { %v3638_v30 = vmul.f32 %v3617_v51, %v5759_v45  ;;  %v3613_v32 = vpop.permute.xlu0 %3612 }
 0x237   : > { %v3636_v2 = vmul.f32 %v3613_v32, %v5762_v22 }
 0x238   : > { %3656 = vrot.lane.b32.xlu0 %v3638_v30, %s4985_s5 }
 0x239   : > { %v3619_v15 = vpop.permute.xlu1 %3618 }
 0x23a   : > { %v3639_v44 = vmul.f32 %v3619_v15, %v5765_v25  ;;  %v3615_v35 = vpop.permute.xlu0 %3614 }
 0x23b   : > { %v3637_v37 = vmul.f32 %v3615_v35, %v5770_v56 }
 0x23c   : > { %3652 = vrot.lane.b32.xlu0 %v3636_v2, %s4985_s5  ;;  %3658 = vrot.lane.b32.xlu1 %v3639_v44, %s4985_s5 }
 0x23e   : > { %v3621_v40 = vpop.permute.xlu0 %3620 }
 0x23f   : > { %v3640_v50 = vmul.f32 %v3621_v40, %v5774_v26 }
 0x240   : > { %3654 = vrot.lane.b32.xlu1 %v3637_v37, %s4985_s5  ;;  %v3623_v5 = vpop.permute.xlu1 %3622 }
 0x241   : > { %3660 = vrot.lane.b32.xlu0 %v3640_v50, %s4985_s5  ;;  %v3641_v18 = vmul.f32 %v3623_v5, %v5778_v43 }
 0x242   : > { %v3625_v10 = vpop.permute.xlu0 %3624 }
 0x243   : > { %v3642_v60 = vmul.f32 %v3625_v10, %v5781_v48 }
 0x244   : > { %3662 = vrot.lane.b32.xlu1 %v3641_v18, %s4985_s5  ;;  %v3627_v41 = vpop.permute.xlu1 %3626 }
 0x245   : > { %3664 = vrot.lane.b32.xlu0 %v3642_v60, %s4985_s5  ;;  %v3643_v59 = vmul.f32 %v3627_v41, %v5785_v49 }
 0x246   : > { %v3573_v55 = vpop.permute.xlu0 %3572 }
 0x247   : > { %v3596_v52 = vmul.f32 %v3573_v55, %v5762_v22 }
 0x248   : > { %3666 = vrot.lane.b32.xlu1 %v3643_v59, %s4985_s5  ;;  %v3575_v8 = vpop.permute.xlu1 %3574 }
 0x249   : > { %v3597_v58 = vmul.f32 %v3575_v8, %v5770_v56 }
 0x24a   : > { %v3577_v11 = vpop.permute.xlu0 %3576 }
 0x24b   : > { %v3598_v62 = vmul.f32 %v3577_v11, %v5759_v45 }
 0x24c   : > { %v3579_v46 = vpop.permute.xlu1 %3578 }
 0x24d   : > { %v3599_v4 = vmul.f32 %v3579_v46, %v5765_v25 }
 0x24e   : > { %v3581_v13 = vpop.permute.xlu0 %3580 }
 0x24f   : > { %v3600_v54 = vmul.f32 %v3581_v13, %v5774_v26 }
 0x250   : > { %v3583_v29 = vpop.permute.xlu1 %3582 }
 0x251   : > { %v3601_v19 = vmul.f32 %v3583_v29, %v5778_v43 }
 0x252   : > { %v3585_v53 = vpop.permute.xlu0 %3584 }
 0x253   : > { %v3602_v17 = vmul.f32 %v3585_v53, %v5781_v48 }
 0x254   : > { %v3587_v21 = vpop.permute.xlu1 %3586 }
 0x255   : > { %v3603_v30 = vmul.f32 %v3587_v21, %v5785_v49 }
 0x2aa   : > { %v3657_v12 = vpop.permute.xlu0 %3656 }
 0x2ab   : > { %v3678_v61 = vadd.f32 %v3657_v12, %v3598_v62 }
 0x2ad   : > { %4918 = vtanh.f32 %v3678_v61 }
 0x2ae   : > { %v3653_v16 = vpop.permute.xlu0 %3652  ;;  %v3659_v1 = vpop.permute.xlu1 %3658 }
 0x2af   : > { %v3676_v0 = vadd.f32 %v3653_v16, %v3596_v52  ;;  %v3679_v27 = vadd.f32 %v3659_v1, %v3599_v4 }
 0x2b1   : > { %4920 = vtanh.f32 %v3676_v0 }
 0x2b2   : > { %4922 = vtanh.f32 %v3679_v27  ;;  %v3655_v6 = vpop.permute.xlu1 %3654 }
 0x2b3   : > { %v3677_v63 = vadd.f32 %v3655_v6, %v3597_v58  ;;  %v3661_v57 = vpop.permute.xlu0 %3660 }
 0x2b4   : > { %v3680_v9 = vadd.f32 %v3661_v57, %v3600_v54 }
 0x2b5   : > { %4924 = vtanh.f32 %v3677_v63 }
 0x2b6   : > { %4926 = vtanh.f32 %v3680_v9  ;;  %v3663_v3 = vpop.permute.xlu1 %3662 }
 0x2b7   : > { %v4919_v14 = vpop.eup %4918  ;;  %v3665_v31 = vpop.permute.xlu0 %3664  ;;  %v3681_v34 = vadd.f32 %v3663_v3, %v3601_v19 }
 0x2b8   : > { %3704 = vrot.lane.b32.xlu0 %v4919_v14, %s4985_s5  ;;  %v3682_v51 = vadd.f32 %v3665_v31, %v3602_v17 }
 0x2b9   : > { %4928 = vtanh.f32 %v3681_v34 }
 0x2ba   : > { %4930 = vtanh.f32 %v3682_v51  ;;  %v3667_v32 = vpop.permute.xlu1 %3666 }
 0x2bb   : > { %v4921_v24 = vpop.eup %4920  ;;  %v3683_v7 = vadd.f32 %v3667_v32, %v3603_v30 }
 0x2bc   : > { %v4923_v20 = vpop.eup %4922  ;;  %3700 = vrot.lane.b32.xlu0 %v4921_v24, %s4985_s5 }
 0x2bd   : > { %3706 = vrot.lane.b32.xlu1 %v4923_v20, %s4985_s5  ;;  %4932 = vtanh.f32 %v3683_v7 }
 0x2bf   : > { %v4925_v39 = vpop.eup %4924 }
 0x2c0   : > { %v4927_v2 = vpop.eup %4926 }
 0x2c1   : > { %3702 = vrot.lane.b32.xlu1 %v4925_v39, %s4985_s5  ;;  %3708 = vrot.lane.b32.xlu0 %v4927_v2, %s4985_s5 }
 0x2c3   : > { %v4929_v15 = vpop.eup %4928 }
 0x2c4   : > { %v4931_v28 = vpop.eup %4930 }
 0x2c5   : > { %3710 = vrot.lane.b32.xlu1 %v4929_v15, %s4985_s5  ;;  %3712 = vrot.lane.b32.xlu0 %v4931_v28, %s4985_s5 }
 0x2c7   : > { %v4933_v44 = vpop.eup %4932 }
 0x2c9   : > { %3714 = vrot.lane.b32.xlu1 %v4933_v44, %s4985_s5  ;;  %3740 = vrot.lane.b32.xlu0 %v3676_v0, %s4986_s7 }
 0x2cd   : > { %3742 = vrot.lane.b32.xlu1 %v3677_v63, %s4986_s7  ;;  %3744 = vrot.lane.b32.xlu0 %v3678_v61, %s4986_s7 }
 0x2d1   : > { %3746 = vrot.lane.b32.xlu1 %v3679_v27, %s4986_s7  ;;  %3748 = vrot.lane.b32.xlu0 %v3680_v9, %s4986_s7 }
 0x2d5   : > { %3750 = vrot.lane.b32.xlu1 %v3681_v34, %s4986_s7  ;;  %3752 = vrot.lane.b32.xlu0 %v3682_v51, %s4986_s7 }
 0x2d9   : > { %3754 = vrot.lane.b32.xlu1 %v3683_v7, %s4986_s7 }
 0x32a   : > { %v3705_v33 = vpop.permute.xlu0 %3704 }
 0x32b   : > { %v3726_v36 = vmul.f32 %v3705_v33, %v5759_v45 }
 0x32d   : > { %v4378_v35 = vpack.c.bf16 %v3726_v36, %v3726_v36 }
 0x32e   : > { %v3701_v37 = vpop.permute.xlu0 %3700 }
 0x32f   : > { %v3821_v38 = vshrl.u32 %v4378_v35, 16  ;;  %v3724_v47 = vmul.f32 %v3701_v37, %v5762_v22  ;;  %v3707_v42 = vpop.permute.xlu1 %3706  ;;  %3996 = vrot.lane.b32.xlu0 %v4378_v35, %s4987_s8  ;;  %v3824_v8 = vshll.u32 %v4378_v35, 16 }
 0x330   : > { %v3727_v40 = vmul.f32 %v3707_v42, %v5765_v25 }
 0x331   : > { %v4376_v50 = vpack.c.bf16 %v3724_v47, %v3724_v47  ;;  %v3823_v23 = vrot.slane %v3821_v38, 7 }
 0x332   : > { %v4379_v5 = vpack.c.bf16 %v3727_v40, %v3727_v40 }
 0x333   : > { %v3805_v10 = vshrl.u32 %v4376_v50, 16  ;;  %v3703_v18 = vpop.permute.xlu1 %3702  ;;  %3992 = vrot.lane.b32.xlu0 %v4376_v50, %s4987_s8  ;;  %v3709_v41 = vpop.permute.xlu0 %3708  ;;  %v3827_v22 = vrot.slane %v3823_v23, 4  ;;  %v3826_v53 = vor.u32 %v3824_v8, %v3823_v23  ;;  %v3808_v62 = vshll.u32 %v4376_v50, 16 }
 0x334   : > { %v3725_v45 = vmul.f32 %v3703_v18, %v5770_v56  ;;  %3998 = vrot.lane.b32.xlu1 %v4379_v5, %s4987_s8  ;;  %v3829_v60 = vshrl.u32 %v4379_v5, 16  ;;  %v3728_v12 = vmul.f32 %v3709_v41, %v5774_v26  ;;  %v3832_v1 = vshll.u32 %v4379_v5, 16  ;;  %v3935_v18 = vld [vmem:[#allocation3 + $0x1c] sm:$0x1] }
 0x335   : > { %v3807_v59 = vrot.slane %v3805_v10, 7 }
 0x336   : > { %v4377_v55 = vpack.c.bf16 %v3725_v45, %v3725_v45  ;;  %v3831_v13 = vrot.slane %v3829_v60, 7 }
 0x337   : > { %3878 = vrot.lane.b32.xlu0 %v3827_v22, %s4987_s8  ;;  %v3711_v11 = vpop.permute.xlu1 %3710  ;;  %v3811_v46 = vrot.slane %v3807_v59, 4  ;;  %v3713_v29 = vpop.permute.xlu0 %3712  ;;  %v3810_v0 = vor.u32 %v3808_v62, %v3807_v59  ;;  %v3923_v22 = vld [vmem:[#allocation3 + $0xc] sm:$0x1] }
 0x338   : > { %3994 = vrot.lane.b32.xlu1 %v4377_v55, %s4987_s8  ;;  %v3813_v25 = vshrl.u32 %v4377_v55, 16  ;;  %v3730_v56 = vmul.f32 %v3713_v29, %v5781_v48  ;;  %v3835_v52 = vrot.slane %v3831_v13, 4  ;;  %v4380_v48 = vpack.c.bf16 %v3728_v12, %v3728_v12  ;;  %v3918_v29 = vld [vmem:[#allocation3 + $0x8] sm:$0xf] }
 0x339   : > { %v3834_v63 = vor.u32 %v3832_v1, %v3831_v13  ;;  %v3816_v57 = vshll.u32 %v4377_v55, 16  ;;  %v3729_v14 = vmul.f32 %v3711_v11, %v5778_v43  ;;  %v3932_v55 = vld [vmem:[#allocation3 + $0x18] sm:$0xf]  ;;  %v3941_v13 = vld [vmem:[#allocation3 + $0x24] sm:$0x1] }
 0x33a   : > { %v5820_v21 = vpack.c.bf16 %v3730_v56, %v3730_v56  ;;  %v3815_v4 = vrot.slane %v3813_v25, 7  ;;  %v3837_v9 = vshrl.u32 %v4380_v48, 16  ;;  %v3840_v44 = vshll.u32 %v4380_v48, 16  ;;  %v3926_v1 = vld [vmem:[#allocation3 + $0x10] sm:$0xf] }
 0x33b   : > { %3870 = vrot.lane.b32.xlu0 %v3811_v46, %s4987_s8  ;;  %v3715_v61 = vpop.permute.xlu1 %3714  ;;  %v3741_v16 = vpop.permute.xlu0 %3740  ;;  %v4381_v34 = vpack.c.bf16 %v3729_v14, %v3729_v14 }
 0x33c   : > { %3876 = vrot.lane.b32.xlu1 %v3826_v53, %s4987_s8  ;;  %3764 = vst.msk [vmem:[#allocation4] sm:$0xff] %vm480_vm5, %v3741_v16  ;;  %v3853_v27 = vshrl.u32 %v5820_v21, 16  ;;  %v3731_v58 = vmul.f32 %v3715_v61, %v5785_v49  ;;  %v3819_v6 = vrot.slane %v3815_v4, 4  ;;  %v3818_v31 = vor.u32 %v3816_v57, %v3815_v4  ;;  %v3938_v61 = vld [vmem:[#allocation3 + $0x20] sm:$0xf] }
 0x33d   : > { %v3839_v30 = vrot.slane %v3837_v9, 7  ;;  %v3856_v32 = vshll.u32 %v5820_v21, 16  ;;  %v3845_v7 = vshrl.u32 %v4381_v34, 16  ;;  %v3848_v42 = vshll.u32 %v4381_v34, 16  ;;  %v3947_v57 = vld [vmem:[#allocation3 + $0x2c] sm:$0x1] }
 0x33e   : > { %v4383_v19 = vpack.c.bf16 %v3731_v58, %v3731_v58  ;;  %v3855_v3 = vrot.slane %v3853_v27, 7  ;;  %v3956_v9 = vld [vmem:[#allocation3 + $0x38] sm:$0xf] }
 0x33f   : > { %3882 = vrot.lane.b32.xlu0 %v3835_v52, %s4987_s8  ;;  %v3743_v26 = vpop.permute.xlu1 %3742  ;;  %v3745_v54 = vpop.permute.xlu0 %3744  ;;  %v3843_v2 = vrot.slane %v3839_v30, 4  ;;  %v3847_v36 = vrot.slane %v3845_v7, 7  ;;  %v3842_v35 = vor.u32 %v3840_v44, %v3839_v30  ;;  %v3953_v30 = vld [vmem:[#allocation3 + $0x34] sm:$0x1] }
 0x340   : > { %3868 = vrot.lane.b32.xlu1 %v3810_v0, %s4987_s8  ;;  %3765 = vst.msk [vmem:[#allocation4 + $0x8] sm:$0xff] %vm480_vm5, %v3743_v26  ;;  %3766 = vst.msk [vmem:[#allocation4 + $0x10] sm:$0xff] %vm480_vm5, %v3745_v54  ;;  %v3861_v51 = vshrl.u32 %v4383_v19, 16  ;;  %v3859_v20 = vrot.slane %v3855_v3, 4  ;;  %v3858_v28 = vor.u32 %v3856_v32, %v3855_v3  ;;  %v3864_v37 = vshll.u32 %v4383_v19, 16 }
 0x341   : > { %v3851_v38 = vrot.slane %v3847_v36, 4  ;;  %v3850_v40 = vor.u32 %v3848_v42, %v3847_v36  ;;  %v3959_v26 = vld [vmem:[#allocation3 + $0x3c] sm:$0x1] }
 0x342   : > { %v3863_v15 = vrot.slane %v3861_v51, 7 }
 0x343   : > { %3874 = vrot.lane.b32.xlu0 %v3819_v6, %s4987_s8  ;;  %v3747_v17 = vpop.permute.xlu1 %3746  ;;  %v3749_v49 = vpop.permute.xlu0 %3748 }
 0x344   : > { %3880 = vrot.lane.b32.xlu1 %v3834_v63, %s4987_s8  ;;  %3767 = vst.msk [vmem:[#allocation4 + $0x18] sm:$0xff] %vm480_vm5, %v3747_v17  ;;  %3768 = vst.msk [vmem:[#allocation4 + $0x20] sm:$0xff] %vm480_vm5, %v3749_v49  ;;  %v3867_v33 = vrot.slane %v3863_v15, 4  ;;  %v3866_v47 = vor.u32 %v3864_v37, %v3863_v15  ;;  %v3965_v49 = vld [vmem:[#allocation3 + $0x44] sm:$0x1] }
 0x345   : > { %v3950_v15 = vld [vmem:[#allocation3 + $0x30] sm:$0xf] }
 0x347   : > { %4000 = vrot.lane.b32.xlu0 %v4380_v48, %s4987_s8  ;;  %v3751_v24 = vpop.permute.xlu1 %3750  ;;  %v3753_v43 = vpop.permute.xlu0 %3752 }
 0x348   : > { %3872 = vrot.lane.b32.xlu1 %v3818_v31, %s4987_s8  ;;  %3769 = vst.msk [vmem:[#allocation4 + $0x28] sm:$0xff] %vm480_vm5, %v3751_v24  ;;  %3770 = vst.msk [vmem:[#allocation4 + $0x30] sm:$0xff] %vm480_vm5, %v3753_v43  ;;  %v3944_v31 = vld [vmem:[#allocation3 + $0x28] sm:$0xf]  ;;  %v3962_v43 = vld [vmem:[#allocation3 + $0x40] sm:$0xf] }
 0x34b   : > { %3894 = vrot.lane.b32.xlu0 %v3859_v20, %s4987_s8  ;;  %v3755_v39 = vpop.permute.xlu1 %3754 }
 0x34c   : > { %4002 = vrot.lane.b32.xlu1 %v4381_v34, %s4987_s8  ;;  %3771 = vst.msk [vmem:[#allocation4 + $0x38] sm:$0xff] %vm480_vm5, %v3755_v39  ;;  %vm3921_vm5 = vcmask 122880  }
 0x34d   : > { %vm5859_vm6 = vmand %vm3921_vm5, %vm388_vm14 }
 0x34f   : > { %3886 = vrot.lane.b32.xlu0 %v3843_v2, %s4987_s8 }
 0x350   : > { %3892 = vrot.lane.b32.xlu1 %v3858_v28, %s4987_s8 }
 0x353   : > { %3898 = vrot.lane.b32.xlu0 %v3867_v33, %s4987_s8 }
 0x354   : > { %3884 = vrot.lane.b32.xlu1 %v3842_v35, %s4987_s8 }
 0x357   : > { %3890 = vrot.lane.b32.xlu0 %v3851_v38, %s4987_s8 }
 0x358   : > { %3896 = vrot.lane.b32.xlu1 %v3866_v47, %s4987_s8 }
 0x35b   : > { %4004 = vrot.lane.b32.xlu0 %v5820_v21, %s4987_s8  ;;  %v3929_v21 = vld [vmem:[#allocation3 + $0x14] sm:$0x1] }
 0x35c   : > { %3888 = vrot.lane.b32.xlu1 %v3850_v40, %s4987_s8 }
 0x360   : > { %4006 = vrot.lane.b32.xlu1 %v4383_v19, %s4987_s8 }
 0x3a1   : > { %v3997_v50 = vpop.permute.xlu0 %3996 }
 0x3a2   : > { %4019 = vst.msk [vmem:[%s5051_s6 + $0x8] sm:$0xf] %vm3916_vm4, %v3997_v50 }
 0x3a5   : > { %v3993_v23 = vpop.permute.xlu0 %3992 }
 0x3a6   : > { %4017 = vst.msk [vmem:[%s5051_s6] sm:$0xf] %vm3916_vm4, %v3993_v23  ;;  %v3999_v5 = vpop.permute.xlu1 %3998 }
 0x3a7   : > { %4020 = vst.msk [vmem:[%s5051_s6 + $0xc] sm:$0xf] %vm3916_vm4, %v3999_v5 }
 0x3a9   : > { %v3879_v45 = vpop.permute.xlu0 %3878 }
 0x3aa   : > { %v3936_v60 = vsel %vm5859_vm6, %v3879_v45, %v3935_v18  ;;  %v3995_v41 = vpop.permute.xlu1 %3994 }
 0x3ab   : > { %3937 = vst [vmem:[#allocation3 + $0x1c] sm:$0x1] %v3936_v60  ;;  %4018 = vst.msk [vmem:[%s5051_s6 + $0x4] sm:$0xf] %vm3916_vm4, %v3995_v41 }
 0x3ad   : > { %v3871_v8 = vpop.permute.xlu0 %3870 }
 0x3ae   : > { %v3924_v25 = vsel %vm5859_vm6, %v3871_v8, %v3923_v22  ;;  %v3877_v11 = vpop.permute.xlu1 %3876 }
 0x3af   : > { %3925 = vst [vmem:[#allocation3 + $0xc] sm:$0x1] %v3924_v25  ;;  %v3933_v46 = vsel %vm5869_vm7, %v3877_v11, %v3932_v55 }
 0x3b0   : > { %3934 = vst [vmem:[#allocation3 + $0x18] sm:$0xf] %v3933_v46 }
 0x3b1   : > { %v3883_v53 = vpop.permute.xlu0 %3882 }
 0x3b2   : > { %v3942_v56 = vsel %vm5859_vm6, %v3883_v53, %v3941_v13  ;;  %v3869_v62 = vpop.permute.xlu1 %3868 }
 0x3b3   : > { %3943 = vst [vmem:[#allocation3 + $0x24] sm:$0x1] %v3942_v56  ;;  %v3919_v12 = vsel %vm5869_vm7, %v3869_v62, %v3918_v29 }
 0x3b4   : > { %3920 = vst [vmem:[#allocation3 + $0x8] sm:$0xf] %v3919_v12 }
 0x3b5   : > { %v3875_v52 = vpop.permute.xlu0 %3874 }
 0x3b6   : > { %v3930_v4 = vsel %vm5859_vm6, %v3875_v52, %v3929_v21  ;;  %v3881_v16 = vpop.permute.xlu1 %3880 }
 0x3b7   : > { %3931 = vst [vmem:[#allocation3 + $0x14] sm:$0x1] %v3930_v4  ;;  %v3939_v0 = vsel %vm5869_vm7, %v3881_v16, %v3938_v61 }
 0x3b8   : > { %3940 = vst [vmem:[#allocation3 + $0x20] sm:$0xf] %v3939_v0 }
 0x3b9   : > { %v4001_v48 = vpop.permute.xlu0 %4000 }
 0x3ba   : > { %4021 = vst.msk [vmem:[%s5051_s6 + $0x10] sm:$0xf] %vm3916_vm4, %v4001_v48  ;;  %v3873_v27 = vpop.permute.xlu1 %3872 }
 0x3bb   : > { %v3927_v58 = vsel %vm5869_vm7, %v3873_v27, %v3926_v1 }
 0x3bc   : > { %3928 = vst [vmem:[#allocation3 + $0x10] sm:$0xf] %v3927_v58 }
 0x3bd   : > { %v3895_v6 = vpop.permute.xlu0 %3894 }
 0x3be   : > { %v3960_v54 = vsel %vm5859_vm6, %v3895_v6, %v3959_v26  ;;  %v4003_v63 = vpop.permute.xlu1 %4002 }
 0x3bf   : > { %3961 = vst [vmem:[#allocation3 + $0x3c] sm:$0x1] %v3960_v54  ;;  %4022 = vst.msk [vmem:[%s5051_s6 + $0x14] sm:$0xf] %vm3916_vm4, %v4003_v63 }
 0x3c1   : > { %v3887_v14 = vpop.permute.xlu0 %3886 }
 0x3c2   : > { %v3948_v19 = vsel %vm5859_vm6, %v3887_v14, %v3947_v57  ;;  %v3893_v17 = vpop.permute.xlu1 %3892 }
 0x3c3   : > { %3949 = vst [vmem:[#allocation3 + $0x2c] sm:$0x1] %v3948_v19  ;;  %v3957_v3 = vsel %vm5869_vm7, %v3893_v17, %v3956_v9 }
 0x3c4   : > { %3958 = vst [vmem:[#allocation3 + $0x38] sm:$0xf] %v3957_v3 }
 0x3c5   : > { %v3899_v34 = vpop.permute.xlu0 %3898 }
 0x3c6   : > { %v3966_v51 = vsel %vm5859_vm6, %v3899_v34, %v3965_v49  ;;  %v3885_v24 = vpop.permute.xlu1 %3884 }
 0x3c7   : > { %3967 = vst [vmem:[#allocation3 + $0x44] sm:$0x1] %v3966_v51  ;;  %v3945_v20 = vsel %vm5869_vm7, %v3885_v24, %v3944_v31 }
 0x3c8   : > { %3946 = vst [vmem:[#allocation3 + $0x28] sm:$0xf] %v3945_v20 }
 0x3c9   : > { %v3891_v32 = vpop.permute.xlu0 %3890 }
 0x3ca   : > { %v3954_v7 = vsel %vm5859_vm6, %v3891_v32, %v3953_v30  ;;  %v3897_v39 = vpop.permute.xlu1 %3896 }
 0x3cb   : > { %3955 = vst [vmem:[#allocation3 + $0x34] sm:$0x1] %v3954_v7  ;;  %v3963_v2 = vsel %vm5869_vm7, %v3897_v39, %v3962_v43 }
 0x3cc   : > { %3964 = vst [vmem:[#allocation3 + $0x40] sm:$0xf] %v3963_v2 }
 0x3cd   : > { %v4005_v28 = vpop.permute.xlu0 %4004 }
 0x3ce   : > { %4023 = vst.msk [vmem:[%s5051_s6 + $0x18] sm:$0xf] %vm3916_vm4, %v4005_v28  ;;  %v3889_v44 = vpop.permute.xlu1 %3888 }
 0x3cf   : > { %v3951_v33 = vsel %vm5869_vm7, %v3889_v44, %v3950_v15 }
 0x3d0   : > { %3952 = vst [vmem:[#allocation3 + $0x30] sm:$0xf] %v3951_v33 }
 0x3d2   : > { %v4007_v36 = vpop.permute.xlu1 %4006 }
 0x3d3   : > { %4024 = vst.msk [vmem:[%s5051_s6 + $0x1c] sm:$0xf] %vm3916_vm4, %v4007_v36 }
 0x3d4 PF: > { %s14_s19 = sadd.s32 1, %s4980_s19   ;;  %s5943_s15 = smov %s4972_s17 }
 0x3d5   : > { %p11_p8 = scmp.ge.s32.totalorder %s14_s19, 10   ;;  %s5944_s16 = smov %s4976_s18 }
 0x3d6   : > { %s5945_s17 = smov %s5948_s20  ;;  %s5946_s18 = smov %s5952_s21 }
 0x3d7   :  { %13 = sbr.rel (!%p11_p8) target bundleno = 3 (0x3), region = 90 }

</bundles_post_ra>
